<compile_context>
chip_gen: v7x
topology: tpu7x:2x2x1
jax: 0.10.0
libtpu: 0.0.40
codegen_flags: <defaults>
</compile_context>

<pallas_src>
import functools

import jax
import jax.numpy as jnp
from jax import lax
from jax.experimental import pallas as pl
from jax.experimental.pallas import tpu as pltpu


# ------------------------------------------------------------------ kernels --

def _conv3x3_bn_relu_kernel(xp_ref, w_ref, prs_ref, prb_ref, pos_ref, pob_ref,
                            o_ref, *, H, W, apply_pre, apply_post):
    """3x3 same-padding conv on one padded image, as 9 accumulating MXU taps.

    xp_ref : [1, H+2, W+2, Cin]  zero-padded input (bf16)
    w_ref  : [9, Cin, Cout]      conv weights, tap-major (bf16)
    prs/prb: [1, Cin]            folded-BN scale/shift applied BEFORE the conv (prologue)
    pos/pob: [1, Cout]           folded-BN scale/shift applied AFTER the conv (epilogue)
    o_ref  : [1, H*W, Cout]      conv output (bf16)
    """
    Hp, Wp = H + 2, W + 2
    cin = xp_ref.shape[-1]
    cout = o_ref.shape[-1]

    h = xp_ref[0].astype(jnp.float32)                              # [Hp, Wp, Cin]
    if apply_pre:
        # Pre-activation BN+ReLU fused into the conv. The halo must be re-zeroed
        # afterwards because relu(0*scale + shift) != 0 in general, and the halo
        # has to act as zero padding for the conv.
        h = jnp.maximum(h * prs_ref[...] + prb_ref[...], 0.0)
        rows = lax.broadcasted_iota(jnp.int32, (Hp, Wp, cin), 0)
        cols = lax.broadcasted_iota(jnp.int32, (Hp, Wp, cin), 1)
        interior = (rows >= 1) & (rows <= H) & (cols >= 1) & (cols <= W)
        h = jnp.where(interior, h, 0.0)

    # 9 accumulating taps: shifted reads of the VMEM-resident padded image.
    acc = jnp.zeros((H * W, cout), jnp.float32)
    for dy in range(3):
        for dx in range(3):
            tap = lax.slice(h, (dy, dx, 0), (dy + H, dx + W, cin))  # [H, W, Cin]
            tap2 = tap.reshape(H * W, cin).astype(jnp.bfloat16)
            acc = acc + jnp.dot(tap2, w_ref[dy * 3 + dx],
                                preferred_element_type=jnp.float32)

    if apply_post:
        acc = jnp.maximum(acc * pos_ref[...] + pob_ref[...], 0.0)
    o_ref[0] = acc.astype(o_ref.dtype)


def _attn_pool_kernel(feat_ref, scale_ref, shift_ref, wa_ref, ba_ref,
                      o_ref, acc_ref, *, inv_hw):
    """Fused final BN+ReLU -> 1x1-conv sigmoid attention -> global average pool.

    feat_ref   : [1, thw, C]   one HW tile of one image's features (bf16)
    scale/shift: [1, C]        folded final BN
    wa_ref     : [C, 1]        1x1 attention conv weight
    ba_ref     : [1, 1] SMEM   attention bias (scalar)
    o_ref      : [1, 1, C]     pooled features for this image (f32)
    acc_ref    : [1, C] f32    running weighted sum over HW tiles
    """
    t = pl.program_id(1)

    @pl.when(t == 0)
    def _():
        acc_ref[...] = jnp.zeros_like(acc_ref)

    f = feat_ref[0].astype(jnp.float32)                            # [thw, C]
    f = jnp.maximum(f * scale_ref[...] + shift_ref[...], 0.0)      # final BN + ReLU
    logits = jnp.dot(f, wa_ref[...],
                     preferred_element_type=jnp.float32) + ba_ref[0, 0]
    a = jax.nn.sigmoid(logits)                                     # [thw, 1] attention
    acc_ref[...] += jnp.sum(f * a, axis=0, keepdims=True)          # [1, C]

    @pl.when(t == pl.num_programs(1) - 1)
    def _():
        # TODO(synk): divides by HW (attention-masked spatial mean); verify against
        # the real global_pool semantics (vs dividing by sum of attention weights).
        o_ref[0] = acc_ref[...] * inv_hw


# ----------------------------------------------------------------- wrappers --

def conv3x3_bn_relu(x_nhwc, w9, pre_scale=None, pre_shift=None,
                    post_scale=None, post_shift=None):
    """(optional BN+ReLU) -> 3x3 same conv -> (optional BN+ReLU), one pallas_call."""
    N, H, W, Cin = x_nhwc.shape
    Cout = w9.shape[-1]
    apply_pre = pre_scale is not None
    apply_post = post_scale is not None
    if not apply_pre:
        pre_scale = jnp.ones((1, Cin), jnp.float32)
        pre_shift = jnp.zeros((1, Cin), jnp.float32)
    if not apply_post:
        post_scale = jnp.ones((1, Cout), jnp.float32)
        post_shift = jnp.zeros((1, Cout), jnp.float32)

    # Zero halo (bf16). ~1.27x copy of the activation, vs the previous 9x HBM im2col.
    xp = jnp.pad(x_nhwc.astype(jnp.bfloat16), ((0, 0), (1, 1), (1, 1), (0, 0)))

    # TODO(synk): per-image whole-block conv; for real CXR resolutions (224^2+) tile the
    # H axis with a halo instead of loading one full image block per grid step.
    kernel = functools.partial(_conv3x3_bn_relu_kernel, H=H, W=W,
                               apply_pre=apply_pre, apply_post=apply_post)
    out = pl.pallas_call(
        kernel,
        out_shape=jax.ShapeDtypeStruct((N, H * W, Cout), jnp.bfloat16),
        grid_spec=pltpu.PrefetchScalarGridSpec(
            num_scalar_prefetch=0,
            grid=(N,),
            in_specs=[
                pl.BlockSpec((1, H + 2, W + 2, Cin), lambda n: (n, 0, 0, 0)),
                pl.BlockSpec((9, Cin, Cout), lambda n: (0, 0, 0)),
                pl.BlockSpec((1, Cin), lambda n: (0, 0)),
                pl.BlockSpec((1, Cin), lambda n: (0, 0)),
                pl.BlockSpec((1, Cout), lambda n: (0, 0)),
                pl.BlockSpec((1, Cout), lambda n: (0, 0)),
            ],
            out_specs=pl.BlockSpec((1, H * W, Cout), lambda n: (n, 0, 0))),
        compiler_params=pltpu.CompilerParams(
            dimension_semantics=("parallel",)),
    )(xp, w9, pre_scale, pre_shift, post_scale, post_shift)
    return out.reshape(N, H, W, Cout)


def attn_pool(feat_nhwc, bn_scale, bn_shift, attn_w, attn_b, *, thw=128):
    """Final BN+ReLU + attention_map + global_pool, fused and HW-tiled."""
    N, H, W, C = feat_nhwc.shape
    HW = H * W
    if HW % thw != 0:
        thw = HW                      # fall back to one tile per image
    feat = feat_nhwc.reshape(N, HW, C)
    kernel = functools.partial(_attn_pool_kernel, inv_hw=1.0 / HW)
    out = pl.pallas_call(
        kernel,
        out_shape=jax.ShapeDtypeStruct((N, 1, C), jnp.float32),
        grid_spec=pltpu.PrefetchScalarGridSpec(
            num_scalar_prefetch=0,
            grid=(N, HW // thw),
            in_specs=[
                pl.BlockSpec((1, thw, C), lambda n, t: (n, t, 0)),
                pl.BlockSpec((1, C), lambda n, t: (0, 0)),
                pl.BlockSpec((1, C), lambda n, t: (0, 0)),
                pl.BlockSpec((C, 1), lambda n, t: (0, 0)),
                pl.BlockSpec(memory_space=pltpu.MemorySpace.SMEM),
            ],
            out_specs=pl.BlockSpec((1, 1, C), lambda n, t: (n, 0, 0)),
            scratch_shapes=[pltpu.VMEM((1, C), jnp.float32)]),
        compiler_params=pltpu.CompilerParams(
            dimension_semantics=("parallel", "arbitrary")),
    )(feat, bn_scale, bn_shift, attn_w, attn_b)
    return out.reshape(N, C)


# --------------------------------------------------------------------- glue --

def fold_bn(gamma, beta, mean, var, eps=1e-5):
    scale = gamma * lax.rsqrt(var + eps)
    shift = beta - mean * scale
    return (scale.reshape(1, -1).astype(jnp.float32),
            shift.reshape(1, -1).astype(jnp.float32))


def init_params(key, cin=3, stem=32, growth=16, n_layers=2):
    ks = jax.random.split(key, 5 + 2 * n_layers)

    def bn_params(k, c):
        k1, k2, k3 = jax.random.split(k, 3)
        gamma = 1.0 + 0.1 * jax.random.normal(k1, (c,), jnp.float32)
        beta = 0.1 * jax.random.normal(k2, (c,), jnp.float32)
        mean = 0.1 * jax.random.normal(k3, (c,), jnp.float32)
        var = jnp.ones((c,), jnp.float32)
        return fold_bn(gamma, beta, mean, var)

    def conv_w(k, ci, co):
        w = 0.1 * jax.random.normal(k, (co, ci, 3, 3), jnp.float32)   # PyTorch OIHW
        # Pre-transposed, tap-major [9, Cin, Cout] bf16 -- done once at init, not per forward.
        return jnp.transpose(w, (2, 3, 1, 0)).reshape(9, ci, co).astype(jnp.bfloat16)

    p = {}
    p['conv0_w'] = conv_w(ks[0], cin, stem)
    p['bn0'] = bn_params(ks[1], stem)
    c = stem
    for li in range(n_layers):
        p[f'dl{li}_bn'] = bn_params(ks[2 + 2 * li], c)
        p[f'dl{li}_conv_w'] = conv_w(ks[3 + 2 * li], c, growth)
        c += growth
    p['bn_final'] = bn_params(ks[2 + 2 * n_layers], c)
    p['attn_w'] = 0.1 * jax.random.normal(ks[3 + 2 * n_layers], (c, 1), jnp.float32)
    p['attn_b'] = 0.1 * jax.random.normal(ks[4 + 2 * n_layers], (1, 1), jnp.float32)
    return p, c


def densenet_cxr_bottom(x_nchw, params, n_layers=2):
    # NCHW -> NHWC (channels-last so C maps to the TPU lane dimension).
    x = jnp.transpose(x_nchw, (0, 2, 3, 1))

    # backbone: conv stem with BN0+ReLU fused as the conv epilogue.
    feat = conv3x3_bn_relu(x, params['conv0_w'],
                           post_scale=params['bn0'][0],
                           post_shift=params['bn0'][1])

    # backbone: dense block. Each layer's pre-activation BN+ReLU is fused into its
    # conv kernel as a prologue -- no separate BN kernel / activation HBM roundtrip.
    # TODO(synk): for deep dense blocks, replace the concat with a preallocated channel
    # slab written in place (input_output_aliases) to avoid O(L^2) re-copies.
    for li in range(n_layers):
        s, b = params[f'dl{li}_bn']
        new = conv3x3_bn_relu(feat, params[f'dl{li}_conv_w'],
                              pre_scale=s, pre_shift=b)
        feat = jnp.concatenate([feat, new], axis=-1)

    # final BN+ReLU + attention_map + global_pool(feat, []) fused into one kernel.
    s, b = params['bn_final']
    return attn_pool(feat, s, b, params['attn_w'], params['attn_b'])   # [N, C]


# --------------------------------------------------------------------- main --

if __name__ == "__main__":
    key = jax.random.PRNGKey(0)
    kx, kp = jax.random.split(key)

    N, Cin, H, W = 2, 3, 16, 16
    x = jax.random.normal(kx, (N, Cin, H, W), jnp.float32)     # NCHW like PyTorch

    params, c_out = init_params(kp, cin=Cin, stem=32, growth=16, n_layers=2)

    fwd = jax.jit(functools.partial(densenet_cxr_bottom, n_layers=2))
    out = jax.block_until_ready(fwd(x, params))

    assert out.shape == (N, c_out), out.shape
    assert bool(jnp.all(jnp.isfinite(out)))
    print("KERNEL_OK")
</pallas_src>

<mosaic_0001>
module attributes {stable_mosaic.version = 11 : i64} {
  func.func @_conv3x3_bn_relu_kernel(%arg0: i32, %arg1: memref<1x18x18x3xbf16, #tpu.memory_space<vmem>>, %arg2: memref<9x3x32xbf16, #tpu.memory_space<vmem>>, %arg3: memref<1x3xf32, #tpu.memory_space<vmem>>, %arg4: memref<1x3xf32, #tpu.memory_space<vmem>>, %arg5: memref<1x32xf32, #tpu.memory_space<vmem>>, %arg6: memref<1x32xf32, #tpu.memory_space<vmem>>, %arg7: memref<1x256x32xbf16, #tpu.memory_space<vmem>>) attributes {dimension_semantics = [#tpu.dimension_semantics<parallel>], iteration_bounds = array<i64: 2>, scalar_prefetch = 0 : i64, scratch_operands = 0 : i64, tpu.core_type = #tpu.core_type<tc>, window_params = [{transform_indices = @transform_0, window_bounds = array<i64: 1, 18, 18, 3>}, {pipeline_mode = #tpu.pipeline_mode<synchronous>, transform_indices = @transform_1, window_bounds = array<i64: 9, 3, 32>}, {pipeline_mode = #tpu.pipeline_mode<synchronous>, transform_indices = @transform_2, window_bounds = array<i64: 1, 3>}, {pipeline_mode = #tpu.pipeline_mode<synchronous>, transform_indices = @transform_3, window_bounds = array<i64: 1, 3>}, {pipeline_mode = #tpu.pipeline_mode<synchronous>, transform_indices = @transform_4, window_bounds = array<i64: 1, 32>}, {pipeline_mode = #tpu.pipeline_mode<synchronous>, transform_indices = @transform_5, window_bounds = array<i64: 1, 32>}, {transform_indices = @transform_6, window_bounds = array<i64: 1, 256, 32>}]} {
    %c0 = arith.constant 0 : index
    %c0_0 = arith.constant 0 : index
    %c0_1 = arith.constant 0 : index
    %c0_2 = arith.constant 0 : index
    %0 = vector.load %arg1[%c0, %c0_0, %c0_1, %c0_2] : memref<1x18x18x3xbf16, #tpu.memory_space<vmem>>, vector<1x18x18x3xbf16>
    %1 = vector.shape_cast %0 : vector<1x18x18x3xbf16> to vector<18x18x3xbf16>
    %2 = arith.extf %1 : vector<18x18x3xbf16> to vector<18x18x3xf32>
    %cst = arith.constant 0.000000e+00 : f32
    %3 = vector.broadcast %cst : f32 to vector<256x32xf32>
    %4 = vector.extract_strided_slice %2 {offsets = [0, 0, 0], sizes = [16, 16, 3], strides = [1, 1, 1]} : vector<18x18x3xf32> to vector<16x16x3xf32>
    %5 = vector.shape_cast %4 : vector<16x16x3xf32> to vector<256x3xf32>
    %6 = arith.truncf %5 : vector<256x3xf32> to vector<256x3xbf16>
    %c0_3 = arith.constant 0 : index
    %c0_4 = arith.constant 0 : index
    %c0_5 = arith.constant 0 : index
    %7 = vector.load %arg2[%c0_3, %c0_4, %c0_5] : memref<9x3x32xbf16, #tpu.memory_space<vmem>>, vector<1x3x32xbf16>
    %8 = vector.shape_cast %7 : vector<1x3x32xbf16> to vector<3x32xbf16>
    %cst_6 = arith.constant dense<0.000000e+00> : vector<256x32xf32>
    %9 = tpu.matmul %6, %8, %cst_6 {dimension_numbers = #tpu.dot_dimension_numbers<[1], [0], [0], [1], [0, 0, 1, 1], [], []>} : vector<256x3xbf16>, vector<3x32xbf16>, vector<256x32xf32> -> vector<256x32xf32>
    %10 = arith.addf %3, %9 : vector<256x32xf32>
    %11 = vector.extract_strided_slice %2 {offsets = [0, 1, 0], sizes = [16, 16, 3], strides = [1, 1, 1]} : vector<18x18x3xf32> to vector<16x16x3xf32>
    %12 = vector.shape_cast %11 : vector<16x16x3xf32> to vector<256x3xf32>
    %13 = arith.truncf %12 : vector<256x3xf32> to vector<256x3xbf16>
    %c1 = arith.constant 1 : index
    %c0_7 = arith.constant 0 : index
    %c0_8 = arith.constant 0 : index
    %14 = vector.load %arg2[%c1, %c0_7, %c0_8] : memref<9x3x32xbf16, #tpu.memory_space<vmem>>, vector<1x3x32xbf16>
    %15 = vector.shape_cast %14 : vector<1x3x32xbf16> to vector<3x32xbf16>
    %cst_9 = arith.constant dense<0.000000e+00> : vector<256x32xf32>
    %16 = tpu.matmul %13, %15, %cst_9 {dimension_numbers = #tpu.dot_dimension_numbers<[1], [0], [0], [1], [0, 0, 1, 1], [], []>} : vector<256x3xbf16>, vector<3x32xbf16>, vector<256x32xf32> -> vector<256x32xf32>
    %17 = arith.addf %10, %16 : vector<256x32xf32>
    %18 = vector.extract_strided_slice %2 {offsets = [0, 2, 0], sizes = [16, 16, 3], strides = [1, 1, 1]} : vector<18x18x3xf32> to vector<16x16x3xf32>
    %19 = vector.shape_cast %18 : vector<16x16x3xf32> to vector<256x3xf32>
    %20 = arith.truncf %19 : vector<256x3xf32> to vector<256x3xbf16>
    %c2 = arith.constant 2 : index
    %c0_10 = arith.constant 0 : index
    %c0_11 = arith.constant 0 : index
    %21 = vector.load %arg2[%c2, %c0_10, %c0_11] : memref<9x3x32xbf16, #tpu.memory_space<vmem>>, vector<1x3x32xbf16>
    %22 = vector.shape_cast %21 : vector<1x3x32xbf16> to vector<3x32xbf16>
    %cst_12 = arith.constant dense<0.000000e+00> : vector<256x32xf32>
    %23 = tpu.matmul %20, %22, %cst_12 {dimension_numbers = #tpu.dot_dimension_numbers<[1], [0], [0], [1], [0, 0, 1, 1], [], []>} : vector<256x3xbf16>, vector<3x32xbf16>, vector<256x32xf32> -> vector<256x32xf32>
    %24 = arith.addf %17, %23 : vector<256x32xf32>
    %25 = vector.extract_strided_slice %2 {offsets = [1, 0, 0], sizes = [16, 16, 3], strides = [1, 1, 1]} : vector<18x18x3xf32> to vector<16x16x3xf32>
    %26 = vector.shape_cast %25 : vector<16x16x3xf32> to vector<256x3xf32>
    %27 = arith.truncf %26 : vector<256x3xf32> to vector<256x3xbf16>
    %c3 = arith.constant 3 : index
    %c0_13 = arith.constant 0 : index
    %c0_14 = arith.constant 0 : index
    %28 = vector.load %arg2[%c3, %c0_13, %c0_14] : memref<9x3x32xbf16, #tpu.memory_space<vmem>>, vector<1x3x32xbf16>
    %29 = vector.shape_cast %28 : vector<1x3x32xbf16> to vector<3x32xbf16>
    %cst_15 = arith.constant dense<0.000000e+00> : vector<256x32xf32>
    %30 = tpu.matmul %27, %29, %cst_15 {dimension_numbers = #tpu.dot_dimension_numbers<[1], [0], [0], [1], [0, 0, 1, 1], [], []>} : vector<256x3xbf16>, vector<3x32xbf16>, vector<256x32xf32> -> vector<256x32xf32>
    %31 = arith.addf %24, %30 : vector<256x32xf32>
    %32 = vector.extract_strided_slice %2 {offsets = [1, 1, 0], sizes = [16, 16, 3], strides = [1, 1, 1]} : vector<18x18x3xf32> to vector<16x16x3xf32>
    %33 = vector.shape_cast %32 : vector<16x16x3xf32> to vector<256x3xf32>
    %34 = arith.truncf %33 : vector<256x3xf32> to vector<256x3xbf16>
    %c4 = arith.constant 4 : index
    %c0_16 = arith.constant 0 : index
    %c0_17 = arith.constant 0 : index
    %35 = vector.load %arg2[%c4, %c0_16, %c0_17] : memref<9x3x32xbf16, #tpu.memory_space<vmem>>, vector<1x3x32xbf16>
    %36 = vector.shape_cast %35 : vector<1x3x32xbf16> to vector<3x32xbf16>
    %cst_18 = arith.constant dense<0.000000e+00> : vector<256x32xf32>
    %37 = tpu.matmul %34, %36, %cst_18 {dimension_numbers = #tpu.dot_dimension_numbers<[1], [0], [0], [1], [0, 0, 1, 1], [], []>} : vector<256x3xbf16>, vector<3x32xbf16>, vector<256x32xf32> -> vector<256x32xf32>
    %38 = arith.addf %31, %37 : vector<256x32xf32>
    %39 = vector.extract_strided_slice %2 {offsets = [1, 2, 0], sizes = [16, 16, 3], strides = [1, 1, 1]} : vector<18x18x3xf32> to vector<16x16x3xf32>
    %40 = vector.shape_cast %39 : vector<16x16x3xf32> to vector<256x3xf32>
    %41 = arith.truncf %40 : vector<256x3xf32> to vector<256x3xbf16>
    %c5 = arith.constant 5 : index
    %c0_19 = arith.constant 0 : index
    %c0_20 = arith.constant 0 : index
    %42 = vector.load %arg2[%c5, %c0_19, %c0_20] : memref<9x3x32xbf16, #tpu.memory_space<vmem>>, vector<1x3x32xbf16>
    %43 = vector.shape_cast %42 : vector<1x3x32xbf16> to vector<3x32xbf16>
    %cst_21 = arith.constant dense<0.000000e+00> : vector<256x32xf32>
    %44 = tpu.matmul %41, %43, %cst_21 {dimension_numbers = #tpu.dot_dimension_numbers<[1], [0], [0], [1], [0, 0, 1, 1], [], []>} : vector<256x3xbf16>, vector<3x32xbf16>, vector<256x32xf32> -> vector<256x32xf32>
    %45 = arith.addf %38, %44 : vector<256x32xf32>
    %46 = vector.extract_strided_slice %2 {offsets = [2, 0, 0], sizes = [16, 16, 3], strides = [1, 1, 1]} : vector<18x18x3xf32> to vector<16x16x3xf32>
    %47 = vector.shape_cast %46 : vector<16x16x3xf32> to vector<256x3xf32>
    %48 = arith.truncf %47 : vector<256x3xf32> to vector<256x3xbf16>
    %c6 = arith.constant 6 : index
    %c0_22 = arith.constant 0 : index
    %c0_23 = arith.constant 0 : index
    %49 = vector.load %arg2[%c6, %c0_22, %c0_23] : memref<9x3x32xbf16, #tpu.memory_space<vmem>>, vector<1x3x32xbf16>
    %50 = vector.shape_cast %49 : vector<1x3x32xbf16> to vector<3x32xbf16>
    %cst_24 = arith.constant dense<0.000000e+00> : vector<256x32xf32>
    %51 = tpu.matmul %48, %50, %cst_24 {dimension_numbers = #tpu.dot_dimension_numbers<[1], [0], [0], [1], [0, 0, 1, 1], [], []>} : vector<256x3xbf16>, vector<3x32xbf16>, vector<256x32xf32> -> vector<256x32xf32>
    %52 = arith.addf %45, %51 : vector<256x32xf32>
    %53 = vector.extract_strided_slice %2 {offsets = [2, 1, 0], sizes = [16, 16, 3], strides = [1, 1, 1]} : vector<18x18x3xf32> to vector<16x16x3xf32>
    %54 = vector.shape_cast %53 : vector<16x16x3xf32> to vector<256x3xf32>
    %55 = arith.truncf %54 : vector<256x3xf32> to vector<256x3xbf16>
    %c7 = arith.constant 7 : index
    %c0_25 = arith.constant 0 : index
    %c0_26 = arith.constant 0 : index
    %56 = vector.load %arg2[%c7, %c0_25, %c0_26] : memref<9x3x32xbf16, #tpu.memory_space<vmem>>, vector<1x3x32xbf16>
    %57 = vector.shape_cast %56 : vector<1x3x32xbf16> to vector<3x32xbf16>
    %cst_27 = arith.constant dense<0.000000e+00> : vector<256x32xf32>
    %58 = tpu.matmul %55, %57, %cst_27 {dimension_numbers = #tpu.dot_dimension_numbers<[1], [0], [0], [1], [0, 0, 1, 1], [], []>} : vector<256x3xbf16>, vector<3x32xbf16>, vector<256x32xf32> -> vector<256x32xf32>
    %59 = arith.addf %52, %58 : vector<256x32xf32>
    %60 = vector.extract_strided_slice %2 {offsets = [2, 2, 0], sizes = [16, 16, 3], strides = [1, 1, 1]} : vector<18x18x3xf32> to vector<16x16x3xf32>
    %61 = vector.shape_cast %60 : vector<16x16x3xf32> to vector<256x3xf32>
    %62 = arith.truncf %61 : vector<256x3xf32> to vector<256x3xbf16>
    %c8 = arith.constant 8 : index
    %c0_28 = arith.constant 0 : index
    %c0_29 = arith.constant 0 : index
    %63 = vector.load %arg2[%c8, %c0_28, %c0_29] : memref<9x3x32xbf16, #tpu.memory_space<vmem>>, vector<1x3x32xbf16>
    %64 = vector.shape_cast %63 : vector<1x3x32xbf16> to vector<3x32xbf16>
    %cst_30 = arith.constant dense<0.000000e+00> : vector<256x32xf32>
    %65 = tpu.matmul %62, %64, %cst_30 {dimension_numbers = #tpu.dot_dimension_numbers<[1], [0], [0], [1], [0, 0, 1, 1], [], []>} : vector<256x3xbf16>, vector<3x32xbf16>, vector<256x32xf32> -> vector<256x32xf32>
    %66 = arith.addf %59, %65 : vector<256x32xf32>
    %c0_31 = arith.constant 0 : index
    %c0_32 = arith.constant 0 : index
    %67 = vector.load %arg5[%c0_31, %c0_32] : memref<1x32xf32, #tpu.memory_space<vmem>>, vector<1x32xf32>
    %68 = vector.broadcast %67 : vector<1x32xf32> to vector<256x32xf32>
    %69 = arith.mulf %66, %68 : vector<256x32xf32>
    %c0_33 = arith.constant 0 : index
    %c0_34 = arith.constant 0 : index
    %70 = vector.load %arg6[%c0_33, %c0_34] : memref<1x32xf32, #tpu.memory_space<vmem>>, vector<1x32xf32>
    %71 = vector.broadcast %70 : vector<1x32xf32> to vector<256x32xf32>
    %72 = arith.addf %69, %71 : vector<256x32xf32>
    %cst_35 = arith.constant 0.000000e+00 : f32
    %73 = vector.broadcast %cst_35 : f32 to vector<256x32xf32>
    %74 = arith.maximumf %72, %73 : vector<256x32xf32>
    %75 = arith.truncf %74 : vector<256x32xf32> to vector<256x32xbf16>
    %c0_36 = arith.constant 0 : index
    %c0_37 = arith.constant 0 : index
    %c0_38 = arith.constant 0 : index
    %76 = vector.load %arg7[%c0_36, %c0_37, %c0_38] : memref<1x256x32xbf16, #tpu.memory_space<vmem>>, vector<1x256x32xbf16>
    %77 = vector.shape_cast %76 : vector<1x256x32xbf16> to vector<256x32xbf16>
    %78 = vector.shape_cast %75 : vector<256x32xbf16> to vector<1x256x32xbf16>
    tpu.vector_store %arg7[%c0_36, %c0_37, %c0_38], %78 {strides = array<i32>} : memref<1x256x32xbf16, #tpu.memory_space<vmem>>, vector<1x256x32xbf16>,
    return
  }
  func.func @transform_0(%arg0: i32) -> (i32, i32, i32, i32) {
    %c0_i32 = arith.constant 0 : i32
    %c0_i32_0 = arith.constant 0 : i32
    %c0_i32_1 = arith.constant 0 : i32
    %c0_i32_2 = arith.constant 0 : i32
    return %arg0, %c0_i32, %c0_i32_0, %c0_i32_1 : i32, i32, i32, i32
  }
  func.func @transform_1(%arg0: i32) -> (i32, i32, i32) {
    %c0_i32 = arith.constant 0 : i32
    %c0_i32_0 = arith.constant 0 : i32
    %c0_i32_1 = arith.constant 0 : i32
    %c0_i32_2 = arith.constant 0 : i32
    return %c0_i32, %c0_i32_0, %c0_i32_1 : i32, i32, i32
  }
  func.func @transform_2(%arg0: i32) -> (i32, i32) {
    %c0_i32 = arith.constant 0 : i32
    %c0_i32_0 = arith.constant 0 : i32
    %c0_i32_1 = arith.constant 0 : i32
    return %c0_i32, %c0_i32_0 : i32, i32
  }
  func.func @transform_3(%arg0: i32) -> (i32, i32) {
    %c0_i32 = arith.constant 0 : i32
    %c0_i32_0 = arith.constant 0 : i32
    %c0_i32_1 = arith.constant 0 : i32
    return %c0_i32, %c0_i32_0 : i32, i32
  }
  func.func @transform_4(%arg0: i32) -> (i32, i32) {
    %c0_i32 = arith.constant 0 : i32
    %c0_i32_0 = arith.constant 0 : i32
    %c0_i32_1 = arith.constant 0 : i32
    return %c0_i32, %c0_i32_0 : i32, i32
  }
  func.func @transform_5(%arg0: i32) -> (i32, i32) {
    %c0_i32 = arith.constant 0 : i32
    %c0_i32_0 = arith.constant 0 : i32
    %c0_i32_1 = arith.constant 0 : i32
    return %c0_i32, %c0_i32_0 : i32, i32
  }
  func.func @transform_6(%arg0: i32) -> (i32, i32, i32) {
    %c0_i32 = arith.constant 0 : i32
    %c0_i32_0 = arith.constant 0 : i32
    %c0_i32_1 = arith.constant 0 : i32
    return %arg0, %c0_i32, %c0_i32_0 : i32, i32, i32
  }
}

module attributes {stable_mosaic.version = 11 : i64} {
  func.func @_conv3x3_bn_relu_kernel(%arg0: i32, %arg1: memref<1x18x18x32xbf16, #tpu.memory_space<vmem>>, %arg2: memref<9x32x16xbf16, #tpu.memory_space<vmem>>, %arg3: memref<1x32xf32, #tpu.memory_space<vmem>>, %arg4: memref<1x32xf32, #tpu.memory_space<vmem>>, %arg5: memref<1x16xf32, #tpu.memory_space<vmem>>, %arg6: memref<1x16xf32, #tpu.memory_space<vmem>>, %arg7: memref<1x256x16xbf16, #tpu.memory_space<vmem>>) attributes {dimension_semantics = [#tpu.dimension_semantics<parallel>], iteration_bounds = array<i64: 2>, scalar_prefetch = 0 : i64, scratch_operands = 0 : i64, tpu.core_type = #tpu.core_type<tc>, window_params = [{transform_indices = @transform_0, window_bounds = array<i64: 1, 18, 18, 32>}, {pipeline_mode = #tpu.pipeline_mode<synchronous>, transform_indices = @transform_1, window_bounds = array<i64: 9, 32, 16>}, {pipeline_mode = #tpu.pipeline_mode<synchronous>, transform_indices = @transform_2, window_bounds = array<i64: 1, 32>}, {pipeline_mode = #tpu.pipeline_mode<synchronous>, transform_indices = @transform_3, window_bounds = array<i64: 1, 32>}, {pipeline_mode = #tpu.pipeline_mode<synchronous>, transform_indices = @transform_4, window_bounds = array<i64: 1, 16>}, {pipeline_mode = #tpu.pipeline_mode<synchronous>, transform_indices = @transform_5, window_bounds = array<i64: 1, 16>}, {transform_indices = @transform_6, window_bounds = array<i64: 1, 256, 16>}]} {
    %c0 = arith.constant 0 : index
    %c0_0 = arith.constant 0 : index
    %c0_1 = arith.constant 0 : index
    %c0_2 = arith.constant 0 : index
    %0 = vector.load %arg1[%c0, %c0_0, %c0_1, %c0_2] : memref<1x18x18x32xbf16, #tpu.memory_space<vmem>>, vector<1x18x18x32xbf16>
    %1 = vector.shape_cast %0 : vector<1x18x18x32xbf16> to vector<18x18x32xbf16>
    %2 = arith.extf %1 : vector<18x18x32xbf16> to vector<18x18x32xf32>
    %c0_3 = arith.constant 0 : index
    %c0_4 = arith.constant 0 : index
    %3 = vector.load %arg3[%c0_3, %c0_4] : memref<1x32xf32, #tpu.memory_space<vmem>>, vector<1x32xf32>
    %4 = vector.shape_cast %3 : vector<1x32xf32> to vector<1x1x32xf32>
    %5 = vector.broadcast %4 : vector<1x1x32xf32> to vector<18x18x32xf32>
    %6 = arith.mulf %2, %5 : vector<18x18x32xf32>
    %c0_5 = arith.constant 0 : index
    %c0_6 = arith.constant 0 : index
    %7 = vector.load %arg4[%c0_5, %c0_6] : memref<1x32xf32, #tpu.memory_space<vmem>>, vector<1x32xf32>
    %8 = vector.shape_cast %7 : vector<1x32xf32> to vector<1x1x32xf32>
    %9 = vector.broadcast %8 : vector<1x1x32xf32> to vector<18x18x32xf32>
    %10 = arith.addf %6, %9 : vector<18x18x32xf32>
    %cst = arith.constant 0.000000e+00 : f32
    %11 = vector.broadcast %cst : f32 to vector<18x18x32xf32>
    %12 = arith.maximumf %10, %11 : vector<18x18x32xf32>
    %13 = tpu.iota {dimensions = array<i32: 0>} : vector<18x18x32xi32>
    %14 = tpu.iota {dimensions = array<i32: 1>} : vector<18x18x32xi32>
    %c1_i32 = arith.constant 1 : i32
    %15 = vector.broadcast %c1_i32 : i32 to vector<18x18x32xi32>
    %16 = arith.cmpi sge, %13, %15 : vector<18x18x32xi32>
    %c16_i32 = arith.constant 16 : i32
    %17 = vector.broadcast %c16_i32 : i32 to vector<18x18x32xi32>
    %18 = arith.cmpi sle, %13, %17 : vector<18x18x32xi32>
    %19 = arith.andi %16, %18 : vector<18x18x32xi1>
    %c1_i32_7 = arith.constant 1 : i32
    %20 = vector.broadcast %c1_i32_7 : i32 to vector<18x18x32xi32>
    %21 = arith.cmpi sge, %14, %20 : vector<18x18x32xi32>
    %22 = arith.andi %19, %21 : vector<18x18x32xi1>
    %c16_i32_8 = arith.constant 16 : i32
    %23 = vector.broadcast %c16_i32_8 : i32 to vector<18x18x32xi32>
    %24 = arith.cmpi sle, %14, %23 : vector<18x18x32xi32>
    %25 = arith.andi %22, %24 : vector<18x18x32xi1>
    %cst_9 = arith.constant 0.000000e+00 : f32
    %26 = vector.broadcast %cst_9 : f32 to vector<18x18x32xf32>
    %27 = arith.select %25, %12, %26 : vector<18x18x32xi1>, vector<18x18x32xf32>
    %cst_10 = arith.constant 0.000000e+00 : f32
    %28 = vector.broadcast %cst_10 : f32 to vector<256x16xf32>
    %29 = vector.extract_strided_slice %27 {offsets = [0, 0, 0], sizes = [16, 16, 32], strides = [1, 1, 1]} : vector<18x18x32xf32> to vector<16x16x32xf32>
    %30 = vector.shape_cast %29 : vector<16x16x32xf32> to vector<256x32xf32>
    %31 = arith.truncf %30 : vector<256x32xf32> to vector<256x32xbf16>
    %c0_11 = arith.constant 0 : index
    %c0_12 = arith.constant 0 : index
    %c0_13 = arith.constant 0 : index
    %32 = vector.load %arg2[%c0_11, %c0_12, %c0_13] : memref<9x32x16xbf16, #tpu.memory_space<vmem>>, vector<1x32x16xbf16>
    %33 = vector.shape_cast %32 : vector<1x32x16xbf16> to vector<32x16xbf16>
    %cst_14 = arith.constant dense<0.000000e+00> : vector<256x16xf32>
    %34 = tpu.matmul %31, %33, %cst_14 {dimension_numbers = #tpu.dot_dimension_numbers<[1], [0], [0], [1], [0, 0, 1, 1], [], []>} : vector<256x32xbf16>, vector<32x16xbf16>, vector<256x16xf32> -> vector<256x16xf32>
    %35 = arith.addf %28, %34 : vector<256x16xf32>
    %36 = vector.extract_strided_slice %27 {offsets = [0, 1, 0], sizes = [16, 16, 32], strides = [1, 1, 1]} : vector<18x18x32xf32> to vector<16x16x32xf32>
    %37 = vector.shape_cast %36 : vector<16x16x32xf32> to vector<256x32xf32>
    %38 = arith.truncf %37 : vector<256x32xf32> to vector<256x32xbf16>
    %c1 = arith.constant 1 : index
    %c0_15 = arith.constant 0 : index
    %c0_16 = arith.constant 0 : index
    %39 = vector.load %arg2[%c1, %c0_15, %c0_16] : memref<9x32x16xbf16, #tpu.memory_space<vmem>>, vector<1x32x16xbf16>
    %40 = vector.shape_cast %39 : vector<1x32x16xbf16> to vector<32x16xbf16>
    %cst_17 = arith.constant dense<0.000000e+00> : vector<256x16xf32>
    %41 = tpu.matmul %38, %40, %cst_17 {dimension_numbers = #tpu.dot_dimension_numbers<[1], [0], [0], [1], [0, 0, 1, 1], [], []>} : vector<256x32xbf16>, vector<32x16xbf16>, vector<256x16xf32> -> vector<256x16xf32>
    %42 = arith.addf %35, %41 : vector<256x16xf32>
    %43 = vector.extract_strided_slice %27 {offsets = [0, 2, 0], sizes = [16, 16, 32], strides = [1, 1, 1]} : vector<18x18x32xf32> to vector<16x16x32xf32>
    %44 = vector.shape_cast %43 : vector<16x16x32xf32> to vector<256x32xf32>
    %45 = arith.truncf %44 : vector<256x32xf32> to vector<256x32xbf16>
    %c2 = arith.constant 2 : index
    %c0_18 = arith.constant 0 : index
    %c0_19 = arith.constant 0 : index
    %46 = vector.load %arg2[%c2, %c0_18, %c0_19] : memref<9x32x16xbf16, #tpu.memory_space<vmem>>, vector<1x32x16xbf16>
    %47 = vector.shape_cast %46 : vector<1x32x16xbf16> to vector<32x16xbf16>
    %cst_20 = arith.constant dense<0.000000e+00> : vector<256x16xf32>
    %48 = tpu.matmul %45, %47, %cst_20 {dimension_numbers = #tpu.dot_dimension_numbers<[1], [0], [0], [1], [0, 0, 1, 1], [], []>} : vector<256x32xbf16>, vector<32x16xbf16>, vector<256x16xf32> -> vector<256x16xf32>
    %49 = arith.addf %42, %48 : vector<256x16xf32>
    %50 = vector.extract_strided_slice %27 {offsets = [1, 0, 0], sizes = [16, 16, 32], strides = [1, 1, 1]} : vector<18x18x32xf32> to vector<16x16x32xf32>
    %51 = vector.shape_cast %50 : vector<16x16x32xf32> to vector<256x32xf32>
    %52 = arith.truncf %51 : vector<256x32xf32> to vector<256x32xbf16>
    %c3 = arith.constant 3 : index
    %c0_21 = arith.constant 0 : index
    %c0_22 = arith.constant 0 : index
    %53 = vector.load %arg2[%c3, %c0_21, %c0_22] : memref<9x32x16xbf16, #tpu.memory_space<vmem>>, vector<1x32x16xbf16>
    %54 = vector.shape_cast %53 : vector<1x32x16xbf16> to vector<32x16xbf16>
    %cst_23 = arith.constant dense<0.000000e+00> : vector<256x16xf32>
    %55 = tpu.matmul %52, %54, %cst_23 {dimension_numbers = #tpu.dot_dimension_numbers<[1], [0], [0], [1], [0, 0, 1, 1], [], []>} : vector<256x32xbf16>, vector<32x16xbf16>, vector<256x16xf32> -> vector<256x16xf32>
    %56 = arith.addf %49, %55 : vector<256x16xf32>
    %57 = vector.extract_strided_slice %27 {offsets = [1, 1, 0], sizes = [16, 16, 32], strides = [1, 1, 1]} : vector<18x18x32xf32> to vector<16x16x32xf32>
    %58 = vector.shape_cast %57 : vector<16x16x32xf32> to vector<256x32xf32>
    %59 = arith.truncf %58 : vector<256x32xf32> to vector<256x32xbf16>
    %c4 = arith.constant 4 : index
    %c0_24 = arith.constant 0 : index
    %c0_25 = arith.constant 0 : index
    %60 = vector.load %arg2[%c4, %c0_24, %c0_25] : memref<9x32x16xbf16, #tpu.memory_space<vmem>>, vector<1x32x16xbf16>
    %61 = vector.shape_cast %60 : vector<1x32x16xbf16> to vector<32x16xbf16>
    %cst_26 = arith.constant dense<0.000000e+00> : vector<256x16xf32>
    %62 = tpu.matmul %59, %61, %cst_26 {dimension_numbers = #tpu.dot_dimension_numbers<[1], [0], [0], [1], [0, 0, 1, 1], [], []>} : vector<256x32xbf16>, vector<32x16xbf16>, vector<256x16xf32> -> vector<256x16xf32>
    %63 = arith.addf %56, %62 : vector<256x16xf32>
    %64 = vector.extract_strided_slice %27 {offsets = [1, 2, 0], sizes = [16, 16, 32], strides = [1, 1, 1]} : vector<18x18x32xf32> to vector<16x16x32xf32>
    %65 = vector.shape_cast %64 : vector<16x16x32xf32> to vector<256x32xf32>
    %66 = arith.truncf %65 : vector<256x32xf32> to vector<256x32xbf16>
    %c5 = arith.constant 5 : index
    %c0_27 = arith.constant 0 : index
    %c0_28 = arith.constant 0 : index
    %67 = vector.load %arg2[%c5, %c0_27, %c0_28] : memref<9x32x16xbf16, #tpu.memory_space<vmem>>, vector<1x32x16xbf16>
    %68 = vector.shape_cast %67 : vector<1x32x16xbf16> to vector<32x16xbf16>
    %cst_29 = arith.constant dense<0.000000e+00> : vector<256x16xf32>
    %69 = tpu.matmul %66, %68, %cst_29 {dimension_numbers = #tpu.dot_dimension_numbers<[1], [0], [0], [1], [0, 0, 1, 1], [], []>} : vector<256x32xbf16>, vector<32x16xbf16>, vector<256x16xf32> -> vector<256x16xf32>
    %70 = arith.addf %63, %69 : vector<256x16xf32>
    %71 = vector.extract_strided_slice %27 {offsets = [2, 0, 0], sizes = [16, 16, 32], strides = [1, 1, 1]} : vector<18x18x32xf32> to vector<16x16x32xf32>
    %72 = vector.shape_cast %71 : vector<16x16x32xf32> to vector<256x32xf32>
    %73 = arith.truncf %72 : vector<256x32xf32> to vector<256x32xbf16>
    %c6 = arith.constant 6 : index
    %c0_30 = arith.constant 0 : index
    %c0_31 = arith.constant 0 : index
    %74 = vector.load %arg2[%c6, %c0_30, %c0_31] : memref<9x32x16xbf16, #tpu.memory_space<vmem>>, vector<1x32x16xbf16>
    %75 = vector.shape_cast %74 : vector<1x32x16xbf16> to vector<32x16xbf16>
    %cst_32 = arith.constant dense<0.000000e+00> : vector<256x16xf32>
    %76 = tpu.matmul %73, %75, %cst_32 {dimension_numbers = #tpu.dot_dimension_numbers<[1], [0], [0], [1], [0, 0, 1, 1], [], []>} : vector<256x32xbf16>, vector<32x16xbf16>, vector<256x16xf32> -> vector<256x16xf32>
    %77 = arith.addf %70, %76 : vector<256x16xf32>
    %78 = vector.extract_strided_slice %27 {offsets = [2, 1, 0], sizes = [16, 16, 32], strides = [1, 1, 1]} : vector<18x18x32xf32> to vector<16x16x32xf32>
    %79 = vector.shape_cast %78 : vector<16x16x32xf32> to vector<256x32xf32>
    %80 = arith.truncf %79 : vector<256x32xf32> to vector<256x32xbf16>
    %c7 = arith.constant 7 : index
    %c0_33 = arith.constant 0 : index
    %c0_34 = arith.constant 0 : index
    %81 = vector.load %arg2[%c7, %c0_33, %c0_34] : memref<9x32x16xbf16, #tpu.memory_space<vmem>>, vector<1x32x16xbf16>
    %82 = vector.shape_cast %81 : vector<1x32x16xbf16> to vector<32x16xbf16>
    %cst_35 = arith.constant dense<0.000000e+00> : vector<256x16xf32>
    %83 = tpu.matmul %80, %82, %cst_35 {dimension_numbers = #tpu.dot_dimension_numbers<[1], [0], [0], [1], [0, 0, 1, 1], [], []>} : vector<256x32xbf16>, vector<32x16xbf16>, vector<256x16xf32> -> vector<256x16xf32>
    %84 = arith.addf %77, %83 : vector<256x16xf32>
    %85 = vector.extract_strided_slice %27 {offsets = [2, 2, 0], sizes = [16, 16, 32], strides = [1, 1, 1]} : vector<18x18x32xf32> to vector<16x16x32xf32>
    %86 = vector.shape_cast %85 : vector<16x16x32xf32> to vector<256x32xf32>
    %87 = arith.truncf %86 : vector<256x32xf32> to vector<256x32xbf16>
    %c8 = arith.constant 8 : index
    %c0_36 = arith.constant 0 : index
    %c0_37 = arith.constant 0 : index
    %88 = vector.load %arg2[%c8, %c0_36, %c0_37] : memref<9x32x16xbf16, #tpu.memory_space<vmem>>, vector<1x32x16xbf16>
    %89 = vector.shape_cast %88 : vector<1x32x16xbf16> to vector<32x16xbf16>
    %cst_38 = arith.constant dense<0.000000e+00> : vector<256x16xf32>
    %90 = tpu.matmul %87, %89, %cst_38 {dimension_numbers = #tpu.dot_dimension_numbers<[1], [0], [0], [1], [0, 0, 1, 1], [], []>} : vector<256x32xbf16>, vector<32x16xbf16>, vector<256x16xf32> -> vector<256x16xf32>
    %91 = arith.addf %84, %90 : vector<256x16xf32>
    %92 = arith.truncf %91 : vector<256x16xf32> to vector<256x16xbf16>
    %c0_39 = arith.constant 0 : index
    %c0_40 = arith.constant 0 : index
    %c0_41 = arith.constant 0 : index
    %93 = vector.load %arg7[%c0_39, %c0_40, %c0_41] : memref<1x256x16xbf16, #tpu.memory_space<vmem>>, vector<1x256x16xbf16>
    %94 = vector.shape_cast %93 : vector<1x256x16xbf16> to vector<256x16xbf16>
    %95 = vector.shape_cast %92 : vector<256x16xbf16> to vector<1x256x16xbf16>
    tpu.vector_store %arg7[%c0_39, %c0_40, %c0_41], %95 {strides = array<i32>} : memref<1x256x16xbf16, #tpu.memory_space<vmem>>, vector<1x256x16xbf16>,
    return
  }
  func.func @transform_0(%arg0: i32) -> (i32, i32, i32, i32) {
    %c0_i32 = arith.constant 0 : i32
    %c0_i32_0 = arith.constant 0 : i32
    %c0_i32_1 = arith.constant 0 : i32
    %c0_i32_2 = arith.constant 0 : i32
    return %arg0, %c0_i32, %c0_i32_0, %c0_i32_1 : i32, i32, i32, i32
  }
  func.func @transform_1(%arg0: i32) -> (i32, i32, i32) {
    %c0_i32 = arith.constant 0 : i32
    %c0_i32_0 = arith.constant 0 : i32
    %c0_i32_1 = arith.constant 0 : i32
    %c0_i32_2 = arith.constant 0 : i32
    return %c0_i32, %c0_i32_0, %c0_i32_1 : i32, i32, i32
  }
  func.func @transform_2(%arg0: i32) -> (i32, i32) {
    %c0_i32 = arith.constant 0 : i32
    %c0_i32_0 = arith.constant 0 : i32
    %c0_i32_1 = arith.constant 0 : i32
    return %c0_i32, %c0_i32_0 : i32, i32
  }
  func.func @transform_3(%arg0: i32) -> (i32, i32) {
    %c0_i32 = arith.constant 0 : i32
    %c0_i32_0 = arith.constant 0 : i32
    %c0_i32_1 = arith.constant 0 : i32
    return %c0_i32, %c0_i32_0 : i32, i32
  }
  func.func @transform_4(%arg0: i32) -> (i32, i32) {
    %c0_i32 = arith.constant 0 : i32
    %c0_i32_0 = arith.constant 0 : i32
    %c0_i32_1 = arith.constant 0 : i32
    return %c0_i32, %c0_i32_0 : i32, i32
  }
  func.func @transform_5(%arg0: i32) -> (i32, i32) {
    %c0_i32 = arith.constant 0 : i32
    %c0_i32_0 = arith.constant 0 : i32
    %c0_i32_1 = arith.constant 0 : i32
    return %c0_i32, %c0_i32_0 : i32, i32
  }
  func.func @transform_6(%arg0: i32) -> (i32, i32, i32) {
    %c0_i32 = arith.constant 0 : i32
    %c0_i32_0 = arith.constant 0 : i32
    %c0_i32_1 = arith.constant 0 : i32
    return %arg0, %c0_i32, %c0_i32_0 : i32, i32, i32
  }
}

module attributes {stable_mosaic.version = 11 : i64} {
  func.func @_conv3x3_bn_relu_kernel(%arg0: i32, %arg1: memref<1x18x18x48xbf16, #tpu.memory_space<vmem>>, %arg2: memref<9x48x16xbf16, #tpu.memory_space<vmem>>, %arg3: memref<1x48xf32, #tpu.memory_space<vmem>>, %arg4: memref<1x48xf32, #tpu.memory_space<vmem>>, %arg5: memref<1x16xf32, #tpu.memory_space<vmem>>, %arg6: memref<1x16xf32, #tpu.memory_space<vmem>>, %arg7: memref<1x256x16xbf16, #tpu.memory_space<vmem>>) attributes {dimension_semantics = [#tpu.dimension_semantics<parallel>], iteration_bounds = array<i64: 2>, scalar_prefetch = 0 : i64, scratch_operands = 0 : i64, tpu.core_type = #tpu.core_type<tc>, window_params = [{transform_indices = @transform_0, window_bounds = array<i64: 1, 18, 18, 48>}, {pipeline_mode = #tpu.pipeline_mode<synchronous>, transform_indices = @transform_1, window_bounds = array<i64: 9, 48, 16>}, {pipeline_mode = #tpu.pipeline_mode<synchronous>, transform_indices = @transform_2, window_bounds = array<i64: 1, 48>}, {pipeline_mode = #tpu.pipeline_mode<synchronous>, transform_indices = @transform_3, window_bounds = array<i64: 1, 48>}, {pipeline_mode = #tpu.pipeline_mode<synchronous>, transform_indices = @transform_4, window_bounds = array<i64: 1, 16>}, {pipeline_mode = #tpu.pipeline_mode<synchronous>, transform_indices = @transform_5, window_bounds = array<i64: 1, 16>}, {transform_indices = @transform_6, window_bounds = array<i64: 1, 256, 16>}]} {
    %c0 = arith.constant 0 : index
    %c0_0 = arith.constant 0 : index
    %c0_1 = arith.constant 0 : index
    %c0_2 = arith.constant 0 : index
    %0 = vector.load %arg1[%c0, %c0_0, %c0_1, %c0_2] : memref<1x18x18x48xbf16, #tpu.memory_space<vmem>>, vector<1x18x18x48xbf16>
    %1 = vector.shape_cast %0 : vector<1x18x18x48xbf16> to vector<18x18x48xbf16>
    %2 = arith.extf %1 : vector<18x18x48xbf16> to vector<18x18x48xf32>
    %c0_3 = arith.constant 0 : index
    %c0_4 = arith.constant 0 : index
    %3 = vector.load %arg3[%c0_3, %c0_4] : memref<1x48xf32, #tpu.memory_space<vmem>>, vector<1x48xf32>
    %4 = vector.shape_cast %3 : vector<1x48xf32> to vector<1x1x48xf32>
    %5 = vector.broadcast %4 : vector<1x1x48xf32> to vector<18x18x48xf32>
    %6 = arith.mulf %2, %5 : vector<18x18x48xf32>
    %c0_5 = arith.constant 0 : index
    %c0_6 = arith.constant 0 : index
    %7 = vector.load %arg4[%c0_5, %c0_6] : memref<1x48xf32, #tpu.memory_space<vmem>>, vector<1x48xf32>
    %8 = vector.shape_cast %7 : vector<1x48xf32> to vector<1x1x48xf32>
    %9 = vector.broadcast %8 : vector<1x1x48xf32> to vector<18x18x48xf32>
    %10 = arith.addf %6, %9 : vector<18x18x48xf32>
    %cst = arith.constant 0.000000e+00 : f32
    %11 = vector.broadcast %cst : f32 to vector<18x18x48xf32>
    %12 = arith.maximumf %10, %11 : vector<18x18x48xf32>
    %13 = tpu.iota {dimensions = array<i32: 0>} : vector<18x18x48xi32>
    %14 = tpu.iota {dimensions = array<i32: 1>} : vector<18x18x48xi32>
    %c1_i32 = arith.constant 1 : i32
    %15 = vector.broadcast %c1_i32 : i32 to vector<18x18x48xi32>
    %16 = arith.cmpi sge, %13, %15 : vector<18x18x48xi32>
    %c16_i32 = arith.constant 16 : i32
    %17 = vector.broadcast %c16_i32 : i32 to vector<18x18x48xi32>
    %18 = arith.cmpi sle, %13, %17 : vector<18x18x48xi32>
    %19 = arith.andi %16, %18 : vector<18x18x48xi1>
    %c1_i32_7 = arith.constant 1 : i32
    %20 = vector.broadcast %c1_i32_7 : i32 to vector<18x18x48xi32>
    %21 = arith.cmpi sge, %14, %20 : vector<18x18x48xi32>
    %22 = arith.andi %19, %21 : vector<18x18x48xi1>
    %c16_i32_8 = arith.constant 16 : i32
    %23 = vector.broadcast %c16_i32_8 : i32 to vector<18x18x48xi32>
    %24 = arith.cmpi sle, %14, %23 : vector<18x18x48xi32>
    %25 = arith.andi %22, %24 : vector<18x18x48xi1>
    %cst_9 = arith.constant 0.000000e+00 : f32
    %26 = vector.broadcast %cst_9 : f32 to vector<18x18x48xf32>
    %27 = arith.select %25, %12, %26 : vector<18x18x48xi1>, vector<18x18x48xf32>
    %cst_10 = arith.constant 0.000000e+00 : f32
    %28 = vector.broadcast %cst_10 : f32 to vector<256x16xf32>
    %29 = vector.extract_strided_slice %27 {offsets = [0, 0, 0], sizes = [16, 16, 48], strides = [1, 1, 1]} : vector<18x18x48xf32> to vector<16x16x48xf32>
    %30 = vector.shape_cast %29 : vector<16x16x48xf32> to vector<256x48xf32>
    %31 = arith.truncf %30 : vector<256x48xf32> to vector<256x48xbf16>
    %c0_11 = arith.constant 0 : index
    %c0_12 = arith.constant 0 : index
    %c0_13 = arith.constant 0 : index
    %32 = vector.load %arg2[%c0_11, %c0_12, %c0_13] : memref<9x48x16xbf16, #tpu.memory_space<vmem>>, vector<1x48x16xbf16>
    %33 = vector.shape_cast %32 : vector<1x48x16xbf16> to vector<48x16xbf16>
    %cst_14 = arith.constant dense<0.000000e+00> : vector<256x16xf32>
    %34 = tpu.matmul %31, %33, %cst_14 {dimension_numbers = #tpu.dot_dimension_numbers<[1], [0], [0], [1], [0, 0, 1, 1], [], []>} : vector<256x48xbf16>, vector<48x16xbf16>, vector<256x16xf32> -> vector<256x16xf32>
    %35 = arith.addf %28, %34 : vector<256x16xf32>
    %36 = vector.extract_strided_slice %27 {offsets = [0, 1, 0], sizes = [16, 16, 48], strides = [1, 1, 1]} : vector<18x18x48xf32> to vector<16x16x48xf32>
    %37 = vector.shape_cast %36 : vector<16x16x48xf32> to vector<256x48xf32>
    %38 = arith.truncf %37 : vector<256x48xf32> to vector<256x48xbf16>
    %c1 = arith.constant 1 : index
    %c0_15 = arith.constant 0 : index
    %c0_16 = arith.constant 0 : index
    %39 = vector.load %arg2[%c1, %c0_15, %c0_16] : memref<9x48x16xbf16, #tpu.memory_space<vmem>>, vector<1x48x16xbf16>
    %40 = vector.shape_cast %39 : vector<1x48x16xbf16> to vector<48x16xbf16>
    %cst_17 = arith.constant dense<0.000000e+00> : vector<256x16xf32>
    %41 = tpu.matmul %38, %40, %cst_17 {dimension_numbers = #tpu.dot_dimension_numbers<[1], [0], [0], [1], [0, 0, 1, 1], [], []>} : vector<256x48xbf16>, vector<48x16xbf16>, vector<256x16xf32> -> vector<256x16xf32>
    %42 = arith.addf %35, %41 : vector<256x16xf32>
    %43 = vector.extract_strided_slice %27 {offsets = [0, 2, 0], sizes = [16, 16, 48], strides = [1, 1, 1]} : vector<18x18x48xf32> to vector<16x16x48xf32>
    %44 = vector.shape_cast %43 : vector<16x16x48xf32> to vector<256x48xf32>
    %45 = arith.truncf %44 : vector<256x48xf32> to vector<256x48xbf16>
    %c2 = arith.constant 2 : index
    %c0_18 = arith.constant 0 : index
    %c0_19 = arith.constant 0 : index
    %46 = vector.load %arg2[%c2, %c0_18, %c0_19] : memref<9x48x16xbf16, #tpu.memory_space<vmem>>, vector<1x48x16xbf16>
    %47 = vector.shape_cast %46 : vector<1x48x16xbf16> to vector<48x16xbf16>
    %cst_20 = arith.constant dense<0.000000e+00> : vector<256x16xf32>
    %48 = tpu.matmul %45, %47, %cst_20 {dimension_numbers = #tpu.dot_dimension_numbers<[1], [0], [0], [1], [0, 0, 1, 1], [], []>} : vector<256x48xbf16>, vector<48x16xbf16>, vector<256x16xf32> -> vector<256x16xf32>
    %49 = arith.addf %42, %48 : vector<256x16xf32>
    %50 = vector.extract_strided_slice %27 {offsets = [1, 0, 0], sizes = [16, 16, 48], strides = [1, 1, 1]} : vector<18x18x48xf32> to vector<16x16x48xf32>
    %51 = vector.shape_cast %50 : vector<16x16x48xf32> to vector<256x48xf32>
    %52 = arith.truncf %51 : vector<256x48xf32> to vector<256x48xbf16>
    %c3 = arith.constant 3 : index
    %c0_21 = arith.constant 0 : index
    %c0_22 = arith.constant 0 : index
    %53 = vector.load %arg2[%c3, %c0_21, %c0_22] : memref<9x48x16xbf16, #tpu.memory_space<vmem>>, vector<1x48x16xbf16>
    %54 = vector.shape_cast %53 : vector<1x48x16xbf16> to vector<48x16xbf16>
    %cst_23 = arith.constant dense<0.000000e+00> : vector<256x16xf32>
    %55 = tpu.matmul %52, %54, %cst_23 {dimension_numbers = #tpu.dot_dimension_numbers<[1], [0], [0], [1], [0, 0, 1, 1], [], []>} : vector<256x48xbf16>, vector<48x16xbf16>, vector<256x16xf32> -> vector<256x16xf32>
    %56 = arith.addf %49, %55 : vector<256x16xf32>
    %57 = vector.extract_strided_slice %27 {offsets = [1, 1, 0], sizes = [16, 16, 48], strides = [1, 1, 1]} : vector<18x18x48xf32> to vector<16x16x48xf32>
    %58 = vector.shape_cast %57 : vector<16x16x48xf32> to vector<256x48xf32>
    %59 = arith.truncf %58 : vector<256x48xf32> to vector<256x48xbf16>
    %c4 = arith.constant 4 : index
    %c0_24 = arith.constant 0 : index
    %c0_25 = arith.constant 0 : index
    %60 = vector.load %arg2[%c4, %c0_24, %c0_25] : memref<9x48x16xbf16, #tpu.memory_space<vmem>>, vector<1x48x16xbf16>
    %61 = vector.shape_cast %60 : vector<1x48x16xbf16> to vector<48x16xbf16>
    %cst_26 = arith.constant dense<0.000000e+00> : vector<256x16xf32>
    %62 = tpu.matmul %59, %61, %cst_26 {dimension_numbers = #tpu.dot_dimension_numbers<[1], [0], [0], [1], [0, 0, 1, 1], [], []>} : vector<256x48xbf16>, vector<48x16xbf16>, vector<256x16xf32> -> vector<256x16xf32>
    %63 = arith.addf %56, %62 : vector<256x16xf32>
    %64 = vector.extract_strided_slice %27 {offsets = [1, 2, 0], sizes = [16, 16, 48], strides = [1, 1, 1]} : vector<18x18x48xf32> to vector<16x16x48xf32>
    %65 = vector.shape_cast %64 : vector<16x16x48xf32> to vector<256x48xf32>
    %66 = arith.truncf %65 : vector<256x48xf32> to vector<256x48xbf16>
    %c5 = arith.constant 5 : index
    %c0_27 = arith.constant 0 : index
    %c0_28 = arith.constant 0 : index
    %67 = vector.load %arg2[%c5, %c0_27, %c0_28] : memref<9x48x16xbf16, #tpu.memory_space<vmem>>, vector<1x48x16xbf16>
    %68 = vector.shape_cast %67 : vector<1x48x16xbf16> to vector<48x16xbf16>
    %cst_29 = arith.constant dense<0.000000e+00> : vector<256x16xf32>
    %69 = tpu.matmul %66, %68, %cst_29 {dimension_numbers = #tpu.dot_dimension_numbers<[1], [0], [0], [1], [0, 0, 1, 1], [], []>} : vector<256x48xbf16>, vector<48x16xbf16>, vector<256x16xf32> -> vector<256x16xf32>
    %70 = arith.addf %63, %69 : vector<256x16xf32>
    %71 = vector.extract_strided_slice %27 {offsets = [2, 0, 0], sizes = [16, 16, 48], strides = [1, 1, 1]} : vector<18x18x48xf32> to vector<16x16x48xf32>
    %72 = vector.shape_cast %71 : vector<16x16x48xf32> to vector<256x48xf32>
    %73 = arith.truncf %72 : vector<256x48xf32> to vector<256x48xbf16>
    %c6 = arith.constant 6 : index
    %c0_30 = arith.constant 0 : index
    %c0_31 = arith.constant 0 : index
    %74 = vector.load %arg2[%c6, %c0_30, %c0_31] : memref<9x48x16xbf16, #tpu.memory_space<vmem>>, vector<1x48x16xbf16>
    %75 = vector.shape_cast %74 : vector<1x48x16xbf16> to vector<48x16xbf16>
    %cst_32 = arith.constant dense<0.000000e+00> : vector<256x16xf32>
    %76 = tpu.matmul %73, %75, %cst_32 {dimension_numbers = #tpu.dot_dimension_numbers<[1], [0], [0], [1], [0, 0, 1, 1], [], []>} : vector<256x48xbf16>, vector<48x16xbf16>, vector<256x16xf32> -> vector<256x16xf32>
    %77 = arith.addf %70, %76 : vector<256x16xf32>
    %78 = vector.extract_strided_slice %27 {offsets = [2, 1, 0], sizes = [16, 16, 48], strides = [1, 1, 1]} : vector<18x18x48xf32> to vector<16x16x48xf32>
    %79 = vector.shape_cast %78 : vector<16x16x48xf32> to vector<256x48xf32>
    %80 = arith.truncf %79 : vector<256x48xf32> to vector<256x48xbf16>
    %c7 = arith.constant 7 : index
    %c0_33 = arith.constant 0 : index
    %c0_34 = arith.constant 0 : index
    %81 = vector.load %arg2[%c7, %c0_33, %c0_34] : memref<9x48x16xbf16, #tpu.memory_space<vmem>>, vector<1x48x16xbf16>
    %82 = vector.shape_cast %81 : vector<1x48x16xbf16> to vector<48x16xbf16>
    %cst_35 = arith.constant dense<0.000000e+00> : vector<256x16xf32>
    %83 = tpu.matmul %80, %82, %cst_35 {dimension_numbers = #tpu.dot_dimension_numbers<[1], [0], [0], [1], [0, 0, 1, 1], [], []>} : vector<256x48xbf16>, vector<48x16xbf16>, vector<256x16xf32> -> vector<256x16xf32>
    %84 = arith.addf %77, %83 : vector<256x16xf32>
    %85 = vector.extract_strided_slice %27 {offsets = [2, 2, 0], sizes = [16, 16, 48], strides = [1, 1, 1]} : vector<18x18x48xf32> to vector<16x16x48xf32>
    %86 = vector.shape_cast %85 : vector<16x16x48xf32> to vector<256x48xf32>
    %87 = arith.truncf %86 : vector<256x48xf32> to vector<256x48xbf16>
    %c8 = arith.constant 8 : index
    %c0_36 = arith.constant 0 : index
    %c0_37 = arith.constant 0 : index
    %88 = vector.load %arg2[%c8, %c0_36, %c0_37] : memref<9x48x16xbf16, #tpu.memory_space<vmem>>, vector<1x48x16xbf16>
    %89 = vector.shape_cast %88 : vector<1x48x16xbf16> to vector<48x16xbf16>
    %cst_38 = arith.constant dense<0.000000e+00> : vector<256x16xf32>
    %90 = tpu.matmul %87, %89, %cst_38 {dimension_numbers = #tpu.dot_dimension_numbers<[1], [0], [0], [1], [0, 0, 1, 1], [], []>} : vector<256x48xbf16>, vector<48x16xbf16>, vector<256x16xf32> -> vector<256x16xf32>
    %91 = arith.addf %84, %90 : vector<256x16xf32>
    %92 = arith.truncf %91 : vector<256x16xf32> to vector<256x16xbf16>
    %c0_39 = arith.constant 0 : index
    %c0_40 = arith.constant 0 : index
    %c0_41 = arith.constant 0 : index
    %93 = vector.load %arg7[%c0_39, %c0_40, %c0_41] : memref<1x256x16xbf16, #tpu.memory_space<vmem>>, vector<1x256x16xbf16>
    %94 = vector.shape_cast %93 : vector<1x256x16xbf16> to vector<256x16xbf16>
    %95 = vector.shape_cast %92 : vector<256x16xbf16> to vector<1x256x16xbf16>
    tpu.vector_store %arg7[%c0_39, %c0_40, %c0_41], %95 {strides = array<i32>} : memref<1x256x16xbf16, #tpu.memory_space<vmem>>, vector<1x256x16xbf16>,
    return
  }
  func.func @transform_0(%arg0: i32) -> (i32, i32, i32, i32) {
    %c0_i32 = arith.constant 0 : i32
    %c0_i32_0 = arith.constant 0 : i32
    %c0_i32_1 = arith.constant 0 : i32
    %c0_i32_2 = arith.constant 0 : i32
    return %arg0, %c0_i32, %c0_i32_0, %c0_i32_1 : i32, i32, i32, i32
  }
  func.func @transform_1(%arg0: i32) -> (i32, i32, i32) {
    %c0_i32 = arith.constant 0 : i32
    %c0_i32_0 = arith.constant 0 : i32
    %c0_i32_1 = arith.constant 0 : i32
    %c0_i32_2 = arith.constant 0 : i32
    return %c0_i32, %c0_i32_0, %c0_i32_1 : i32, i32, i32
  }
  func.func @transform_2(%arg0: i32) -> (i32, i32) {
    %c0_i32 = arith.constant 0 : i32
    %c0_i32_0 = arith.constant 0 : i32
    %c0_i32_1 = arith.constant 0 : i32
    return %c0_i32, %c0_i32_0 : i32, i32
  }
  func.func @transform_3(%arg0: i32) -> (i32, i32) {
    %c0_i32 = arith.constant 0 : i32
    %c0_i32_0 = arith.constant 0 : i32
    %c0_i32_1 = arith.constant 0 : i32
    return %c0_i32, %c0_i32_0 : i32, i32
  }
  func.func @transform_4(%arg0: i32) -> (i32, i32) {
    %c0_i32 = arith.constant 0 : i32
    %c0_i32_0 = arith.constant 0 : i32
    %c0_i32_1 = arith.constant 0 : i32
    return %c0_i32, %c0_i32_0 : i32, i32
  }
  func.func @transform_5(%arg0: i32) -> (i32, i32) {
    %c0_i32 = arith.constant 0 : i32
    %c0_i32_0 = arith.constant 0 : i32
    %c0_i32_1 = arith.constant 0 : i32
    return %c0_i32, %c0_i32_0 : i32, i32
  }
  func.func @transform_6(%arg0: i32) -> (i32, i32, i32) {
    %c0_i32 = arith.constant 0 : i32
    %c0_i32_0 = arith.constant 0 : i32
    %c0_i32_1 = arith.constant 0 : i32
    return %arg0, %c0_i32, %c0_i32_0 : i32, i32, i32
  }
}

module attributes {stable_mosaic.version = 11 : i64} {
  func.func @_attn_pool_kernel(%arg0: i32, %arg1: i32, %arg2: memref<1x128x64xbf16, #tpu.memory_space<vmem>>, %arg3: memref<1x64xf32, #tpu.memory_space<vmem>>, %arg4: memref<1x64xf32, #tpu.memory_space<vmem>>, %arg5: memref<64x1xf32, #tpu.memory_space<vmem>>, %arg6: memref<1x1xf32, #tpu.memory_space<smem>>, %arg7: memref<1x1x64xf32, #tpu.memory_space<vmem>>, %arg8: memref<1x64xf32, #tpu.memory_space<vmem>>) attributes {dimension_semantics = [#tpu.dimension_semantics<parallel>, #tpu.dimension_semantics<arbitrary>], iteration_bounds = array<i64: 2, 2>, scalar_prefetch = 0 : i64, scratch_operands = 1 : i64, tpu.core_type = #tpu.core_type<tc>, window_params = [{transform_indices = @transform_0, window_bounds = array<i64: 1, 128, 64>}, {pipeline_mode = #tpu.pipeline_mode<synchronous>, transform_indices = @transform_1, window_bounds = array<i64: 1, 64>}, {pipeline_mode = #tpu.pipeline_mode<synchronous>, transform_indices = @transform_2, window_bounds = array<i64: 1, 64>}, {pipeline_mode = #tpu.pipeline_mode<synchronous>, transform_indices = @transform_3, window_bounds = array<i64: 64, 1>}, {transform_indices = @transform_4, window_bounds = array<i64: 1, 1>}, {transform_indices = @transform_5, window_bounds = array<i64: 1, 1, 64>}]} {
    %c0_i32 = arith.constant 0 : i32
    %0 = arith.cmpi eq, %arg1, %c0_i32 : i32
    %1 = arith.extui %0 : i1 to i32
    %c0_i32_0 = arith.constant 0 : i32
    %2 = arith.cmpi ne, %1, %c0_i32_0 : i32
    scf.if %2 {
      %cst_19 = arith.constant 0.000000e+00 : f32
      %34 = vector.broadcast %cst_19 : f32 to vector<1x64xf32>
      %c0_20 = arith.constant 0 : index
      %c0_21 = arith.constant 0 : index
      %35 = vector.load %arg8[%c0_20, %c0_21] : memref<1x64xf32, #tpu.memory_space<vmem>>, vector<1x64xf32>
      tpu.vector_store %arg8[%c0_20, %c0_21], %34 {strides = array<i32>} : memref<1x64xf32, #tpu.memory_space<vmem>>, vector<1x64xf32>,
    } else {
    }
    %c0 = arith.constant 0 : index
    %c0_1 = arith.constant 0 : index
    %c0_2 = arith.constant 0 : index
    %3 = vector.load %arg2[%c0, %c0_1, %c0_2] : memref<1x128x64xbf16, #tpu.memory_space<vmem>>, vector<1x128x64xbf16>
    %4 = vector.shape_cast %3 : vector<1x128x64xbf16> to vector<128x64xbf16>
    %5 = arith.extf %4 : vector<128x64xbf16> to vector<128x64xf32>
    %c0_3 = arith.constant 0 : index
    %c0_4 = arith.constant 0 : index
    %6 = vector.load %arg3[%c0_3, %c0_4] : memref<1x64xf32, #tpu.memory_space<vmem>>, vector<1x64xf32>
    %7 = vector.broadcast %6 : vector<1x64xf32> to vector<128x64xf32>
    %8 = arith.mulf %5, %7 : vector<128x64xf32>
    %c0_5 = arith.constant 0 : index
    %c0_6 = arith.constant 0 : index
    %9 = vector.load %arg4[%c0_5, %c0_6] : memref<1x64xf32, #tpu.memory_space<vmem>>, vector<1x64xf32>
    %10 = vector.broadcast %9 : vector<1x64xf32> to vector<128x64xf32>
    %11 = arith.addf %8, %10 : vector<128x64xf32>
    %cst = arith.constant 0.000000e+00 : f32
    %12 = vector.broadcast %cst : f32 to vector<128x64xf32>
    %13 = arith.maximumf %11, %12 : vector<128x64xf32>
    %c0_7 = arith.constant 0 : index
    %c0_8 = arith.constant 0 : index
    %14 = vector.load %arg5[%c0_7, %c0_8] : memref<64x1xf32, #tpu.memory_space<vmem>>, vector<64x1xf32>
    %cst_9 = arith.constant dense<0.000000e+00> : vector<128x1xf32>
    %15 = tpu.matmul %13, %14, %cst_9 {dimension_numbers = #tpu.dot_dimension_numbers<[1], [0], [0], [1], [0, 0, 1, 1], [], []>} : vector<128x64xf32>, vector<64x1xf32>, vector<128x1xf32> -> vector<128x1xf32>
    %c0_10 = arith.constant 0 : index
    %c0_11 = arith.constant 0 : index
    %16 = memref.load %arg6[%c0_10, %c0_11] : memref<1x1xf32, #tpu.memory_space<smem>>
    %17 = vector.broadcast %16 : f32 to vector<128x1xf32>
    %18 = arith.addf %15, %17 : vector<128x1xf32>
    %19 = arith.negf %18 : vector<128x1xf32>
    %20 = math.exp %19 : vector<128x1xf32>
    %cst_12 = arith.constant 1.000000e+00 : f32
    %21 = vector.broadcast %cst_12 : f32 to vector<128x1xf32>
    %22 = arith.addf %21, %20 : vector<128x1xf32>
    %23 = arith.divf %21, %22 : vector<128x1xf32>
    %c0_13 = arith.constant 0 : index
    %c0_14 = arith.constant 0 : index
    %24 = vector.load %arg8[%c0_13, %c0_14] : memref<1x64xf32, #tpu.memory_space<vmem>>, vector<1x64xf32>
    %25 = vector.broadcast %23 : vector<128x1xf32> to vector<128x64xf32>
    %26 = arith.mulf %13, %25 : vector<128x64xf32>
    %cst_15 = arith.constant dense<0.000000e+00> : vector<64xf32>
    %27 = vector.multi_reduction <add>, %26, %cst_15 [0] : vector<128x64xf32> to vector<64xf32>
    %28 = vector.shape_cast %27 : vector<64xf32> to vector<1x64xf32>
    %29 = arith.addf %24, %28 : vector<1x64xf32>
    %c0_16 = arith.constant 0 : index
    %c0_17 = arith.constant 0 : index
    %30 = vector.load %arg8[%c0_16, %c0_17] : memref<1x64xf32, #tpu.memory_space<vmem>>, vector<1x64xf32>
    tpu.vector_store %arg8[%c0_16, %c0_17], %29 {strides = array<i32>} : memref<1x64xf32, #tpu.memory_space<vmem>>, vector<1x64xf32>,
    %c1_i32 = arith.constant 1 : i32
    %31 = arith.cmpi eq, %arg1, %c1_i32 : i32
    %32 = arith.extui %31 : i1 to i32
    %c0_i32_18 = arith.constant 0 : i32
    %33 = arith.cmpi ne, %32, %c0_i32_18 : i32
    scf.if %33 {
      %c0_19 = arith.constant 0 : index
      %c0_20 = arith.constant 0 : index
      %34 = vector.load %arg8[%c0_19, %c0_20] : memref<1x64xf32, #tpu.memory_space<vmem>>, vector<1x64xf32>
      %cst_21 = arith.constant 3.906250e-03 : f32
      %35 = vector.broadcast %cst_21 : f32 to vector<1x64xf32>
      %36 = arith.mulf %34, %35 : vector<1x64xf32>
      %c0_22 = arith.constant 0 : index
      %c0_23 = arith.constant 0 : index
      %c0_24 = arith.constant 0 : index
      %37 = vector.load %arg7[%c0_22, %c0_23, %c0_24] : memref<1x1x64xf32, #tpu.memory_space<vmem>>, vector<1x1x64xf32>
      %38 = vector.shape_cast %37 : vector<1x1x64xf32> to vector<1x64xf32>
      %39 = vector.shape_cast %36 : vector<1x64xf32> to vector<1x1x64xf32>
      tpu.vector_store %arg7[%c0_22, %c0_23, %c0_24], %39 {strides = array<i32>} : memref<1x1x64xf32, #tpu.memory_space<vmem>>, vector<1x1x64xf32>,
    } else {
    }
    return
  }
  func.func @transform_0(%arg0: i32, %arg1: i32) -> (i32, i32, i32) {
    %c0_i32 = arith.constant 0 : i32
    %c0_i32_0 = arith.constant 0 : i32
    return %arg0, %arg1, %c0_i32 : i32, i32, i32
  }
  func.func @transform_1(%arg0: i32, %arg1: i32) -> (i32, i32) {
    %c0_i32 = arith.constant 0 : i32
    %c0_i32_0 = arith.constant 0 : i32
    %c0_i32_1 = arith.constant 0 : i32
    return %c0_i32, %c0_i32_0 : i32, i32
  }
  func.func @transform_2(%arg0: i32, %arg1: i32) -> (i32, i32) {
    %c0_i32 = arith.constant 0 : i32
    %c0_i32_0 = arith.constant 0 : i32
    %c0_i32_1 = arith.constant 0 : i32
    return %c0_i32, %c0_i32_0 : i32, i32
  }
  func.func @transform_3(%arg0: i32, %arg1: i32) -> (i32, i32) {
    %c0_i32 = arith.constant 0 : i32
    %c0_i32_0 = arith.constant 0 : i32
    %c0_i32_1 = arith.constant 0 : i32
    return %c0_i32, %c0_i32_0 : i32, i32
  }
  func.func @transform_4(%arg0: i32, %arg1: i32) -> (i32, i32) {
    %c0_i32 = arith.constant 0 : i32
    %c0_i32_0 = arith.constant 0 : i32
    %c0_i32_1 = arith.constant 0 : i32
    return %c0_i32, %c0_i32_0 : i32, i32
  }
  func.func @transform_5(%arg0: i32, %arg1: i32) -> (i32, i32, i32) {
    %c0_i32 = arith.constant 0 : i32
    %c0_i32_0 = arith.constant 0 : i32
    %c0_i32_1 = arith.constant 0 : i32
    return %arg0, %c0_i32, %c0_i32_0 : i32, i32, i32
  }
}

</mosaic_0001>

<bundles_post_ra>
// kernel: densenet_cxr_bottom.5
= control target key start
LH: loop header
LB: loop body
LE: loop exit
PB: predicated region body
PF: predicated region fallthrough
CT: control target
= control target key end

     0   :  { %s4311_s21 = smov 0   ;;  %s5367_s0 = inlined_call_operand.vmem [shape: bf16[2,18,18,32], index: 0, kind: input, shape index: {}]   ;;  %s5368_s1 = inlined_call_operand.vmem [shape: bf16[9,32,16], index: 1, kind: input, shape index: {}]   ;;  %s5369_s2 = inlined_call_operand.vmem [shape: f32[1,32], index: 2, kind: input, shape index: {}]   ;;  %s5370_s3 = inlined_call_operand.vmem [shape: f32[1,32], index: 3, kind: input, shape index: {}]   ;;  %s5371_s4 = inlined_call_operand.vmem [shape: f32[1,16], index: 4, kind: input, shape index: {}]   ;;  %s5372_s5 = inlined_call_operand.vmem [shape: f32[1,16], index: 5, kind: input, shape index: {}]   ;;  %s5373_s6 = inlined_call_operand.vmem [shape: bf16[2,256,16], index: 6, kind: output, shape index: {}]  }
   0x1 LB: > { %s3179_s22 = sadd.s32 4294967295, %s4272_s21   ;;  %p3183_p0 = scmp.ge.s32.totalorder %s4272_s21, 1  ;;  %s4272_s21 = sphi %s4311_s21, %s16_s21  }
   0x2   : > { %p212_p1 = scmp.lt.s32.totalorder %s4272_s21, 3 }
   0x4   : > { %p213_p2 = pnand %p3183_p0, %p212_p1 }
   0x6   : > { %216 = sbr.rel (%p213_p2) target bundleno = 554 (0x22a), region = 44 }
   0xd   : > { %v4245_v0 = vld [vmem:[%s5368_s1 + $0x10] sm:$0xff]   ;;  %v537_v1 = vlaneseq  ;;  %v4246_v2 = vld [vmem:[%s5368_s1 + $0x40] sm:$0xff]   ;;  %v5374_v3 = vmov 0.0   ;;  %v4247_v5 = vld [vmem:[%s5368_s1 + $0x18] sm:$0xff]   ;;  %vm827_vm0 = vcmask 261120   ;;  %p242_p3 = scmp.lt.s32.totalorder %s3179_s22, 1 }
   0xe   : > { %v682_v4 = vrot.slane %v5374_v3, 1  ;;  %3650 = vmatprep.subr.bf16.mxu1 %v4245_v0  ;;  %3794 = vmatprep.subr.bf16.mxu0 %v4246_v2  ;;  %v4248_v6 = vld [vmem:[%s5368_s1 + $0x48] sm:$0xff]   ;;  %v4341_v9 = vld [vmem:[%s5368_s1] sm:$0xff]   ;;  %v4351_v11 = vld [vmem:[%s5368_s1 + $0x50] sm:$0xff]   ;;  %vm681_vm3 = vcmask 1046528   ;;  %vm1258_vm4 = vcmask 1045504  }
   0xf   : > { %3651 = vmatpush3.bf16.msra.mxu1 %v4245_v0  ;;  %3795 = vmatpush3.bf16.msra.mxu0 %v4246_v2  ;;  %v4334_v8 = vshrl.u32 %v537_v1, 7  ;;  %s5435_s22 = smov (!%p242_p3, %s3179_s22), 1  ;;  %v4364_v12 = vld [vmem:[%s5369_s2] ss:$0 sm:$0xff]  ;;  %vm3091_vm5 = vcmask 125952  }
  0x10   : > { %v4332_v7 = vpack.c.bf16 %v682_v4, %v682_v4  ;;  %3652 = vmatprep.subr.bf16.mxu1 %v4247_v5  ;;  %3796 = vmatprep.subr.bf16.mxu0 %v4248_v6  ;;  %s4234_s9 = smul.u32 216, %s5435_s22  ;;  %v4377_v23 = vld [vmem:[%s5370_s3] ss:$0 sm:$0xff]  ;;  %s3415_s23 = sshll.u32 %s5435_s22, 7 }
  0x11   : > { %v4346_v10 = vadd.s32 16, %v4334_v8  ;;  %vm541_vm1 = vcmp.ge.s32.totalorder %v4334_v8, 1  ;;  %s5298_s26 = scalar_lea.vmem %s5373_s6, %s3415_s23 }
  0x12   : > { %5400 = vst [vmem:[#allocation2_spill] sm:$0xff] %v4332_v7  ;;  %3654 = vmatprep.mubr.msk.bf16.mxu1 %vm827_vm0, %v4332_v7  ;;  %s4359_s12 = scalar_lea.vmem %s5367_s0, %s4234_s9 }
  0x13   : > { %3653 = vmatpush3.bf16.msra.mxu1 %v4247_v5  ;;  %3797 = vmatpush3.bf16.msra.mxu0 %v4248_v6  ;;  %v256_v13 = vld [vmem:[%s4359_s12 + $0xc] sm:$0xff]   ;;  %v258_v14 = vld [vmem:[%s4359_s12 + $0x14] sm:$0x1]  ;;  %vm552_vm2 = vcmp.le.s32.totalorder %v4346_v10, 16  ;;  %v3480_v15 = vld [vmem:[%s4359_s12 + $0x18] sm:$0xff]  }
  0x14   : > { %3686 = vmatprep.subr.bf16.mxu1 %v4341_v9  ;;  %3830 = vmatprep.subr.bf16.mxu0 %v4351_v11  ;;  %v310_v16 = vunpack.c.l.bf16 %v256_v13  ;;  %v311_v17 = vunpack.c.h.bf16 %v256_v13  ;;  %v312_v18 = vunpack.c.l.bf16 %v258_v14  ;;  %v3450_v19 = vunpack.c.l.bf16 %v3480_v15  ;;  %v261_v20 = vld [vmem:[%s4359_s12 + $0x20] sm:$0x1]  ;;  %v262_v21 = vld [vmem:[%s4359_s12 + $0x24] sm:$0xff]   ;;  %v264_v22 = vld [vmem:[%s4359_s12 + $0x2c] sm:$0x1] }
  0x15   : > { %v3451_v24 = vunpack.c.h.bf16 %v3480_v15  ;;  %v315_v25 = vunpack.c.l.bf16 %v261_v20  ;;  %v316_v26 = vunpack.c.l.bf16 %v262_v21  ;;  %v317_v27 = vunpack.c.h.bf16 %v262_v21  ;;  %v3481_v0 = vld [vmem:[%s4359_s12 + $0x30] sm:$0xff]   ;;  %v267_v6 = vld [vmem:[%s4359_s12 + $0x38] sm:$0x1]  ;;  %v268_v13 = vld [vmem:[%s4359_s12 + $0x3c] sm:$0xff]  }
  0x16   : > { %v371_v28 = vmul.f32 %v4364_v12, %v310_v16  ;;  %v372_v29 = vmul.f32 %v4364_v12, %v311_v17  ;;  %v373_v30 = vmul.f32 %v4364_v12, %v312_v18  ;;  %v374_v31 = vmul.f32 %v3450_v19, %v4364_v12  ;;  %v4251_v14 = vld [vmem:[%s5368_s1 + $0x58] sm:$0xff]   ;;  %v4252_v19 = vld [vmem:[%s5368_s1 + $0x8] sm:$0xff]  }
  0x17   : > { %v375_v32 = vmul.f32 %v3451_v24, %v4364_v12  ;;  %v376_v33 = vmul.f32 %v4364_v12, %v315_v25  ;;  %v318_v34 = vunpack.c.l.bf16 %v264_v22  ;;  %v377_v35 = vmul.f32 %v4364_v12, %v316_v26  ;;  %v270_v25 = vld [vmem:[%s4359_s12 + $0x44] sm:$0x1]  ;;  %v292_v7 = vld [vmem:[%s4359_s12 + $0x9c] sm:$0xff]  }
  0x18   : > { %v432_v36 = vadd.f32 %v4377_v23, %v371_v28  ;;  %v433_v37 = vadd.f32 %v4377_v23, %v372_v29  ;;  %v434_v38 = vadd.f32 %v4377_v23, %v373_v30  ;;  %v435_v39 = vadd.f32 %v4377_v23, %v374_v31 }
  0x19   : > { %v436_v40 = vadd.f32 %v4377_v23, %v375_v32  ;;  %v437_v41 = vadd.f32 %v4377_v23, %v376_v33  ;;  %v378_v42 = vmul.f32 %v4364_v12, %v317_v27  ;;  %v379_v43 = vmul.f32 %v4364_v12, %v318_v34  ;;  %v4463_v34 = vld [vmem:[%s5368_s1 + $0x60] sm:$0xff]  }
  0x1a   : > { %v486_v44 = vmax.f32 %v432_v36, 0.0  ;;  %v4394_v45 = vmax.f32 %v433_v37, 0.0  ;;  %v488_v46 = vmax.f32 %v434_v38, 0.0  ;;  %v489_v47 = vmax.f32 %v435_v39, 0.0  ;;  %v3482_v39 = vld [vmem:[%s4359_s12 + $0x48] sm:$0xff]  }
  0x1b   : > { %v4396_v48 = vmax.f32 %v436_v40, 0.0  ;;  %v491_v49 = vmax.f32 %v437_v41, 0.0  ;;  %v438_v50 = vadd.f32 %v4377_v23, %v377_v35  ;;  %v439_v51 = vadd.f32 %v4377_v23, %v378_v42 }
  0x1c   : > { %v4402_v52 = vsel %vm541_vm1, %v486_v44, 0.0  ;;  %v4406_v53 = vsel %vm552_vm2, %v488_v46, 0.0  ;;  %v688_v54 = vrot.slane %v4394_v45, 1  ;;  %v4411_v55 = vsel %vm541_vm1, %v489_v47, 0.0 }
  0x1d   : > { %v687_v56 = vrot.slane %v4402_v52, 1  ;;  %v690_v57 = vrot.slane %v4406_v53, 1  ;;  %v4417_v58 = vsel %vm552_vm2, %v491_v49, 0.0  ;;  %v692_v59 = vrot.slane %v4411_v55, 1 }
  0x1e   : > { %v693_v60 = vrot.slane %v4396_v48, 1  ;;  %v695_v61 = vrot.slane %v4417_v58, 1  ;;  %v1269_v62 = vrot.slane %v4411_v55, 2  ;;  %v1270_v63 = vrot.slane %v4396_v48, 2 }
  0x1f   : > { %v689_v1 = vsel %vm681_vm3, %v687_v56, %v688_v54  ;;  %v691_v2 = vsel %vm681_vm3, %v688_v54, %v690_v57  ;;  %v1272_v4 = vrot.slane %v4417_v58, 2  ;;  %v440_v5 = vadd.f32 %v4377_v23, %v379_v43 }
  0x20   : > { %v795_v15 = vpack.c.bf16 %v691_v2, %v689_v1  ;;  %v694_v16 = vsel %vm681_vm3, %v692_v59, %v693_v60  ;;  %v696_v17 = vsel %vm681_vm3, %v693_v60, %v695_v61  ;;  %v492_v18 = vmax.f32 %v438_v50, 0.0  ;;  %v273_v61 = vld [vmem:[%s4359_s12 + $0x50] sm:$0x1] }
  0x21   : > { %v4439_v20 = vpack.c.bf16 %v696_v17, %v694_v16  ;;  %v4441_v21 = vmax.f32 %v439_v51, 0.0  ;;  %v494_v22 = vmax.f32 %v440_v5, 0.0  ;;  %v3454_v24 = vunpack.c.l.bf16 %v3481_v0 }
  0x22   : > { %3655 = vmatmul.mubr.msk.bf16.vlgmr.msra.gmra.mrb[0].mxu1 %vm827_vm0, %v795_v15  ;;  %3798 = vmatprep.mubr.msk.bf16.mxu0 %vm827_vm0, %v795_v15  ;;  %v4448_v26 = vsel %vm541_vm1, %v492_v18, 0.0  ;;  %v3455_v27 = vunpack.c.h.bf16 %v3481_v0  ;;  %v321_v28 = vunpack.c.l.bf16 %v267_v6  ;;  %v322_v29 = vunpack.c.l.bf16 %v268_v13 }
  0x23   : > { %5401 = vst [vmem:[#allocation3_spill] sm:$0xff] %v4439_v20  ;;  %3687 = vmatpush3.bf16.msra.mxu1 %v4341_v9  ;;  %3799 = vmatmul.mubr.msk.bf16.vlgmr.msra.gmra.mrb[0].mxu0 %vm827_vm0, %v4439_v20  ;;  %v4455_v30 = vsel %vm552_vm2, %v494_v22, 0.0  ;;  %v697_v31 = vrot.slane %v4448_v26, 1  ;;  %v698_v32 = vrot.slane %v4441_v21, 1  ;;  %v380_v33 = vmul.f32 %v3454_v24, %v4364_v12  ;;  %v4468_v9 = vld [vmem:[%s5368_s1 + $0x20] sm:$0xff]  }
  0x24   : > { %3831 = vmatpush3.bf16.msra.mxu0 %v4351_v11  ;;  %3658 = vmatprep.mubr.msk.bf16.mxu1 %vm827_vm0, %v4439_v20  ;;  %v700_v35 = vrot.slane %v4455_v30, 1  ;;  %v381_v36 = vmul.f32 %v3455_v27, %v4364_v12  ;;  %v382_v37 = vmul.f32 %v4364_v12, %v321_v28  ;;  %v323_v38 = vunpack.c.h.bf16 %v268_v13  ;;  %v274_v28 = vld [vmem:[%s4359_s12 + $0x54] sm:$0xff]   ;;  %v300_v20 = vld [vmem:[%s4359_s12 + $0xbc] sm:$0x1] }
  0x25   : > { %v699_v40 = vsel %vm681_vm3, %v697_v31, %v698_v32  ;;  %v441_v41 = vadd.f32 %v4377_v23, %v380_v33  ;;  %v324_v42 = vunpack.c.l.bf16 %v270_v25  ;;  %v383_v43 = vmul.f32 %v4364_v12, %v322_v29  ;;  %3832 = vmatprep.subr.bf16.mxu0 %v4251_v14  ;;  %3688 = vmatprep.subr.bf16.mxu1 %v4252_v19 }
  0x26   : > { %v701_v11 = vsel %vm681_vm3, %v698_v32, %v700_v35  ;;  %v442_v44 = vadd.f32 %v4377_v23, %v381_v36  ;;  %v443_v46 = vadd.f32 %v4377_v23, %v382_v37  ;;  %v384_v47 = vmul.f32 %v4364_v12, %v323_v38  ;;  %v276_v35 = vld [vmem:[%s4359_s12 + $0x5c] sm:$0x1]  ;;  %v3483_v36 = vld [vmem:[%s4359_s12 + $0x60] sm:$0xff]  }
  0x27   : > { %v4484_v49 = vpack.c.bf16 %v701_v11, %v699_v40  ;;  %v495_v50 = vmax.f32 %v441_v41, 0.0  ;;  %v385_v51 = vmul.f32 %v4364_v12, %v324_v42  ;;  %v444_v54 = vadd.f32 %v4377_v23, %v383_v43  ;;  %3689 = vmatpush3.bf16.msra.mxu1 %v4252_v19 }
  0x28   : > { %v4488_v56 = vmax.f32 %v442_v44, 0.0  ;;  %v497_v57 = vmax.f32 %v443_v46, 0.0  ;;  %v445_v59 = vadd.f32 %v4377_v23, %v384_v47  ;;  %v3458_v60 = vunpack.c.l.bf16 %v3482_v39  ;;  %3833 = vmatpush3.bf16.msra.mxu0 %v4251_v14  ;;  %3722 = vmatprep.subr.bf16.mxu1 %v4468_v9 }
  0x29   : > { %5402 = vst [vmem:[#allocation4_spill] sm:$0xff] %v4484_v49  ;;  %3802 = vmatprep.mubr.msk.bf16.mxu0 %vm827_vm0, %v4484_v49  ;;  %v4497_v0 = vsel %vm541_vm1, %v495_v50, 0.0  ;;  %v446_v1 = vadd.f32 %v4377_v23, %v385_v51  ;;  %v498_v2 = vmax.f32 %v444_v54, 0.0  ;;  %v3459_v5 = vunpack.c.h.bf16 %v3482_v39  ;;  %3866 = vmatprep.subr.bf16.mxu0 %v4463_v34 }
  0x2a   : > { %3659 = vmatmul.mubr.msk.bf16.gmra.mrb[4].mxu1 %vm827_vm0, %v4484_v49  ;;  %v4505_v6 = vsel %vm552_vm2, %v497_v57, 0.0  ;;  %v702_v13 = vrot.slane %v4497_v0, 1  ;;  %v703_v14 = vrot.slane %v4488_v56, 1  ;;  %v4509_v15 = vmax.f32 %v445_v59, 0.0 }
  0x2b   : > { %v705_v16 = vrot.slane %v4505_v6, 1  ;;  %v500_v17 = vmax.f32 %v446_v1, 0.0  ;;  %v4514_v18 = vsel %vm541_vm1, %v498_v2, 0.0  ;;  %v327_v19 = vunpack.c.l.bf16 %v273_v61 }
  0x2c   : > { %v704_v22 = vsel %vm681_vm3, %v702_v13, %v703_v14  ;;  %v707_v24 = vrot.slane %v4514_v18, 1  ;;  %v708_v25 = vrot.slane %v4509_v15, 1  ;;  %v386_v27 = vmul.f32 %v3458_v60, %v4364_v12  ;;  %v279_v60 = vld [vmem:[%s4359_s12 + $0x68] sm:$0x1] }
  0x2d   : > { %v706_v29 = vsel %vm681_vm3, %v703_v14, %v705_v16  ;;  %v4524_v31 = vsel %vm552_vm2, %v500_v17, 0.0  ;;  %v387_v32 = vmul.f32 %v3459_v5, %v4364_v12  ;;  %v388_v33 = vmul.f32 %v4364_v12, %v327_v19 }
  0x2e   : > { %v4530_v37 = vpack.c.bf16 %v706_v29, %v704_v22  ;;  %v709_v38 = vsel %vm681_vm3, %v707_v24, %v708_v25  ;;  %v710_v39 = vrot.slane %v4524_v31, 1  ;;  %v447_v40 = vadd.f32 %v4377_v23, %v386_v27 }
  0x2f   : > { %v448_v41 = vadd.f32 %v4377_v23, %v387_v32  ;;  %v449_v42 = vadd.f32 %v4377_v23, %v388_v33  ;;  %v328_v43 = vunpack.c.l.bf16 %v274_v28  ;;  %v329_v11 = vunpack.c.h.bf16 %v274_v28 }
  0x30   : > { %5403 = vst [vmem:[#allocation5_spill] sm:$0xff] %v4530_v37  ;;  %3803 = vmatmul.mubr.msk.bf16.gmra.mrb[4].mxu0 %vm827_vm0, %v4530_v37  ;;  %3662 = vmatprep.mubr.msk.bf16.mxu1 %vm827_vm0, %v4530_v37  ;;  %v711_v44 = vsel %vm681_vm3, %v708_v25, %v710_v39  ;;  %v501_v46 = vmax.f32 %v447_v40, 0.0  ;;  %v330_v47 = vunpack.c.l.bf16 %v276_v35  ;;  %v3462_v50 = vunpack.c.l.bf16 %v3483_v36  ;;  %v280_v39 = vld [vmem:[%s4359_s12 + $0x6c] sm:$0xff]  }
  0x31   : > { %v4542_v51 = vpack.c.bf16 %v711_v44, %v709_v38  ;;  %v4544_v54 = vmax.f32 %v448_v41, 0.0  ;;  %v503_v57 = vmax.f32 %v449_v42, 0.0  ;;  %v389_v59 = vmul.f32 %v4364_v12, %v328_v43 }
  0x32   : > { %v4550_v61 = vsel %vm541_vm1, %v501_v46, 0.0  ;;  %v390_v1 = vmul.f32 %v4364_v12, %v329_v11  ;;  %v391_v2 = vmul.f32 %v4364_v12, %v330_v47  ;;  %v3463_v5 = vunpack.c.h.bf16 %v3483_v36  ;;  %v282_v11 = vld [vmem:[%s4359_s12 + $0x74] sm:$0x1] }
  0x33   : > { %5404 = vst [vmem:[#allocation6_spill] sm:$0xff] %v4542_v51  ;;  %3663 = vmatmul.mubr.msk.bf16.gmra.mrb[8].mxu1 %vm827_vm0, %v4542_v51  ;;  %3806 = vmatprep.mubr.msk.bf16.mxu0 %vm827_vm0, %v4542_v51  ;;  %v4560_v13 = vsel %vm552_vm2, %v503_v57, 0.0  ;;  %v712_v14 = vrot.slane %v4550_v61, 1  ;;  %v713_v16 = vrot.slane %v4544_v54, 1  ;;  %v450_v17 = vadd.f32 %v4377_v23, %v389_v59 }
  0x34   : > { %v715_v19 = vrot.slane %v4560_v13, 1  ;;  %v451_v22 = vadd.f32 %v4377_v23, %v390_v1  ;;  %v452_v24 = vadd.f32 %v4377_v23, %v391_v2  ;;  %v333_v25 = vunpack.c.l.bf16 %v279_v60 }
  0x35   : > { %v714_v27 = vsel %vm681_vm3, %v712_v14, %v713_v16  ;;  %v504_v28 = vmax.f32 %v450_v17, 0.0  ;;  %v392_v29 = vmul.f32 %v3462_v50, %v4364_v12  ;;  %v393_v32 = vmul.f32 %v3463_v5, %v4364_v12 }
  0x36   : > { %v716_v33 = vsel %vm681_vm3, %v713_v16, %v715_v19  ;;  %v4572_v35 = vmax.f32 %v451_v22, 0.0  ;;  %v506_v36 = vmax.f32 %v452_v24, 0.0  ;;  %v394_v38 = vmul.f32 %v4364_v12, %v333_v25 }
  0x37   : > { %v4576_v40 = vpack.c.bf16 %v716_v33, %v714_v27  ;;  %v4580_v41 = vsel %vm541_vm1, %v504_v28, 0.0  ;;  %v453_v42 = vadd.f32 %v4377_v23, %v392_v29  ;;  %v454_v43 = vadd.f32 %v4377_v23, %v393_v32 }
  0x38   : > { %v4587_v44 = vsel %vm552_vm2, %v506_v36, 0.0  ;;  %v717_v46 = vrot.slane %v4580_v41, 1  ;;  %v718_v47 = vrot.slane %v4572_v35, 1  ;;  %v455_v50 = vadd.f32 %v4377_v23, %v394_v38 }
  0x39   : > { %5405 = vst [vmem:[#allocation7_spill] sm:$0xff] %v4576_v40  ;;  %3807 = vmatmul.mubr.msk.bf16.gmra.mrb[8].mxu0 %vm827_vm0, %v4576_v40  ;;  %3666 = vmatprep.mubr.msk.bf16.mxu1 %vm827_vm0, %v4576_v40  ;;  %v720_v57 = vrot.slane %v4587_v44, 1  ;;  %v507_v59 = vmax.f32 %v453_v42, 0.0  ;;  %v4597_v60 = vmax.f32 %v454_v43, 0.0  ;;  %v334_v1 = vunpack.c.l.bf16 %v280_v39 }
  0x3a   : > { %v719_v2 = vsel %vm681_vm3, %v717_v46, %v718_v47  ;;  %v509_v5 = vmax.f32 %v455_v50, 0.0  ;;  %v335_v14 = vunpack.c.h.bf16 %v280_v39  ;;  %v336_v16 = vunpack.c.l.bf16 %v282_v11 }
  0x3b   : > { %v721_v17 = vsel %vm681_vm3, %v718_v47, %v720_v57  ;;  %v4603_v19 = vsel %vm541_vm1, %v507_v59, 0.0  ;;  %v723_v22 = vrot.slane %v4597_v60, 1  ;;  %v395_v24 = vmul.f32 %v4364_v12, %v334_v1  ;;  %v3484_v59 = vld [vmem:[%s4359_s12 + $0x78] sm:$0xff]  }
  0x3c   : > { %v4607_v25 = vpack.c.bf16 %v721_v17, %v719_v2  ;;  %v4611_v27 = vsel %vm552_vm2, %v509_v5, 0.0  ;;  %v722_v28 = vrot.slane %v4603_v19, 1  ;;  %v396_v29 = vmul.f32 %v4364_v12, %v335_v14  ;;  %v285_v14 = vld [vmem:[%s4359_s12 + $0x80] sm:$0x1] }
  0x3d   : > { %v725_v32 = vrot.slane %v4611_v27, 1  ;;  %v397_v33 = vmul.f32 %v4364_v12, %v336_v16  ;;  %v456_v36 = vadd.f32 %v4377_v23, %v395_v24  ;;  %v1264_v38 = vrot.slane %v4402_v52, 2  ;;  %v286_v16 = vld [vmem:[%s4359_s12 + $0x84] sm:$0xff]  }
  0x3e   : > { %5406 = vst [vmem:[#allocation8_spill] sm:$0xff] %v4607_v25  ;;  %3667 = vmatmul.mubr.msk.bf16.gmra.mrb[12].mxu1 %vm827_vm0, %v4607_v25  ;;  %3810 = vmatprep.mubr.msk.bf16.mxu0 %vm827_vm0, %v4607_v25  ;;  %v724_v39 = vsel %vm681_vm3, %v722_v28, %v723_v22  ;;  %v457_v42 = vadd.f32 %v4377_v23, %v396_v29  ;;  %v1265_v43 = vrot.slane %v4394_v45, 2  ;;  %v1267_v11 = vrot.slane %v4406_v53, 2  ;;  %v294_v25 = vld [vmem:[%s4359_s12 + $0xa4] sm:$0x1] }
  0x3f   : > { %v726_v46 = vsel %vm681_vm3, %v723_v22, %v725_v32  ;;  %v458_v47 = vadd.f32 %v4377_v23, %v397_v33  ;;  %v510_v50 = vmax.f32 %v456_v36, 0.0  ;;  %v1271_v57 = vsel %vm1258_vm4, %v1269_v62, %v1270_v63  ;;  %v288_v36 = vld [vmem:[%s4359_s12 + $0x8c] sm:$0x1] }
  0x40   : > { %v4635_v1 = vpack.c.bf16 %v726_v46, %v724_v39  ;;  %v4637_v2 = vmax.f32 %v457_v42, 0.0  ;;  %v1266_v5 = vsel %vm1258_vm4, %v1264_v38, %v1265_v43  ;;  %v1268_v53 = vsel %vm1258_vm4, %v1265_v43, %v1267_v11 }
  0x41   : > { %v512_v17 = vmax.f32 %v458_v47, 0.0  ;;  %v4645_v22 = vsel %vm541_vm1, %v510_v50, 0.0  ;;  %v4647_v24 = vpack.c.bf16 %v1268_v53, %v1266_v5  ;;  %v1273_v62 = vsel %vm1258_vm4, %v1270_v63, %v1272_v4 }
  0x42   : > { %5407 = vst [vmem:[#allocation9_spill] sm:$0xff] %v4635_v1  ;;  %3811 = vmatmul.mubr.msk.bf16.gmra.mrb[12].mxu0 %vm827_vm0, %v4635_v1  ;;  %3670 = vmatprep.mubr.msk.bf16.mxu1 %vm827_vm0, %v4635_v1  ;;  %v727_v28 = vrot.slane %v4645_v22, 1  ;;  %v728_v29 = vrot.slane %v4637_v2, 1  ;;  %v4660_v32 = vpack.c.bf16 %v1273_v62, %v1271_v57  ;;  %v3466_v33 = vunpack.c.l.bf16 %v3484_v59 }
  0x43   : > { %v4665_v58 = vsel %vm552_vm2, %v512_v17, 0.0  ;;  %3834 = vmatprep.mubr.msk.bf16.mxu0 %vm827_vm0, %v4647_v24  ;;  %v3467_v63 = vunpack.c.h.bf16 %v3484_v59  ;;  %v339_v4 = vunpack.c.l.bf16 %v285_v14  ;;  %v340_v38 = vunpack.c.l.bf16 %v286_v16 }
  0x44   : > { %v729_v39 = vsel %vm681_vm3, %v727_v28, %v728_v29  ;;  %v730_v42 = vrot.slane %v4665_v58, 1  ;;  %v398_v43 = vmul.f32 %v3466_v33, %v4364_v12  ;;  %v341_v11 = vunpack.c.h.bf16 %v286_v16 }
  0x45   : > { %v399_v46 = vmul.f32 %v3467_v63, %v4364_v12  ;;  %v400_v47 = vmul.f32 %v4364_v12, %v339_v4  ;;  %v342_v50 = vunpack.c.l.bf16 %v288_v36  ;;  %v401_v57 = vmul.f32 %v4364_v12, %v340_v38  ;;  %v4255_v4 = vld [vmem:[%s5368_s1 + $0x68] sm:$0xff]  }
  0x46   : > { %v731_v5 = vsel %vm681_vm3, %v728_v29, %v730_v42  ;;  %v459_v59 = vadd.f32 %v4377_v23, %v398_v43  ;;  %v402_v53 = vmul.f32 %v4364_v12, %v341_v11  ;;  %v1274_v14 = vrot.slane %v4448_v26, 2 }
  0x47   : > { %v4679_v17 = vpack.c.bf16 %v731_v5, %v729_v39  ;;  %v460_v62 = vadd.f32 %v4377_v23, %v399_v46  ;;  %v461_v16 = vadd.f32 %v4377_v23, %v400_v47  ;;  %v403_v28 = vmul.f32 %v4364_v12, %v342_v50 }
  0x48   : > { %v513_v33 = vmax.f32 %v459_v59, 0.0  ;;  %v462_v36 = vadd.f32 %v4377_v23, %v401_v57  ;;  %v463_v63 = vadd.f32 %v4377_v23, %v402_v53  ;;  %v1275_v29 = vrot.slane %v4441_v21, 2 }
  0x49   : > { %5408 = vst [vmem:[#allocation10_spill] sm:$0xff] %v4679_v17  ;;  %3671 = vmatmul.mubr.msk.bf16.gmra.mrb[16].mxu1 %vm827_vm0, %v4679_v17  ;;  %v4692_v38 = vmax.f32 %v460_v62, 0.0  ;;  %v515_v39 = vmax.f32 %v461_v16, 0.0  ;;  %v464_v42 = vadd.f32 %v4377_v23, %v403_v28  ;;  %v1277_v43 = vrot.slane %v4455_v30, 2  ;;  %v3485_v16 = vld [vmem:[%s4359_s12 + $0x90] sm:$0xff]  }
  0x4a   : > { %3835 = vmatmul.mubr.msk.bf16.vlgmr.msra.gmra.mrb[0].mxu0 %vm827_vm0, %v4660_v32  ;;  %v4700_v11 = vsel %vm541_vm1, %v513_v33, 0.0  ;;  %v516_v46 = vmax.f32 %v462_v36, 0.0  ;;  %v4702_v47 = vmax.f32 %v463_v63, 0.0  ;;  %v1276_v50 = vsel %vm1258_vm4, %v1274_v14, %v1275_v29  ;;  %v4723_v28 = vld [vmem:[%s5368_s1 + $0x70] sm:$0xff]  }
  0x4b   : > { %3867 = vmatpush3.bf16.msra.mxu0 %v4463_v34  ;;  %v4708_v57 = vsel %vm552_vm2, %v515_v39, 0.0  ;;  %v732_v30 = vrot.slane %v4700_v11, 1  ;;  %v733_v5 = vrot.slane %v4692_v38, 1  ;;  %v518_v59 = vmax.f32 %v464_v42, 0.0  ;;  %v291_v42 = vld [vmem:[%s4359_s12 + $0x98] sm:$0x1] }
  0x4c   : > { %v735_v53 = vrot.slane %v4708_v57, 1  ;;  %v4715_v62 = vsel %vm541_vm1, %v516_v46, 0.0  ;;  %v738_v14 = vrot.slane %v4702_v47, 1  ;;  %v1278_v34 = vsel %vm1258_vm4, %v1275_v29, %v1277_v43  ;;  %3868 = vmatprep.subr.bf16.mxu0 %v4255_v4 }
  0x4d   : > { %v734_v33 = vsel %vm681_vm3, %v732_v30, %v733_v5  ;;  %v4728_v36 = vsel %vm552_vm2, %v518_v59, 0.0  ;;  %v737_v63 = vrot.slane %v4715_v62, 1  ;;  %v4731_v39 = vpack.c.bf16 %v1278_v34, %v1276_v50 }
  0x4e   : > { %v736_v29 = vsel %vm681_vm3, %v733_v5, %v735_v53  ;;  %v740_v43 = vrot.slane %v4728_v36, 1  ;;  %v1279_v46 = vrot.slane %v4497_v0, 2  ;;  %v1280_v3 = vrot.slane %v4488_v56, 2 }
  0x4f   : > { %v4739_v30 = vpack.c.bf16 %v736_v29, %v734_v33  ;;  %v739_v59 = vsel %vm681_vm3, %v737_v63, %v738_v14  ;;  %3838 = vmatprep.mubr.msk.bf16.mxu0 %vm827_vm0, %v4731_v39  ;;  %v1282_v50 = vrot.slane %v4505_v6, 2  ;;  %v3470_v34 = vunpack.c.l.bf16 %v3485_v16  ;;  %3869 = vmatpush3.bf16.msra.mxu0 %v4255_v4 }
  0x50   : > { %v741_v5 = vsel %vm681_vm3, %v738_v14, %v740_v43  ;;  %v1281_v53 = vsel %vm1258_vm4, %v1279_v46, %v1280_v3  ;;  %v3471_v17 = vunpack.c.h.bf16 %v3485_v16  ;;  %v345_v1 = vunpack.c.l.bf16 %v291_v42  ;;  %3902 = vmatprep.subr.bf16.mxu0 %v4723_v28 }
  0x51   : > { %5409 = vst [vmem:[#allocation11_spill] sm:$0xff] %v4739_v30  ;;  %3674 = vmatprep.mubr.msk.bf16.mxu1 %vm827_vm0, %v4739_v30  ;;  %v4751_v33 = vpack.c.bf16 %v741_v5, %v739_v59  ;;  %v1283_v63 = vsel %vm1258_vm4, %v1280_v3, %v1282_v50  ;;  %v404_v6 = vmul.f32 %v3470_v34, %v4364_v12  ;;  %v346_v29 = vunpack.c.l.bf16 %v292_v7 }
  0x52   : > { %v4755_v4 = vpack.c.bf16 %v1283_v63, %v1281_v53  ;;  %v405_v14 = vmul.f32 %v3471_v17, %v4364_v12  ;;  %v406_v16 = vmul.f32 %v4364_v12, %v345_v1  ;;  %v347_v42 = vunpack.c.h.bf16 %v292_v7 }
  0x53   : > { %5410 = vst [vmem:[#allocation12_spill] sm:$0xff] %v4751_v33  ;;  %3675 = vmatmul.mubr.msk.bf16.gmra.mrb[20].mxu1 %vm827_vm0, %v4751_v33  ;;  %v465_v43 = vadd.f32 %v4377_v23, %v404_v6  ;;  %v348_v46 = vunpack.c.l.bf16 %v294_v25  ;;  %v407_v59 = vmul.f32 %v4364_v12, %v346_v29  ;;  %v1284_v3 = vrot.slane %v4514_v18, 2  ;;  %v297_v33 = vld [vmem:[%s4359_s12 + $0xb0] sm:$0x1] }
  0x54   : > { %5411 = vst [vmem:[#allocation13_spill] sm:$0xff] %v4755_v4  ;;  %3839 = vmatmul.mubr.msk.bf16.gmra.mrb[4].mxu0 %vm827_vm0, %v4755_v4  ;;  %v466_v50 = vadd.f32 %v4377_v23, %v405_v14  ;;  %v467_v17 = vadd.f32 %v4377_v23, %v406_v16  ;;  %v408_v1 = vmul.f32 %v4364_v12, %v347_v42  ;;  %v1285_v7 = vrot.slane %v4509_v15, 2 }
  0x55   : > { %v519_v34 = vmax.f32 %v465_v43, 0.0  ;;  %v409_v5 = vmul.f32 %v4364_v12, %v348_v46  ;;  %v468_v25 = vadd.f32 %v4377_v23, %v407_v59  ;;  %v1287_v53 = vrot.slane %v4524_v31, 2 }
  0x56   : > { %v4773_v63 = vmax.f32 %v466_v50, 0.0  ;;  %v521_v6 = vmax.f32 %v467_v17, 0.0  ;;  %v469_v29 = vadd.f32 %v4377_v23, %v408_v1  ;;  %v1286_v14 = vsel %vm1258_vm4, %v1284_v3, %v1285_v7 }
  0x57   : > { %v4779_v16 = vsel %vm541_vm1, %v519_v34, 0.0  ;;  %v470_v42 = vadd.f32 %v4377_v23, %v409_v5  ;;  %v522_v43 = vmax.f32 %v468_v25, 0.0  ;;  %v1288_v46 = vsel %vm1258_vm4, %v1285_v7, %v1287_v53  ;;  %v3486_v7 = vld [vmem:[%s4359_s12 + $0xa8] sm:$0xff]  }
  0x58   : > { %v4785_v31 = vsel %vm552_vm2, %v521_v6, 0.0  ;;  %v742_v59 = vrot.slane %v4779_v16, 1  ;;  %v743_v50 = vrot.slane %v4773_v63, 1  ;;  %v4789_v17 = vmax.f32 %v469_v29, 0.0 }
  0x59   : > { %v745_v3 = vrot.slane %v4785_v31, 1  ;;  %v524_v1 = vmax.f32 %v470_v42, 0.0  ;;  %v4794_v34 = vsel %vm541_vm1, %v522_v43, 0.0  ;;  %v4796_v5 = vpack.c.bf16 %v1288_v46, %v1286_v14  ;;  %v298_v46 = vld [vmem:[%s4359_s12 + $0xb4] sm:$0xff]  }
  0x5a   : > { %v744_v25 = vsel %vm681_vm3, %v742_v59, %v743_v50  ;;  %v747_v53 = vrot.slane %v4794_v34, 1  ;;  %v748_v6 = vrot.slane %v4789_v17, 1  ;;  %v1289_v29 = vrot.slane %v4550_v61, 2 }
  0x5b   : > { %5412 = vst [vmem:[#allocation14_spill] sm:$0xff] %v4796_v5  ;;  %v746_v30 = vsel %vm681_vm3, %v743_v50, %v745_v3  ;;  %v4807_v42 = vsel %vm552_vm2, %v524_v1, 0.0  ;;  %3842 = vmatprep.mubr.msk.bf16.mxu0 %vm827_vm0, %v4796_v5  ;;  %v1290_v14 = vrot.slane %v4544_v54, 2  ;;  %v1292_v43 = vrot.slane %v4560_v13, 2 }
  0x5c   : > { %v4814_v59 = vpack.c.bf16 %v746_v30, %v744_v25  ;;  %v749_v40 = vsel %vm681_vm3, %v747_v53, %v748_v6  ;;  %v750_v51 = vrot.slane %v4807_v42, 1  ;;  %v3474_v37 = vunpack.c.l.bf16 %v3486_v7 }
  0x5d   : > { %v1291_v50 = vsel %vm1258_vm4, %v1289_v29, %v1290_v14  ;;  %v1293_v3 = vsel %vm1258_vm4, %v1290_v14, %v1292_v43  ;;  %v3475_v1 = vunpack.c.h.bf16 %v3486_v7  ;;  %v351_v49 = vunpack.c.l.bf16 %v297_v33 }
  0x5e   : > { %5413 = vst [vmem:[#allocation15_spill] sm:$0xff] %v4814_v59  ;;  %3678 = vmatprep.mubr.msk.bf16.mxu1 %vm827_vm0, %v4814_v59  ;;  %v751_v13 = vsel %vm681_vm3, %v748_v6, %v750_v51  ;;  %v4824_v5 = vpack.c.bf16 %v1293_v3, %v1291_v50  ;;  %v410_v30 = vmul.f32 %v3474_v37, %v4364_v12  ;;  %v352_v25 = vunpack.c.l.bf16 %v298_v46 }
  0x5f   : > { %v4827_v53 = vpack.c.bf16 %v751_v13, %v749_v40  ;;  %v411_v4 = vmul.f32 %v3475_v1, %v4364_v12  ;;  %v412_v29 = vmul.f32 %v4364_v12, %v351_v49  ;;  %v353_v14 = vunpack.c.h.bf16 %v298_v46 }
  0x60   : > { %3843 = vmatmul.mubr.msk.bf16.gmra.mrb[8].mxu0 %vm827_vm0, %v4824_v5  ;;  %v471_v33 = vadd.f32 %v4377_v23, %v410_v30  ;;  %v354_v7 = vunpack.c.l.bf16 %v300_v20  ;;  %v413_v51 = vmul.f32 %v4364_v12, %v352_v25  ;;  %v1294_v6 = vrot.slane %v4580_v41, 2 }
  0x61   : > { %5414 = vst [vmem:[#allocation16_spill] sm:$0xff] %v4827_v53  ;;  %3679 = vmatmul.mubr.msk.bf16.gmra.mrb[24].mxu1 %vm827_vm0, %v4827_v53  ;;  %v472_v37 = vadd.f32 %v4377_v23, %v411_v4  ;;  %v473_v40 = vadd.f32 %v4377_v23, %v412_v29  ;;  %v414_v49 = vmul.f32 %v4364_v12, %v353_v14  ;;  %v1295_v43 = vrot.slane %v4572_v35, 2 }
  0x62   : > { %v525_v46 = vmax.f32 %v471_v33, 0.0  ;;  %v415_v50 = vmul.f32 %v4364_v12, %v354_v7  ;;  %v474_v20 = vadd.f32 %v4377_v23, %v413_v51  ;;  %v1297_v3 = vrot.slane %v4587_v44, 2 }
  0x63   : > { %v4845_v1 = vmax.f32 %v472_v37, 0.0  ;;  %v527_v13 = vmax.f32 %v473_v40, 0.0  ;;  %v475_v30 = vadd.f32 %v4377_v23, %v414_v49  ;;  %v1296_v4 = vsel %vm1258_vm4, %v1294_v6, %v1295_v43 }
  0x64   : > { %v4851_v25 = vsel %vm541_vm1, %v525_v46, 0.0  ;;  %v476_v29 = vadd.f32 %v4377_v23, %v415_v50  ;;  %v528_v14 = vmax.f32 %v474_v20, 0.0  ;;  %v1298_v33 = vsel %vm1258_vm4, %v1295_v43, %v1297_v3 }
  0x65   : > { %v4857_v7 = vsel %vm552_vm2, %v527_v13, 0.0  ;;  %v752_v44 = vrot.slane %v4851_v25, 1  ;;  %v753_v51 = vrot.slane %v4845_v1, 1  ;;  %v4861_v37 = vmax.f32 %v475_v30, 0.0 }
  0x66   : > { %v755_v6 = vrot.slane %v4857_v7, 1  ;;  %v530_v40 = vmax.f32 %v476_v29, 0.0  ;;  %v4866_v49 = vsel %vm541_vm1, %v528_v14, 0.0  ;;  %v4868_v46 = vpack.c.bf16 %v1298_v33, %v1296_v4 }
  0x67   : > { %v754_v43 = vsel %vm681_vm3, %v752_v44, %v753_v51  ;;  %v757_v50 = vrot.slane %v4866_v49, 1  ;;  %v758_v20 = vrot.slane %v4861_v37, 1  ;;  %v1299_v3 = vrot.slane %v4603_v19, 2 }
  0x68   : > { %v756_v13 = vsel %vm681_vm3, %v753_v51, %v755_v6  ;;  %v4877_v30 = vsel %vm552_vm2, %v530_v40, 0.0  ;;  %3846 = vmatprep.mubr.msk.bf16.mxu0 %vm827_vm0, %v4868_v46  ;;  %v1300_v4 = vrot.slane %v4597_v60, 2  ;;  %v1302_v29 = vrot.slane %v4611_v27, 2 }
  0x69   : > { %v4883_v14 = vpack.c.bf16 %v756_v13, %v754_v43  ;;  %v759_v33 = vsel %vm681_vm3, %v757_v50, %v758_v20  ;;  %v760_v44 = vrot.slane %v4877_v30, 1  ;;  %v1304_v6 = vrot.slane %v4645_v22, 2 }
  0x6a   : > { %v1301_v53 = vsel %vm1258_vm4, %v1299_v3, %v1300_v4  ;;  %v1303_v51 = vsel %vm1258_vm4, %v1300_v4, %v1302_v29  ;;  %v1305_v40 = vrot.slane %v4637_v2, 2  ;;  %v1307_v43 = vrot.slane %v4665_v58, 2 }
  0x6b   : > { %5415 = vst [vmem:[#allocation17_spill] sm:$0xff] %v4883_v14  ;;  %3682 = vmatprep.mubr.msk.bf16.mxu1 %vm827_vm0, %v4883_v14  ;;  %v761_v59 = vsel %vm681_vm3, %v758_v20, %v760_v44  ;;  %v4894_v27 = vpack.c.bf16 %v1303_v51, %v1301_v53  ;;  %v1309_v50 = vrot.slane %v4700_v11, 2  ;;  %v1310_v4 = vrot.slane %v4692_v38, 2 }
  0x6c   : > { %v4898_v13 = vpack.c.bf16 %v761_v59, %v759_v33  ;;  %v1306_v3 = vsel %vm1258_vm4, %v1304_v6, %v1305_v40  ;;  %v1312_v29 = vrot.slane %v4708_v57, 2  ;;  %v1308_v14 = vsel %vm1258_vm4, %v1305_v40, %v1307_v43 }
  0x6d   : > { %3847 = vmatmul.mubr.msk.bf16.gmra.mrb[12].mxu0 %vm827_vm0, %v4894_v27  ;;  %v1314_v53 = vrot.slane %v4715_v62, 2  ;;  %v4909_v58 = vpack.c.bf16 %v1308_v14, %v1306_v3  ;;  %v1311_v59 = vsel %vm1258_vm4, %v1309_v50, %v1310_v4  ;;  %v1315_v33 = vrot.slane %v4702_v47, 2 }
  0x6e   : > { %3683 = vmatmul.mubr.msk.bf16.gmra.mrb[28].mxu1 %vm827_vm0, %v4898_v13  ;;  %v1313_v20 = vsel %vm1258_vm4, %v1310_v4, %v1312_v29  ;;  %v5399_v44 = vmov 0.0|0.0   ;;  %v1317_v57 = vrot.slane %v4728_v36, 2  ;;  %v1319_v51 = vrot.slane %v4779_v16, 2 }
  0x6f   : > { %3690 = vmatprep.mubr.bf16.mxu1 %v5399_v44  ;;  %v1320_v6 = vrot.slane %v4773_v63, 2  ;;  %v4920_v14 = vpack.c.bf16 %v4394_v45, %v4402_v52  ;;  %3850 = vmatprep.mubr.msk.bf16.mxu0 %vm827_vm0, %v4909_v58  ;;  %v1316_v40 = vsel %vm1258_vm4, %v1314_v53, %v1315_v33  ;;  %v1322_v43 = vrot.slane %v4785_v31, 2  ;;  %v3487_v31 = vld [vmem:[%s4359_s12 + $0xc0] sm:$0xff]  }
  0x70   : > { %v4926_v50 = vpack.c.bf16 %v1313_v20, %v1311_v59  ;;  %v1318_v36 = vsel %vm1258_vm4, %v1315_v33, %v1317_v57  ;;  %v1324_v3 = vrot.slane %v4794_v34, 2  ;;  %v1325_v4 = vrot.slane %v4789_v17, 2  ;;  %v303_v33 = vld [vmem:[%s4359_s12 + $0xc8] sm:$0x1] }
  0x71   : > { %v4931_v29 = vpack.c.bf16 %v1318_v36, %v1316_v40  ;;  %v1321_v45 = vsel %vm1258_vm4, %v1319_v51, %v1320_v6  ;;  %v1323_v52 = vsel %vm1258_vm4, %v1320_v6, %v1322_v43  ;;  %v1327_v44 = vrot.slane %v4807_v42, 2  ;;  %v4256_v57 = vld [vmem:[%s5368_s1 + $0x28] sm:$0xff]  }
  0x72   : > { %v4938_v53 = vpack.c.bf16 %v4396_v48, %v4411_v55  ;;  %v4943_v59 = vpack.c.bf16 %v4441_v21, %v4448_v26  ;;  %v4947_v20 = vpack.c.bf16 %v4572_v35, %v4580_v41  ;;  %v4955_v42 = vpack.c.bf16 %v1323_v52, %v1321_v45 }
  0x73   : > { %v4959_v48 = vpack.c.bf16 %v4488_v56, %v4497_v0  ;;  %v1326_v55 = vsel %vm1258_vm4, %v1324_v3, %v1325_v4  ;;  %v1329_v21 = vrot.slane %v4851_v25, 2  ;;  %v1328_v26 = vsel %vm1258_vm4, %v1325_v4, %v1327_v44 }
  0x74   : > { %v1330_v35 = vrot.slane %v4845_v1, 2  ;;  %v3478_v41 = vunpack.c.l.bf16 %v3487_v31  ;;  %v3479_v51 = vunpack.c.h.bf16 %v3487_v31  ;;  %v1332_v56 = vrot.slane %v4857_v7, 2 }
  0x75   : > { %3851 = vmatmul.mubr.msk.bf16.gmra.mrb[16].mxu0 %vm827_vm0, %v4926_v50  ;;  %v357_v0 = vunpack.c.l.bf16 %v303_v33  ;;  %v4975_v6 = vpack.c.bf16 %v4597_v60, %v4603_v19  ;;  %v4979_v40 = vpack.c.bf16 %v4637_v2, %v4645_v22  ;;  %v1334_v44 = vrot.slane %v4866_v49, 2  ;;  %v4991_v60 = vld [vmem:[%s5368_s1 + $0x30] sm:$0xff]   ;;  %v4263_v2 = vld [vmem:[%s5369_s2] ss:$0 sm:$0xff] }
  0x76   : > { %3691 = vmatmul.mubr.msk.bf16.vlgmr.msra.gmra.mrb[0].mxu1 %vm827_vm0, %v4920_v14  ;;  %3854 = vmatprep.mubr.msk.bf16.mxu0 %vm827_vm0, %v4931_v29  ;;  %v416_v43 = vmul.f32 %v3478_v41, %v4364_v12  ;;  %v4986_v36 = vpack.c.bf16 %v4692_v38, %v4700_v11  ;;  %v4993_v19 = vpack.c.bf16 %v1328_v26, %v1326_v55  ;;  %v1335_v45 = vrot.slane %v4861_v37, 2 }
  0x77   : > { %3723 = vmatpush3.bf16.msra.mxu1 %v4468_v9  ;;  %3694 = vmatprep.mubr.msk.bf16.mxu1 %vm827_vm0, %v4938_v53  ;;  %v417_v9 = vmul.f32 %v3479_v51, %v4364_v12  ;;  %v418_v22 = vmul.f32 %v4263_v2, %v357_v0  ;;  %v5000_v12 = vpack.c.bf16 %v4702_v47, %v4715_v62  ;;  %v1337_v47 = vrot.slane %v4877_v30, 2  ;;  %v4261_v0 = vld [vmem:[%s5368_s1 + $0x80] sm:$0xff]  }
  0x78   : > { %3724 = vmatprep.subr.bf16.mxu1 %v4256_v57  ;;  %v5004_v38 = vpack.c.bf16 %v4773_v63, %v4779_v16  ;;  %v477_v11 = vadd.f32 %v4377_v23, %v416_v43  ;;  %v5010_v3 = vpack.c.bf16 %v4789_v17, %v4794_v34  ;;  %v5014_v4 = vpack.c.bf16 %v4845_v1, %v4851_v25  ;;  %v4264_v2 = vld [vmem:[%s5368_s1 + $0x40] sm:$0xff]  }
  0x79   : > { %v478_v7 = vadd.f32 %v4377_v23, %v417_v9  ;;  %v479_v62 = vadd.f32 %v4377_v23, %v418_v22  ;;  %v5021_v63 = vpack.c.bf16 %v4861_v37, %v4866_v49  ;;  %v1331_v23 = vsel %vm1258_vm4, %v1329_v21, %v1330_v35  ;;  %v4260_v9 = vld [vmem:[%s5368_s1 + $0x38] sm:$0xff]   ;;  %v5418_v22 = vld [vmem:[#allocation14_spill] sm:$0xff] }
  0x7a   : > { %v531_v16 = vmax.f32 %v477_v11, 0.0  ;;  %v1333_v34 = vsel %vm1258_vm4, %v1330_v35, %v1332_v56  ;;  %v1336_v25 = vsel %vm1258_vm4, %v1334_v44, %v1335_v45  ;;  %v1338_v37 = vsel %vm1258_vm4, %v1335_v45, %v1337_v47  ;;  %v4259_v56 = vld [vmem:[%s5368_s1 + $0x78] sm:$0xff]   ;;  %v4262_v45 = vld [vmem:[%s5368_s1 + $0x88] sm:$0xff]   ;;  %v5421_v47 = vld [vmem:[#allocation4_spill] sm:$0xff] }
  0x7b   : > { %3725 = vmatpush3.bf16.msra.mxu1 %v4256_v57  ;;  %v533_v17 = vmax.f32 %v479_v62, 0.0  ;;  %v5032_v1 = vmax.f32 %v478_v7, 0.0  ;;  %v5046_v52 = vpack.c.bf16 %v4509_v15, %v4514_v18  ;;  %v5048_v31 = vpack.c.bf16 %v1333_v34, %v1331_v23  ;;  %v5420_v7 = vld [vmem:[#allocation3_spill] sm:$0xff]  ;;  %v5422_v62 = vld [vmem:[#allocation5_spill] sm:$0xff]  ;;  %v5425_v23 = vld [vmem:[#allocation8_spill] sm:$0xff] }
  0x7c   : > { %3758 = vmatprep.subr.bf16.mxu1 %v4991_v60  ;;  %v5040_v49 = vsel %vm541_vm1, %v531_v16, 0.0  ;;  %v5050_v33 = vpack.c.bf16 %v1338_v37, %v1336_v25  ;;  %v5056_v8 = vpack.c.bf16 %v4544_v54, %v4550_v61  ;;  %v5419_v11 = vmov 0.0|0.0   ;;  %v5423_v16 = vld [vmem:[#allocation6_spill] sm:$0xff]  ;;  %v5426_v34 = vld [vmem:[#allocation9_spill] sm:$0xff]  ;;  %v5428_v25 = vld [vmem:[#allocation11_spill] sm:$0xff] }
  0x7d   : > { %3855 = vmatmul.mubr.msk.bf16.gmra.mrb[20].mxu0 %vm827_vm0, %v4955_v42  ;;  %v609_v30 = vsel %vm552_vm2, %v533_v17, 0.0  ;;  %v2083_v57 = vrot.slane %v5040_v49, 2  ;;  %v2084_v55 = vrot.slane %v5032_v1, 2  ;;  %v1862_v54 = vrot.slane %v5040_v49, 1  ;;  %v5424_v17 = vld [vmem:[#allocation7_spill] sm:$0xff]  ;;  %v5429_v37 = vld [vmem:[#allocation12_spill] sm:$0xff] }
  0x7e   : > { %3695 = vmatmul.mubr.msk.bf16.gmra.mrb[4].mxu1 %vm827_vm0, %v4943_v59  ;;  %3858 = vmatprep.mubr.msk.bf16.mxu0 %vm827_vm0, %v4993_v19  ;;  %v2086_v21 = vrot.slane %v609_v30, 2  ;;  %v1863_v61 = vrot.slane %v5032_v1, 1  ;;  %v1865_v26 = vrot.slane %v609_v30, 1  ;;  %v4265_v30 = vld [vmem:[%s5368_s1 + $0x48] sm:$0xff]  }
  0x7f   : > { %3698 = vmatprep.mubr.msk.bf16.mxu1 %vm827_vm0, %v4959_v48  ;;  %v2085_v10 = vsel %vm1258_vm4, %v2083_v57, %v2084_v55 }
  0x80   : > { %v2087_v15 = vsel %vm1258_vm4, %v2084_v55, %v2086_v21  ;;  %v1864_v35 = vsel %vm681_vm3, %v1862_v54, %v1863_v61  ;;  %v1866_v41 = vsel %vm681_vm3, %v1863_v61, %v1865_v26 }
  0x81   : > { %v5068_v18 = vpack.c.bf16 %v2087_v15, %v2085_v10  ;;  %v5074_v51 = vpack.c.bf16 %v1866_v41, %v1864_v35 }
  0x85   : > { %3859 = vmatmul.mubr.msk.bf16.gmra.mrb[24].mxu0 %vm827_vm0, %v5048_v31 }
  0x86   : > { %3699 = vmatmul.mubr.msk.bf16.gmra.mrb[8].mxu1 %vm827_vm0, %v5046_v52  ;;  %3862 = vmatprep.mubr.msk.bf16.mxu0 %vm827_vm0, %v5050_v33 }
  0x87   : > { %3702 = vmatprep.mubr.msk.bf16.mxu1 %vm827_vm0, %v5056_v8 }
  0x8d   : > { %3863 = vmatmul.mubr.msk.bf16.gmra.mrb[28].mxu0 %vm827_vm0, %v5068_v18 }
  0x8e   : > { %3703 = vmatmul.mubr.msk.bf16.gmra.mrb[12].mxu1 %vm827_vm0, %v4947_v20  ;;  %3870 = vmatprep.mubr.msk.bf16.mxu0 %vm827_vm0, %v4938_v53 }
  0x8f   : > { %3706 = vmatprep.mubr.msk.bf16.mxu1 %vm827_vm0, %v4975_v6 }
  0x95   : > { %3871 = vmatmul.mubr.msk.bf16.vlgmr.msra.gmra.mrb[0].mxu0 %vm827_vm0, %v4943_v59 }
  0x96   : > { %3707 = vmatmul.mubr.msk.bf16.gmra.mrb[16].mxu1 %vm827_vm0, %v4979_v40  ;;  %3903 = vmatpush3.bf16.msra.mxu0 %v4723_v28  ;;  %v5416_v28 = vmov 0.0  }
  0x97   : > { %3710 = vmatprep.mubr.msk.bf16.mxu1 %vm827_vm0, %v4986_v36  ;;  %3874 = vmatprep.mubr.msk.bf16.mxu0 %vm827_vm0, %v4959_v48  ;;  %v1259_v44 = vrot.slane %v5416_v28, 2 }
  0x98   : > { %3904 = vmatprep.subr.bf16.mxu0 %v4259_v56 }
  0x99   : > { %v5116_v43 = vpack.c.bf16 %v1259_v44, %v1259_v44 }
  0x9a   : > { %3905 = vmatpush3.bf16.msra.mxu0 %v4259_v56 }
  0x9b   : > { %3938 = vmatprep.subr.bf16.mxu0 %v4261_v0 }
  0x9d   : > { %3875 = vmatmul.mubr.msk.bf16.gmra.mrb[4].mxu0 %vm827_vm0, %v5046_v52 }
  0x9e   : > { %3711 = vmatmul.mubr.msk.bf16.gmra.mrb[20].mxu1 %vm827_vm0, %v5000_v12  ;;  %3878 = vmatprep.mubr.msk.bf16.mxu0 %vm827_vm0, %v5056_v8 }
  0x9f   : > { %3714 = vmatprep.mubr.msk.bf16.mxu1 %vm827_vm0, %v5004_v38 }
  0xa5   : > { %3879 = vmatmul.mubr.msk.bf16.gmra.mrb[8].mxu0 %vm827_vm0, %v4947_v20 }
  0xa6   : > { %3715 = vmatmul.mubr.msk.bf16.gmra.mrb[24].mxu1 %vm827_vm0, %v5010_v3  ;;  %3882 = vmatprep.mubr.msk.bf16.mxu0 %vm827_vm0, %v4975_v6 }
  0xa7   : > { %3718 = vmatprep.mubr.msk.bf16.mxu1 %vm827_vm0, %v5014_v4 }
  0xad   : > { %3883 = vmatmul.mubr.msk.bf16.gmra.mrb[12].mxu0 %vm827_vm0, %v4979_v40 }
  0xae   : > { %3719 = vmatmul.mubr.msk.bf16.gmra.mrb[28].mxu1 %vm827_vm0, %v5021_v63  ;;  %3886 = vmatprep.mubr.msk.bf16.mxu0 %vm827_vm0, %v4986_v36 }
  0xaf   : > { %3726 = vmatprep.mubr.msk.bf16.mxu1 %vm827_vm0, %v5116_v43 }
  0xb5   : > { %3887 = vmatmul.mubr.msk.bf16.gmra.mrb[16].mxu0 %vm827_vm0, %v5000_v12 }
  0xb6   : > { %3727 = vmatmul.mubr.msk.bf16.vlgmr.msra.gmra.mrb[0].mxu1 %vm827_vm0, %v4647_v24  ;;  %3890 = vmatprep.mubr.msk.bf16.mxu0 %vm827_vm0, %v5004_v38  ;;  %v5417_v24 = vld [vmem:[#allocation13_spill] sm:$0xff] }
  0xb7   : > { %3759 = vmatpush3.bf16.msra.mxu1 %v4991_v60  ;;  %3730 = vmatprep.mubr.msk.bf16.mxu1 %vm827_vm0, %v4660_v32  ;;  %v1645_v60 = vpack.c.bf16 %v5032_v1, %v5040_v49  ;;  %v5427_v1 = vld [vmem:[#allocation10_spill] sm:$0xff]  ;;  %v5430_v49 = vld [vmem:[#allocation15_spill] sm:$0xff] }
  0xb8   : > { %3760 = vmatprep.subr.bf16.mxu1 %v4260_v9 }
  0xbb   : > { %3761 = vmatpush3.bf16.msra.mxu1 %v4260_v9 }
  0xbc   : > { %3974 = vmatprep.subr.bf16.mxu1 %v4264_v2 }
  0xbd   : > { %3891 = vmatmul.mubr.msk.bf16.gmra.mrb[20].mxu0 %vm827_vm0, %v5010_v3 }
  0xbe   : > { %3731 = vmatmul.mubr.msk.bf16.gmra.mrb[4].mxu1 %vm827_vm0, %v4731_v39  ;;  %3894 = vmatprep.mubr.msk.bf16.mxu0 %vm827_vm0, %v5014_v4 }
  0xbf   : > { %3734 = vmatprep.mubr.msk.bf16.mxu1 %vm827_vm0, %v5417_v24 }
  0xc5   : > { %3895 = vmatmul.mubr.msk.bf16.gmra.mrb[24].mxu0 %vm827_vm0, %v5021_v63 }
  0xc6   : > { %3735 = vmatmul.mubr.msk.bf16.gmra.mrb[8].mxu1 %vm827_vm0, %v5418_v22  ;;  %3898 = vmatprep.mubr.msk.bf16.mxu0 %vm827_vm0, %v1645_v60 }
  0xc7   : > { %3738 = vmatprep.mubr.msk.bf16.mxu1 %vm827_vm0, %v4824_v5 }
  0xcd   : > { %3899 = vmatmul.mubr.bf16.gmra.mrb[28].mxu0 %v5419_v11 }
  0xce   : > { %3739 = vmatmul.mubr.msk.bf16.gmra.mrb[12].mxu1 %vm827_vm0, %v4868_v46  ;;  %3906 = vmatprep.mubr.msk.bf16.mxu0 %vm827_vm0, %v5420_v7 }
  0xcf   : > { %3742 = vmatprep.mubr.msk.bf16.mxu1 %vm827_vm0, %v4894_v27 }
  0xd5   : > { %3907 = vmatmul.mubr.msk.bf16.vlgmr.msra.gmra.mrb[0].mxu0 %vm827_vm0, %v5421_v47 }
  0xd6   : > { %3743 = vmatmul.mubr.msk.bf16.gmra.mrb[16].mxu1 %vm827_vm0, %v4909_v58  ;;  %3939 = vmatpush3.bf16.msra.mxu0 %v4261_v0 }
  0xd7   : > { %3746 = vmatprep.mubr.msk.bf16.mxu1 %vm827_vm0, %v4926_v50  ;;  %3910 = vmatprep.mubr.msk.bf16.mxu0 %vm827_vm0, %v5422_v62 }
  0xd8   : > { %3940 = vmatprep.subr.bf16.mxu0 %v4262_v45 }
  0xda   : > { %3941 = vmatpush3.bf16.msra.mxu0 %v4262_v45 }
  0xdd   : > { %3911 = vmatmul.mubr.msk.bf16.gmra.mrb[4].mxu0 %vm827_vm0, %v5423_v16 }
  0xde   : > { %3747 = vmatmul.mubr.msk.bf16.gmra.mrb[20].mxu1 %vm827_vm0, %v4931_v29  ;;  %3914 = vmatprep.mubr.msk.bf16.mxu0 %vm827_vm0, %v5424_v17 }
  0xdf   : > { %3750 = vmatprep.mubr.msk.bf16.mxu1 %vm827_vm0, %v4955_v42 }
  0xe5   : > { %3915 = vmatmul.mubr.msk.bf16.gmra.mrb[8].mxu0 %vm827_vm0, %v5425_v23 }
  0xe6   : > { %3751 = vmatmul.mubr.msk.bf16.gmra.mrb[24].mxu1 %vm827_vm0, %v4993_v19  ;;  %3918 = vmatprep.mubr.msk.bf16.mxu0 %vm827_vm0, %v5426_v34 }
  0xe7   : > { %3754 = vmatprep.mubr.msk.bf16.mxu1 %vm827_vm0, %v5048_v31 }
  0xed   : > { %3919 = vmatmul.mubr.msk.bf16.gmra.mrb[12].mxu0 %vm827_vm0, %v5427_v1 }
  0xee   : > { %3755 = vmatmul.mubr.msk.bf16.gmra.mrb[28].mxu1 %vm827_vm0, %v5050_v33  ;;  %3922 = vmatprep.mubr.msk.bf16.mxu0 %vm827_vm0, %v5428_v25 }
  0xef   : > { %3762 = vmatprep.mubr.msk.bf16.mxu1 %vm827_vm0, %v4920_v14  ;;  %v5431_v14 = vld [vmem:[#allocation16_spill] sm:$0xff] }
  0xf5   : > { %3923 = vmatmul.mubr.msk.bf16.gmra.mrb[16].mxu0 %vm827_vm0, %v5429_v37 }
  0xf6   : > { %3763 = vmatmul.mubr.msk.bf16.vlgmr.msra.gmra.mrb[0].mxu1 %vm827_vm0, %v4938_v53  ;;  %3926 = vmatprep.mubr.msk.bf16.mxu0 %vm827_vm0, %v5430_v49  ;;  %v5432_v53 = vld [vmem:[#allocation17_spill] sm:$0xff] }
  0xf7   : > { %3976 = vmatpush3.bf16.msra.mxu1 %v4264_v2  ;;  %3766 = vmatprep.mubr.msk.bf16.mxu1 %vm827_vm0, %v4943_v59  ;;  %v5433_v59 = vld [vmem:[#allocation2_spill] sm:$0xff] }
  0xf8   : > { %3975 = vmatprep.subr.bf16.mxu1 %v4265_v30 }
  0xfb   : > { %3977 = vmatpush3.bf16.msra.mxu1 %v4265_v30 }
  0xfd   : > { %3927 = vmatmul.mubr.msk.bf16.gmra.mrb[20].mxu0 %vm827_vm0, %v5431_v14 }
  0xfe   : > { %3767 = vmatmul.mubr.msk.bf16.gmra.mrb[4].mxu1 %vm827_vm0, %v4959_v48  ;;  %3930 = vmatprep.mubr.msk.bf16.mxu0 %vm827_vm0, %v5432_v53 }
  0xff   : > { %3770 = vmatprep.mubr.msk.bf16.mxu1 %vm827_vm0, %v5046_v52 }
 0x105   : > { %3931 = vmatmul.mubr.msk.bf16.gmra.mrb[24].mxu0 %vm827_vm0, %v4898_v13 }
 0x106   : > { %3771 = vmatmul.mubr.msk.bf16.gmra.mrb[8].mxu1 %vm827_vm0, %v5056_v8  ;;  %3934 = vmatprep.mubr.msk.bf16.mxu0 %vm827_vm0, %v5074_v51 }
 0x107   : > { %3774 = vmatprep.mubr.msk.bf16.mxu1 %vm827_vm0, %v4947_v20 }
 0x10d   : > { %3935 = vmatmul.mubr.msk.bf16.gmra.mrb[28].mxu0 %vm827_vm0, %v5433_v59 }
 0x10e   : > { %3775 = vmatmul.mubr.msk.bf16.gmra.mrb[12].mxu1 %vm827_vm0, %v4975_v6  ;;  %3942 = vmatprep.mubr.msk.bf16.mxu0 %vm827_vm0, %v4660_v32 }
 0x10f   : > { %3778 = vmatprep.mubr.msk.bf16.mxu1 %vm827_vm0, %v4979_v40 }
 0x115   : > { %3943 = vmatmul.mubr.msk.bf16.vlgmr.msra.gmra.mrb[0].mxu0 %vm827_vm0, %v4731_v39 }
 0x116   : > { %3779 = vmatmul.mubr.msk.bf16.gmra.mrb[16].mxu1 %vm827_vm0, %v4986_v36  ;;  %3946 = vmatprep.mubr.msk.bf16.mxu0 %vm827_vm0, %v5417_v24 }
 0x117   : > { %3782 = vmatprep.mubr.msk.bf16.mxu1 %vm827_vm0, %v5000_v12 }
 0x11d   : > { %3947 = vmatmul.mubr.msk.bf16.gmra.mrb[4].mxu0 %vm827_vm0, %v5418_v22 }
 0x11e   : > { %3783 = vmatmul.mubr.msk.bf16.gmra.mrb[20].mxu1 %vm827_vm0, %v5004_v38  ;;  %3950 = vmatprep.mubr.msk.bf16.mxu0 %vm827_vm0, %v4824_v5 }
 0x11f   : > { %3786 = vmatprep.mubr.msk.bf16.mxu1 %vm827_vm0, %v5010_v3 }
 0x125   : > { %3951 = vmatmul.mubr.msk.bf16.gmra.mrb[8].mxu0 %vm827_vm0, %v4868_v46 }
 0x126   : > { %3787 = vmatmul.mubr.msk.bf16.gmra.mrb[24].mxu1 %vm827_vm0, %v5014_v4  ;;  %3954 = vmatprep.mubr.msk.bf16.mxu0 %vm827_vm0, %v4894_v27 }
 0x127   : > { %3790 = vmatprep.mubr.msk.bf16.mxu1 %vm827_vm0, %v5021_v63 }
 0x12d   : > { %3955 = vmatmul.mubr.msk.bf16.gmra.mrb[12].mxu0 %vm827_vm0, %v4909_v58 }
 0x12e   : > { %3791 = vmatmul.mubr.msk.bf16.gmra.mrb[28].mxu1 %vm827_vm0, %v1645_v60  ;;  %3958 = vmatprep.mubr.msk.bf16.mxu0 %vm827_vm0, %v4926_v50 }
 0x12f   : > { %3814 = vmatprep.mubr.msk.bf16.mxu1 %vm827_vm0, %v5427_v1 }
 0x135   : > { %3959 = vmatmul.mubr.msk.bf16.gmra.mrb[16].mxu0 %vm827_vm0, %v4931_v29 }
 0x136   : > { %3815 = vmatmul.mubr.msk.bf16.vlgmr.msra.gmra.mrb[16].mxu1 %vm827_vm0, %v5428_v25  ;;  %3962 = vmatprep.mubr.msk.bf16.mxu0 %vm827_vm0, %v4955_v42 }
 0x137   : > { %3818 = vmatprep.mubr.msk.bf16.mxu1 %vm827_vm0, %v5429_v37 }
 0x13d   : > { %3963 = vmatmul.mubr.msk.bf16.gmra.mrb[20].mxu0 %vm827_vm0, %v4993_v19 }
 0x13e   : > { %3819 = vmatmul.mubr.msk.bf16.gmra.mrb[20].mxu1 %vm827_vm0, %v5430_v49  ;;  %3966 = vmatprep.mubr.msk.bf16.mxu0 %vm827_vm0, %v5048_v31 }
 0x13f   : > { %3822 = vmatprep.mubr.msk.bf16.mxu1 %vm827_vm0, %v5431_v14 }
 0x145   : > { %3967 = vmatmul.mubr.msk.bf16.gmra.mrb[24].mxu0 %vm827_vm0, %v5050_v33 }
 0x146   : > { %3823 = vmatmul.mubr.msk.bf16.gmra.mrb[24].mxu1 %vm827_vm0, %v5432_v53  ;;  %3970 = vmatprep.mubr.msk.bf16.mxu0 %vm827_vm0, %v5068_v18 }
 0x147   : > { %3826 = vmatprep.mubr.msk.bf16.mxu1 %vm827_vm0, %v4898_v13 }
 0x14d   : > { %3971 = vmatmul.mubr.msk.bf16.gmra.mrb[28].mxu0 %vm827_vm0, %v5116_v43 }
 0x14e   : > { %3827 = vmatmul.mubr.msk.bf16.gmra.mrb[28].mxu1 %vm827_vm0, %v5074_v51 }
 0x1c9   : > { %v3764_v32 = vpop.f32.mrb[0].mxu1 }
 0x1ca   : > { %v1700_v39 = vpop.f32.mrb[1].mxu1 }
 0x1cb   : > { %v3765_v5 = vpop.f32.mrb[2].mxu1 }
 0x1cc   : > { %v1703_v46 = vpop.f32.mrb[3].mxu1 }
 0x1d1   : > { %v3768_v27 = vpop.f32.mrb[4].mxu1 }
 0x1d2   : > { %v1716_v58 = vpop.f32.mrb[5].mxu1 }
 0x1d3   : > { %v3769_v50 = vpop.f32.mrb[6].mxu1 }
 0x1d4   : > { %v1719_v29 = vpop.f32.mrb[7].mxu1 }
 0x1d9   : > { %v3772_v20 = vpop.f32.mrb[8].mxu1 }
 0x1da   : > { %v1732_v42 = vpop.f32.mrb[9].mxu1 }
 0x1db   : > { %v3773_v48 = vpop.f32.mrb[10].mxu1 }
 0x1dc   : > { %v1735_v6 = vpop.f32.mrb[11].mxu1 }
 0x1e1   : > { %v3776_v13 = vpop.f32.mrb[12].mxu1 }
 0x1e2   : > { %v1748_v40 = vpop.f32.mrb[13].mxu1 }
 0x1e3   : > { %v3777_v36 = vpop.f32.mrb[14].mxu1 }
 0x1e4   : > { %v1751_v19 = vpop.f32.mrb[15].mxu1 }
 0x1e8   : > { %v3944_v12 = vpop.f32.mrb[0].mxu0 }
 0x1e9   : > { %v3978_v38 = vadd.f32 %v3944_v12, %v3764_v32  ;;  %v2804_v3 = vpop.f32.mrb[1].mxu0 }
 0x1ea   : > { %v3979_v4 = vadd.f32 %v2804_v3, %v1700_v39  ;;  %v3945_v63 = vpop.f32.mrb[2].mxu0 }
 0x1eb   : > { %v3418_v52 = vpack.c.bf16 %v3978_v38, %v3978_v38  ;;  %v3980_v31 = vadd.f32 %v3945_v63, %v3765_v5  ;;  %v2807_v33 = vpop.f32.mrb[3].mxu0 }
 0x1ec   : > { %v3416_v57 = vpack.c.bf16 %v3979_v4, %v3979_v4  ;;  %v3981_v55 = vadd.f32 %v2807_v33, %v1703_v46 }
 0x1ed   : > { %3094 = vst.msk [vmem:[%s5298_s26 + $0x8] sm:$0xf] %vm3091_vm5, %v3418_v52  ;;  %v3419_v21 = vpack.c.bf16 %v3980_v31, %v3980_v31 }
 0x1ee   : > { %3092 = vst.msk [vmem:[%s5298_s26] sm:$0xf] %vm3091_vm5, %v3416_v57  ;;  %v3417_v8 = vpack.c.bf16 %v3981_v55, %v3981_v55 }
 0x1ef   : > { %3095 = vst.msk [vmem:[%s5298_s26 + $0xc] sm:$0xf] %vm3091_vm5, %v3419_v21 }
 0x1f0   : > { %3093 = vst.msk [vmem:[%s5298_s26 + $0x4] sm:$0xf] %vm3091_vm5, %v3417_v8  ;;  %v3948_v10 = vpop.f32.mrb[4].mxu0 }
 0x1f1   : > { %v3982_v15 = vadd.f32 %v3948_v10, %v3768_v27  ;;  %v2820_v18 = vpop.f32.mrb[5].mxu0 }
 0x1f2   : > { %v3983_v54 = vadd.f32 %v2820_v18, %v1716_v58  ;;  %v3949_v61 = vpop.f32.mrb[6].mxu0 }
 0x1f3   : > { %v3422_v26 = vpack.c.bf16 %v3982_v15, %v3982_v15  ;;  %v3984_v35 = vadd.f32 %v3949_v61, %v3769_v50  ;;  %v2823_v41 = vpop.f32.mrb[7].mxu0 }
 0x1f4   : > { %v3420_v51 = vpack.c.bf16 %v3983_v54, %v3983_v54  ;;  %v3985_v56 = vadd.f32 %v2823_v41, %v1719_v29 }
 0x1f5   : > { %3098 = vst.msk [vmem:[%s5298_s26 + $0x18] sm:$0xf] %vm3091_vm5, %v3422_v26  ;;  %v3423_v0 = vpack.c.bf16 %v3984_v35, %v3984_v35 }
 0x1f6   : > { %3096 = vst.msk [vmem:[%s5298_s26 + $0x10] sm:$0xf] %vm3091_vm5, %v3420_v51  ;;  %v3421_v28 = vpack.c.bf16 %v3985_v56, %v3985_v56 }
 0x1f7   : > { %3099 = vst.msk [vmem:[%s5298_s26 + $0x1c] sm:$0xf] %vm3091_vm5, %v3423_v0 }
 0x1f8   : > { %3097 = vst.msk [vmem:[%s5298_s26 + $0x14] sm:$0xf] %vm3091_vm5, %v3421_v28  ;;  %v3952_v44 = vpop.f32.mrb[8].mxu0 }
 0x1f9   : > { %v3986_v43 = vadd.f32 %v3952_v44, %v3772_v20  ;;  %v2836_v9 = vpop.f32.mrb[9].mxu0 }
 0x1fa   : > { %v3987_v2 = vadd.f32 %v2836_v9, %v1732_v42  ;;  %v3953_v24 = vpop.f32.mrb[10].mxu0 }
 0x1fb   : > { %v3426_v60 = vpack.c.bf16 %v3986_v43, %v3986_v43  ;;  %v3988_v22 = vadd.f32 %v3953_v24, %v3773_v48  ;;  %v2839_v11 = vpop.f32.mrb[11].mxu0 }
 0x1fc   : > { %v3424_v7 = vpack.c.bf16 %v3987_v2, %v3987_v2  ;;  %v3989_v45 = vadd.f32 %v2839_v11, %v1735_v6 }
 0x1fd   : > { %3102 = vst.msk [vmem:[%s5298_s26 + $0x28] sm:$0xf] %vm3091_vm5, %v3426_v60  ;;  %v3427_v47 = vpack.c.bf16 %v3988_v22, %v3988_v22 }
 0x1fe   : > { %3100 = vst.msk [vmem:[%s5298_s26 + $0x20] sm:$0xf] %vm3091_vm5, %v3424_v7  ;;  %v3425_v62 = vpack.c.bf16 %v3989_v45, %v3989_v45 }
 0x1ff   : > { %3103 = vst.msk [vmem:[%s5298_s26 + $0x2c] sm:$0xf] %vm3091_vm5, %v3427_v47 }
 0x200   : > { %3101 = vst.msk [vmem:[%s5298_s26 + $0x24] sm:$0xf] %vm3091_vm5, %v3425_v62  ;;  %v3956_v16 = vpop.f32.mrb[12].mxu0 }
 0x201   : > { %v3990_v17 = vadd.f32 %v3956_v16, %v3776_v13  ;;  %v2852_v23 = vpop.f32.mrb[13].mxu0 }
 0x202   : > { %v3991_v34 = vadd.f32 %v2852_v23, %v1748_v40  ;;  %v3957_v1 = vpop.f32.mrb[14].mxu0 }
 0x203   : > { %v3430_v25 = vpack.c.bf16 %v3990_v17, %v3990_v17  ;;  %v3992_v37 = vadd.f32 %v3957_v1, %v3777_v36  ;;  %v2855_v49 = vpop.f32.mrb[15].mxu0 }
 0x204   : > { %v3428_v30 = vpack.c.bf16 %v3991_v34, %v3991_v34  ;;  %v3993_v14 = vadd.f32 %v2855_v49, %v1751_v19 }
 0x205   : > { %3106 = vst.msk [vmem:[%s5298_s26 + $0x38] sm:$0xf] %vm3091_vm5, %v3430_v25  ;;  %v3431_v53 = vpack.c.bf16 %v3992_v37, %v3992_v37 }
 0x206   : > { %3104 = vst.msk [vmem:[%s5298_s26 + $0x30] sm:$0xf] %vm3091_vm5, %v3428_v30  ;;  %v3429_v59 = vpack.c.bf16 %v3993_v14, %v3993_v14 }
 0x207   : > { %3107 = vst.msk [vmem:[%s5298_s26 + $0x3c] sm:$0xf] %vm3091_vm5, %v3431_v53 }
 0x208   : > { %3105 = vst.msk [vmem:[%s5298_s26 + $0x34] sm:$0xf] %vm3091_vm5, %v3429_v59  ;;  %v3960_v32 = vpop.f32.mrb[16].mxu0 }
 0x209   : > { %v3816_v39 = vpop.f32.mrb[16].mxu1  ;;  %v2868_v5 = vpop.f32.mrb[17].mxu0 }
 0x20a   : > { %v1988_v46 = vpop.f32.mrb[17].mxu1  ;;  %v3994_v27 = vadd.f32 %v3960_v32, %v3816_v39  ;;  %v3961_v58 = vpop.f32.mrb[18].mxu0 }
 0x20b   : > { %v3817_v50 = vpop.f32.mrb[18].mxu1  ;;  %v3995_v29 = vadd.f32 %v2868_v5, %v1988_v46  ;;  %v2871_v20 = vpop.f32.mrb[19].mxu0 }
 0x20c   : > { %v3434_v42 = vpack.c.bf16 %v3994_v27, %v3994_v27  ;;  %v1991_v48 = vpop.f32.mrb[19].mxu1  ;;  %v3996_v6 = vadd.f32 %v3961_v58, %v3817_v50 }
 0x20d   : > { %v3432_v13 = vpack.c.bf16 %v3995_v29, %v3995_v29  ;;  %v3997_v40 = vadd.f32 %v2871_v20, %v1991_v48 }
 0x20e   : > { %3110 = vst.msk [vmem:[%s5298_s26 + $0x48] sm:$0xf] %vm3091_vm5, %v3434_v42  ;;  %v3435_v36 = vpack.c.bf16 %v3996_v6, %v3996_v6 }
 0x20f   : > { %3108 = vst.msk [vmem:[%s5298_s26 + $0x40] sm:$0xf] %vm3091_vm5, %v3432_v13  ;;  %v3433_v19 = vpack.c.bf16 %v3997_v40, %v3997_v40 }
 0x210   : > { %3111 = vst.msk [vmem:[%s5298_s26 + $0x4c] sm:$0xf] %vm3091_vm5, %v3435_v36  ;;  %v3964_v12 = vpop.f32.mrb[20].mxu0 }
 0x211   : > { %3109 = vst.msk [vmem:[%s5298_s26 + $0x44] sm:$0xf] %vm3091_vm5, %v3433_v19  ;;  %v3820_v38 = vpop.f32.mrb[20].mxu1  ;;  %v2884_v3 = vpop.f32.mrb[21].mxu0 }
 0x212   : > { %v2004_v4 = vpop.f32.mrb[21].mxu1  ;;  %v3998_v63 = vadd.f32 %v3964_v12, %v3820_v38  ;;  %v3965_v52 = vpop.f32.mrb[22].mxu0 }
 0x213   : > { %v3821_v31 = vpop.f32.mrb[22].mxu1  ;;  %v3999_v33 = vadd.f32 %v2884_v3, %v2004_v4  ;;  %v2887_v57 = vpop.f32.mrb[23].mxu0 }
 0x214   : > { %v3438_v55 = vpack.c.bf16 %v3998_v63, %v3998_v63  ;;  %v2007_v21 = vpop.f32.mrb[23].mxu1  ;;  %v4000_v8 = vadd.f32 %v3965_v52, %v3821_v31 }
 0x215   : > { %v3436_v10 = vpack.c.bf16 %v3999_v33, %v3999_v33  ;;  %v4001_v15 = vadd.f32 %v2887_v57, %v2007_v21 }
 0x216   : > { %3114 = vst.msk [vmem:[%s5298_s26 + $0x58] sm:$0xf] %vm3091_vm5, %v3438_v55  ;;  %v3439_v18 = vpack.c.bf16 %v4000_v8, %v4000_v8 }
 0x217   : > { %3112 = vst.msk [vmem:[%s5298_s26 + $0x50] sm:$0xf] %vm3091_vm5, %v3436_v10  ;;  %v3437_v54 = vpack.c.bf16 %v4001_v15, %v4001_v15 }
 0x218   : > { %3115 = vst.msk [vmem:[%s5298_s26 + $0x5c] sm:$0xf] %vm3091_vm5, %v3439_v18  ;;  %v3968_v61 = vpop.f32.mrb[24].mxu0 }
 0x219   : > { %3113 = vst.msk [vmem:[%s5298_s26 + $0x54] sm:$0xf] %vm3091_vm5, %v3437_v54  ;;  %v3824_v26 = vpop.f32.mrb[24].mxu1  ;;  %v2900_v35 = vpop.f32.mrb[25].mxu0 }
 0x21a   : > { %v2020_v41 = vpop.f32.mrb[25].mxu1  ;;  %v4002_v51 = vadd.f32 %v3968_v61, %v3824_v26  ;;  %v3969_v56 = vpop.f32.mrb[26].mxu0 }
 0x21b   : > { %v3825_v0 = vpop.f32.mrb[26].mxu1  ;;  %v4003_v28 = vadd.f32 %v2900_v35, %v2020_v41  ;;  %v2903_v44 = vpop.f32.mrb[27].mxu0 }
 0x21c   : > { %v3442_v43 = vpack.c.bf16 %v4002_v51, %v4002_v51  ;;  %v2023_v9 = vpop.f32.mrb[27].mxu1  ;;  %v4004_v2 = vadd.f32 %v3969_v56, %v3825_v0 }
 0x21d   : > { %v3440_v24 = vpack.c.bf16 %v4003_v28, %v4003_v28  ;;  %v4005_v60 = vadd.f32 %v2903_v44, %v2023_v9 }
 0x21e   : > { %3118 = vst.msk [vmem:[%s5298_s26 + $0x68] sm:$0xf] %vm3091_vm5, %v3442_v43  ;;  %v3443_v22 = vpack.c.bf16 %v4004_v2, %v4004_v2 }
 0x21f   : > { %3116 = vst.msk [vmem:[%s5298_s26 + $0x60] sm:$0xf] %vm3091_vm5, %v3440_v24  ;;  %v3441_v11 = vpack.c.bf16 %v4005_v60, %v4005_v60 }
 0x220   : > { %3119 = vst.msk [vmem:[%s5298_s26 + $0x6c] sm:$0xf] %vm3091_vm5, %v3443_v22  ;;  %v3972_v7 = vpop.f32.mrb[28].mxu0 }
 0x221   : > { %3117 = vst.msk [vmem:[%s5298_s26 + $0x64] sm:$0xf] %vm3091_vm5, %v3441_v11  ;;  %v3828_v45 = vpop.f32.mrb[28].mxu1  ;;  %v2916_v47 = vpop.f32.mrb[29].mxu0 }
 0x222   : > { %v2036_v62 = vpop.f32.mrb[29].mxu1  ;;  %v4006_v16 = vadd.f32 %v3972_v7, %v3828_v45  ;;  %v3973_v17 = vpop.f32.mrb[30].mxu0 }
 0x223   : > { %v3829_v23 = vpop.f32.mrb[30].mxu1  ;;  %v4007_v34 = vadd.f32 %v2916_v47, %v2036_v62  ;;  %v2919_v1 = vpop.f32.mrb[31].mxu0 }
 0x224   : > { %v3446_v25 = vpack.c.bf16 %v4006_v16, %v4006_v16  ;;  %v2039_v37 = vpop.f32.mrb[31].mxu1  ;;  %v4008_v49 = vadd.f32 %v3973_v17, %v3829_v23 }
 0x225   : > { %v3444_v30 = vpack.c.bf16 %v4007_v34, %v4007_v34  ;;  %v4009_v14 = vadd.f32 %v2919_v1, %v2039_v37 }
 0x226   : > { %3122 = vst.msk [vmem:[%s5298_s26 + $0x78] sm:$0xf] %vm3091_vm5, %v3446_v25  ;;  %v3447_v53 = vpack.c.bf16 %v4008_v49, %v4008_v49 }
 0x227   : > { %3120 = vst.msk [vmem:[%s5298_s26 + $0x70] sm:$0xf] %vm3091_vm5, %v3444_v30  ;;  %v3445_v59 = vpack.c.bf16 %v4009_v14, %v4009_v14 }
 0x228   : > { %3123 = vst.msk [vmem:[%s5298_s26 + $0x7c] sm:$0xf] %vm3091_vm5, %v3447_v53 }
 0x229   : > { %3121 = vst.msk [vmem:[%s5298_s26 + $0x74] sm:$0xf] %vm3091_vm5, %v3445_v59 }
 0x22a PF: > { %s16_s21 = sadd.s32 1, %s4272_s21  }
 0x22b   : > { %p13_p4 = scmp.ge.s32.totalorder %s16_s21, 4  }
 0x22d   :  { %15 = sbr.rel (!%p13_p4) target bundleno = 1 (0x1), region = 82 }

// kernel: densenet_cxr_bottom.4
= control target key start
LH: loop header
LB: loop body
LE: loop exit
PB: predicated region body
PF: predicated region fallthrough
CT: control target
= control target key end

     0   :  { %s3987_s21 = smov 0   ;;  %s5012_s0 = inlined_call_operand.vmem [shape: bf16[2,18,18,3], index: 0, kind: input, shape index: {}]   ;;  %s5013_s1 = inlined_call_operand.vmem [shape: bf16[9,3,32], index: 1, kind: input, shape index: {}]   ;;  %s5014_s2 = inlined_call_operand.vmem [shape: f32[1,3], index: 2, kind: input, shape index: {}]   ;;  %s5015_s3 = inlined_call_operand.vmem [shape: f32[1,3], index: 3, kind: input, shape index: {}]   ;;  %s5016_s4 = inlined_call_operand.vmem [shape: f32[1,32], index: 4, kind: input, shape index: {}]   ;;  %s5017_s5 = inlined_call_operand.vmem [shape: f32[1,32], index: 5, kind: input, shape index: {}]   ;;  %s5018_s6 = inlined_call_operand.vmem [shape: bf16[2,256,32], index: 6, kind: output, shape index: {}]  }
   0x1 LB: > { %s2933_s2 = sadd.s32 4294967295, %s3949_s21   ;;  %p2937_p0 = scmp.ge.s32.totalorder %s3949_s21, 1  ;;  %s3949_s21 = sphi %s3987_s21, %s16_s21  }
   0x2   : > { %p212_p1 = scmp.lt.s32.totalorder %s3949_s21, 3 }
   0x4   : > { %p213_p2 = pnand %p2937_p0, %p212_p1 }
   0x6   : > { %216 = sbr.rel (%p213_p2) target bundleno = 537 (0x219), region = 44 }
   0xd   : > { %v2957_v0 = vld [vmem:[%s5013_s1 + $0x2] sm:$0x3]  ;;  %vm606_vm0 = vcmask 1040384   ;;  %vm607_vm1 = vcmask 1041408   ;;  %p242_p3 = scmp.lt.s32.totalorder %s2933_s2, 1  ;;  %v3951_v1 = vmov 65535  }
   0xe   : > { %v608_v2 = vsel %vm606_vm0, 4294967295, %v3951_v1  ;;  %v3025_v3 = vld [vmem:[%s5013_s1 + $0x8] sm:$0x3]  ;;  %v377_v5 = vld [vmem:[%s5013_s1] sm:$0x3]  ;;  %vm426_vm2 = vcmask 1046528  }
   0xf   : > { %v4001_v4 = vsel %vm607_vm1, %v608_v2, 0  ;;  %s5100_s2 = smov (!%p242_p3, %s2933_s2), 1  ;;  %v3042_v6 = vld [vmem:[%s5013_s1 + $0xa] sm:$0x3]  ;;  %vm557_vm3 = vcmask 23552   ;;  %vm986_vm4 = vcmask 1045504  }
  0x10   : > { %v611_v7 = vand.u32 %v2957_v0, %v4001_v4  ;;  %v4013_v8 = vand.u32 %v3025_v3, %v4001_v4  ;;  %v823_v9 = vand.u32 %v4001_v4, %v377_v5  ;;  %v4017_v10 = vand.u32 %v3042_v6, %v4001_v4  ;;  %s3897_s29 = smul.u32 216, %s5100_s2  ;;  %v2990_v33 = vld [vmem:[%s5013_s1 + $0x4] sm:$0x3]  ;;  %v3060_v36 = vld [vmem:[%s5013_s1 + $0xc] sm:$0x3]  ;;  %s3147_s23 = sshll.u32 %s5100_s2, 7 }
  0x11   : > { %v4095_v47 = vand.u32 %v2990_v33, %v4001_v4  ;;  %v4102_v50 = vand.u32 %v3060_v36, %v4001_v4  ;;  %s4879_s26 = scalar_lea.vmem %s5018_s6, %s3147_s23  ;;  %vm2845_vm5 = vcmask 257024  }
  0x12   : > { %3333 = vmatprep.subr.bf16.mxu1 %v611_v7  ;;  %3469 = vmatprep.subr.bf16.mxu0 %v4013_v8  ;;  %s4025_s8 = scalar_lea.vmem %s5012_s0, %s3897_s29 }
  0x13   : > { %3334 = vmatpush3.bf16.msra.mxu1 %v611_v7  ;;  %3470 = vmatpush3.bf16.msra.mxu0 %v4013_v8  ;;  %v4028_v11 = vld [vmem:[%s4025_s8] sm:$0xff]   ;;  %v4031_v12 = vld [vmem:[%s4025_s8 + $0x8] sm:$0x1]  ;;  %v4034_v13 = vld [vmem:[%s4025_s8 + $0xc] sm:$0xff]  }
  0x14   : > { %3367 = vmatprep.subr.bf16.mxu1 %v823_v9  ;;  %3503 = vmatprep.subr.bf16.mxu0 %v4017_v10  ;;  %v5021_v14 = vunpack.c.l.bf16 %v4028_v11  ;;  %v5020_v15 = vunpack.c.h.bf16 %v4028_v11  ;;  %v5019_v16 = vunpack.c.l.bf16 %v4031_v12  ;;  %v4041_v17 = vld [vmem:[%s4025_s8 + $0x14] sm:$0x1]  ;;  %v310_v18 = vunpack.c.l.bf16 %v4034_v13  ;;  %v4045_v19 = vld [vmem:[%s4025_s8 + $0x18] sm:$0xff]   ;;  %v4061_v28 = vld [vmem:[%s4025_s8 + $0x20] sm:$0x1] }
  0x15   : > { %v311_v20 = vunpack.c.h.bf16 %v4034_v13  ;;  %v312_v21 = vunpack.c.l.bf16 %v4041_v17  ;;  %v313_v25 = vunpack.c.l.bf16 %v4045_v19  ;;  %v4068_v32 = vld [vmem:[%s4025_s8 + $0x24] sm:$0xff]   ;;  %v314_v38 = vunpack.c.h.bf16 %v4045_v19  ;;  %v4083_v41 = vld [vmem:[%s4025_s8 + $0x2c] sm:$0x1]  ;;  %v4086_v42 = vld [vmem:[%s4025_s8 + $0x30] sm:$0xff]  }
  0x16   : > { %v427_v22 = vrot.slane %v5021_v14, 1  ;;  %v428_v23 = vrot.slane %v5020_v15, 1  ;;  %v430_v24 = vrot.slane %v5019_v16, 1  ;;  %v432_v26 = vrot.slane %v310_v18, 1  ;;  %v4092_v46 = vld [vmem:[%s4025_s8 + $0x38] sm:$0x1] }
  0x17   : > { %v433_v27 = vrot.slane %v311_v20, 1  ;;  %v435_v31 = vrot.slane %v312_v21, 1  ;;  %v315_v39 = vunpack.c.l.bf16 %v4061_v28  ;;  %v437_v40 = vrot.slane %v313_v25, 1  ;;  %v4113_v55 = vld [vmem:[%s4025_s8 + $0x3c] sm:$0xff]   ;;  %v4120_v60 = vld [vmem:[%s4025_s8 + $0x44] sm:$0x1] }
  0x18   : > { %v429_v29 = vsel %vm426_vm2, %v427_v22, %v428_v23  ;;  %v431_v30 = vsel %vm426_vm2, %v428_v23, %v430_v24  ;;  %v316_v44 = vunpack.c.l.bf16 %v4068_v32  ;;  %v317_v45 = vunpack.c.h.bf16 %v4068_v32  ;;  %v4123_v61 = vld [vmem:[%s4025_s8 + $0x48] sm:$0xff]   ;;  %v4140_v7 = vld [vmem:[%s4025_s8 + $0x50] sm:$0x1]  ;;  %v4161_v33 = vld [vmem:[%s4025_s8 + $0x5c] sm:$0x1] }
  0x19   : > { %v539_v34 = vpack.c.bf16 %v431_v30, %v429_v29  ;;  %v434_v35 = vsel %vm426_vm2, %v432_v26, %v433_v27  ;;  %v436_v37 = vsel %vm426_vm2, %v433_v27, %v435_v31  ;;  %v438_v48 = vrot.slane %v314_v38, 1  ;;  %v4151_v26 = vld [vmem:[%s4025_s8 + $0x54] sm:$0xff]  }
  0x1a   : > { %v540_v43 = vpack.c.bf16 %v436_v37, %v434_v35  ;;  %v440_v49 = vrot.slane %v315_v39, 1  ;;  %v318_v51 = vunpack.c.l.bf16 %v4083_v41  ;;  %v442_v52 = vrot.slane %v316_v44, 1 }
  0x1b   : > { %3335 = vmatprep.mubr.msk.bf16.mxu1 %vm557_vm3, %v539_v34  ;;  %v443_v53 = vrot.slane %v317_v45, 1  ;;  %v319_v54 = vunpack.c.l.bf16 %v4086_v42  ;;  %v439_v56 = vsel %vm426_vm2, %v437_v40, %v438_v48  ;;  %v320_v58 = vunpack.c.h.bf16 %v4086_v42 }
  0x1c   : > { %3471 = vmatprep.mubr.msk.bf16.mxu0 %vm557_vm3, %v540_v43  ;;  %3336 = vmatmul.mubr.msk.bf16.vlgmr.msra.gmra.mrb[0].mxu1 %vm557_vm3, %v540_v43  ;;  %v441_v57 = vsel %vm426_vm2, %v438_v48, %v440_v49  ;;  %v321_v59 = vunpack.c.l.bf16 %v4092_v46  ;;  %v445_v0 = vrot.slane %v318_v51, 1  ;;  %v322_v5 = vunpack.c.l.bf16 %v4113_v55 }
  0x1d   : > { %3368 = vmatpush3.bf16.msra.mxu1 %v823_v9  ;;  %v4125_v62 = vpack.c.bf16 %v441_v57, %v439_v56  ;;  %v444_v63 = vsel %vm426_vm2, %v442_v52, %v443_v53  ;;  %v447_v1 = vrot.slane %v319_v54, 1  ;;  %v448_v2 = vrot.slane %v320_v58, 1  ;;  %v4187_v57 = vld [vmem:[%s4025_s8 + $0x60] sm:$0xff]  }
  0x1e   : > { %3401 = vmatprep.subr.bf16.mxu1 %v4095_v47  ;;  %v450_v3 = vrot.slane %v321_v59, 1  ;;  %v323_v6 = vunpack.c.h.bf16 %v4113_v55  ;;  %v446_v9 = vsel %vm426_vm2, %v443_v53, %v445_v0  ;;  %v5037_v22 = vunpack.c.l.bf16 %v4120_v60  ;;  %v4194_v0 = vld [vmem:[%s4025_s8 + $0x68] sm:$0x1] }
  0x1f   : > { %3472 = vmatmul.mubr.msk.bf16.vlgmr.msra.gmra.mrb[0].mxu0 %vm557_vm3, %v4125_v62  ;;  %3339 = vmatprep.mubr.msk.bf16.mxu1 %vm557_vm3, %v4125_v62  ;;  %v5036_v23 = vunpack.c.l.bf16 %v4123_v61  ;;  %v5031_v24 = vunpack.c.h.bf16 %v4123_v61  ;;  %v4154_v27 = vpack.c.bf16 %v446_v9, %v444_v63  ;;  %v449_v29 = vsel %vm426_vm2, %v447_v1, %v448_v2 }
  0x20   : > { %3504 = vmatpush3.bf16.msra.mxu0 %v4017_v10  ;;  %v451_v30 = vsel %vm426_vm2, %v448_v2, %v450_v3  ;;  %v452_v31 = vrot.slane %v322_v5, 1  ;;  %v453_v35 = vrot.slane %v323_v6, 1  ;;  %v455_v10 = vrot.slane %v5037_v22, 1 }
  0x21   : > { %v4163_v34 = vpack.c.bf16 %v451_v30, %v449_v29  ;;  %v5028_v36 = vunpack.c.l.bf16 %v4140_v7  ;;  %3537 = vmatprep.subr.bf16.mxu0 %v4102_v50  ;;  %3475 = vmatprep.mubr.msk.bf16.mxu0 %vm557_vm3, %v4154_v27  ;;  %v457_v37 = vrot.slane %v5036_v23, 1  ;;  %v458_v40 = vrot.slane %v5031_v24, 1 }
  0x22   : > { %v5027_v43 = vunpack.c.l.bf16 %v4151_v26  ;;  %v5026_v48 = vunpack.c.h.bf16 %v4151_v26  ;;  %v454_v49 = vsel %vm426_vm2, %v452_v31, %v453_v35  ;;  %v456_v52 = vsel %vm426_vm2, %v453_v35, %v455_v10  ;;  %v4212_v10 = vld [vmem:[%s4025_s8 + $0x6c] sm:$0xff]  }
  0x23   : > { %v460_v53 = vrot.slane %v5028_v36, 1  ;;  %v5022_v56 = vunpack.c.l.bf16 %v4161_v33  ;;  %v4191_v63 = vpack.c.bf16 %v456_v52, %v454_v49  ;;  %v5025_v9 = vunpack.c.l.bf16 %v4187_v57 }
  0x24   : > { %3340 = vmatmul.mubr.msk.bf16.gmra.mrb[4].mxu1 %vm557_vm3, %v4154_v27  ;;  %v462_v1 = vrot.slane %v5027_v43, 1  ;;  %v463_v2 = vrot.slane %v5026_v48, 1  ;;  %v459_v29 = vsel %vm426_vm2, %v457_v37, %v458_v40  ;;  %v5024_v31 = vunpack.c.h.bf16 %v4187_v57  ;;  %v4219_v37 = vld [vmem:[%s4025_s8 + $0x74] sm:$0x1] }
  0x25   : > { %3343 = vmatprep.mubr.msk.bf16.mxu1 %vm557_vm3, %v4163_v34  ;;  %v465_v3 = vrot.slane %v5022_v56, 1  ;;  %v461_v30 = vsel %vm426_vm2, %v458_v40, %v460_v53  ;;  %v5023_v35 = vunpack.c.l.bf16 %v4194_v0  ;;  %v992_v49 = vrot.slane %v310_v18, 2  ;;  %v4230_v56 = vld [vmem:[%s4025_s8 + $0x78] sm:$0xff]   ;;  %v4233_v18 = vld [vmem:[%s4025_s8 + $0x80] sm:$0x1] }
  0x26   : > { %v464_v52 = vsel %vm426_vm2, %v462_v1, %v463_v2  ;;  %v993_v40 = vrot.slane %v311_v20, 2  ;;  %v995_v53 = vrot.slane %v312_v21, 2  ;;  %v4225_v15 = vpack.c.bf16 %v461_v30, %v459_v29 }
  0x27   : > { %3476 = vmatmul.mubr.msk.bf16.gmra.mrb[4].mxu0 %vm557_vm3, %v4163_v34  ;;  %v466_v16 = vsel %vm426_vm2, %v463_v2, %v465_v3  ;;  %v467_v14 = vrot.slane %v5025_v9, 1  ;;  %v468_v1 = vrot.slane %v5024_v31, 1  ;;  %v470_v20 = vrot.slane %v5023_v35, 1 }
  0x28   : > { %3479 = vmatprep.mubr.msk.bf16.mxu0 %vm557_vm3, %v4191_v63  ;;  %v5030_v17 = vunpack.c.l.bf16 %v4212_v10  ;;  %v5029_v21 = vunpack.c.h.bf16 %v4212_v10  ;;  %v4245_v2 = vpack.c.bf16 %v466_v16, %v464_v52  ;;  %v5035_v3 = vunpack.c.l.bf16 %v4219_v37 }
  0x29   : > { %v997_v29 = vrot.slane %v313_v25, 2  ;;  %v5033_v30 = vunpack.c.l.bf16 %v4230_v56  ;;  %v5032_v35 = vunpack.c.h.bf16 %v4230_v56  ;;  %v5034_v31 = vunpack.c.l.bf16 %v4233_v18 }
  0x2a   : > { %v998_v9 = vrot.slane %v314_v38, 2  ;;  %v1000_v48 = vrot.slane %v315_v39, 2  ;;  %v994_v16 = vsel %vm986_vm4, %v992_v49, %v993_v40  ;;  %v996_v52 = vsel %vm986_vm4, %v993_v40, %v995_v53  ;;  %v4268_v38 = vld [vmem:[%s4025_s8 + $0x84] sm:$0xff]   ;;  %v4271_v39 = vld [vmem:[%s4025_s8 + $0x8c] sm:$0x1] }
  0x2b   : > { %v469_v25 = vsel %vm426_vm2, %v467_v14, %v468_v1  ;;  %v471_v43 = vsel %vm426_vm2, %v468_v1, %v470_v20  ;;  %v472_v36 = vrot.slane %v5030_v17, 1  ;;  %v473_v28 = vrot.slane %v5029_v21, 1  ;;  %v4286_v20 = vld [vmem:[%s4025_s8 + $0x90] sm:$0xff]  }
  0x2c   : > { %3344 = vmatmul.mubr.msk.bf16.gmra.mrb[8].mxu1 %vm557_vm3, %v4191_v63  ;;  %v475_v49 = vrot.slane %v5035_v3, 1  ;;  %v4277_v14 = vpack.c.bf16 %v996_v52, %v994_v16  ;;  %v477_v40 = vrot.slane %v5033_v30, 1  ;;  %v478_v53 = vrot.slane %v5032_v35, 1  ;;  %v4294_v52 = vld [vmem:[%s4025_s8 + $0x98] sm:$0x1] }
  0x2d   : > { %3347 = vmatprep.mubr.msk.bf16.mxu1 %vm557_vm3, %v4225_v15  ;;  %v480_v1 = vrot.slane %v5034_v31, 1  ;;  %v4288_v21 = vpack.c.bf16 %v471_v43, %v469_v25  ;;  %v5043_v17 = vunpack.c.l.bf16 %v4268_v38  ;;  %v5042_v24 = vunpack.c.h.bf16 %v4268_v38 }
  0x2e   : > { %v5038_v16 = vunpack.c.l.bf16 %v4271_v39  ;;  %v474_v35 = vsel %vm426_vm2, %v472_v36, %v473_v28  ;;  %v999_v30 = vsel %vm986_vm4, %v997_v29, %v998_v9  ;;  %v1001_v31 = vsel %vm986_vm4, %v998_v9, %v1000_v48 }
  0x2f   : > { %3480 = vmatmul.mubr.msk.bf16.gmra.mrb[8].mxu0 %vm557_vm3, %v4225_v15  ;;  %v1002_v43 = vrot.slane %v316_v44, 2  ;;  %v476_v25 = vsel %vm426_vm2, %v473_v28, %v475_v49  ;;  %v1003_v3 = vrot.slane %v317_v45, 2  ;;  %v5040_v23 = vunpack.c.l.bf16 %v4286_v20 }
  0x30   : > { %3483 = vmatprep.mubr.msk.bf16.mxu0 %vm557_vm3, %v4245_v2  ;;  %v5039_v22 = vunpack.c.h.bf16 %v4286_v20  ;;  %v479_v36 = vsel %vm426_vm2, %v477_v40, %v478_v53  ;;  %v481_v48 = vsel %vm426_vm2, %v478_v53, %v480_v1  ;;  %v1005_v44 = vrot.slane %v318_v51, 2 }
  0x31   : > { %v5041_v9 = vunpack.c.l.bf16 %v4294_v52  ;;  %v482_v29 = vrot.slane %v5043_v17, 1  ;;  %v483_v45 = vrot.slane %v5042_v24, 1  ;;  %v485_v28 = vrot.slane %v5038_v16, 1  ;;  %v4337_v16 = vld [vmem:[%s4025_s8 + $0x9c] sm:$0xff]  }
  0x32   : > { %v4323_v49 = vpack.c.bf16 %v476_v25, %v474_v35  ;;  %v4325_v40 = vpack.c.bf16 %v1001_v31, %v999_v30  ;;  %v4329_v41 = vpack.c.bf16 %v481_v48, %v479_v36  ;;  %v1004_v51 = vsel %vm986_vm4, %v1002_v43, %v1003_v3  ;;  %v3077_v31 = vld [vmem:[%s5013_s1 + $0xe] sm:$0x3]  ;;  %v4350_v36 = vld [vmem:[%s4025_s8 + $0xa4] sm:$0x1] }
  0x33   : > { %v487_v53 = vrot.slane %v5040_v23, 1  ;;  %v488_v1 = vrot.slane %v5039_v22, 1  ;;  %v1006_v35 = vsel %vm986_vm4, %v1003_v3, %v1005_v44  ;;  %v1007_v30 = vrot.slane %v319_v54, 2  ;;  %v4359_v44 = vld [vmem:[%s4025_s8 + $0xa8] sm:$0xff]   ;;  %v4362_v54 = vld [vmem:[%s4025_s8 + $0xb0] sm:$0x1] }
  0x34   : > { %3348 = vmatmul.mubr.msk.bf16.gmra.mrb[12].mxu1 %vm557_vm3, %v4245_v2  ;;  %5057 = vst [vmem:[#allocation2_spill] sm:$0xff] %v4329_v41  ;;  %v1008_v43 = vrot.slane %v320_v58, 2  ;;  %v490_v25 = vrot.slane %v5041_v9, 1  ;;  %v484_v48 = vsel %vm426_vm2, %v482_v29, %v483_v45  ;;  %v486_v22 = vsel %vm426_vm2, %v483_v45, %v485_v28 }
  0x35   : > { %3351 = vmatprep.mubr.msk.bf16.mxu1 %vm557_vm3, %v4288_v21  ;;  %v1010_v23 = vrot.slane %v321_v59, 2  ;;  %v1012_v3 = vrot.slane %v322_v5, 2  ;;  %v1013_v58 = vrot.slane %v323_v6, 2  ;;  %v5058_v29 = vunpack.c.l.bf16 %v4120_v60 }
  0x36   : > { %v5048_v45 = vunpack.c.l.bf16 %v4337_v16  ;;  %v4374_v59 = vpack.c.bf16 %v1006_v35, %v1004_v51  ;;  %v489_v5 = vsel %vm426_vm2, %v487_v53, %v488_v1  ;;  %v5047_v28 = vunpack.c.l.bf16 %v4350_v36 }
  0x37   : > { %3484 = vmatmul.mubr.msk.bf16.gmra.mrb[12].mxu0 %vm557_vm3, %v4288_v21  ;;  %v1015_v9 = vrot.slane %v5058_v29, 2  ;;  %v4379_v24 = vand.u32 %v3077_v31, %v4001_v4  ;;  %v491_v6 = vsel %vm426_vm2, %v488_v1, %v490_v25  ;;  %v5044_v60 = vunpack.c.l.bf16 %v4359_v44 }
  0x38   : > { %3505 = vmatprep.mubr.msk.bf16.mxu0 %vm557_vm3, %v4277_v14  ;;  %v5045_v29 = vunpack.c.h.bf16 %v4359_v44  ;;  %v5046_v17 = vunpack.c.l.bf16 %v4362_v54  ;;  %v4385_v46 = vpack.c.bf16 %v486_v22, %v484_v48  ;;  %v1009_v51 = vsel %vm986_vm4, %v1007_v30, %v1008_v43 }
  0x39   : > { %v1011_v53 = vsel %vm986_vm4, %v1008_v43, %v1010_v23  ;;  %v1014_v31 = vsel %vm986_vm4, %v1012_v3, %v1013_v58  ;;  %v1016_v1 = vsel %vm986_vm4, %v1013_v58, %v1015_v9  ;;  %v492_v35 = vrot.slane %v5048_v45, 1  ;;  %v4416_v58 = vld [vmem:[%s4025_s8 + $0xbc] sm:$0x1] }
  0x3a   : > { %5059 = vst [vmem:[#allocation3_spill] sm:$0xff] %v4385_v46  ;;  %v5060_v25 = vunpack.c.h.bf16 %v4337_v16  ;;  %v4400_v30 = vpack.c.bf16 %v491_v6, %v489_v5  ;;  %v495_v23 = vrot.slane %v5047_v28, 1  ;;  %v4404_v43 = vpack.c.bf16 %v1011_v53, %v1009_v51 }
  0x3b   : > { %v497_v9 = vrot.slane %v5044_v60, 1  ;;  %v498_v48 = vrot.slane %v5045_v29, 1  ;;  %v500_v3 = vrot.slane %v5046_v17, 1  ;;  %v4419_v5 = vpack.c.bf16 %v1016_v1, %v1014_v31 }
  0x3c   : > { %3352 = vmatmul.mubr.msk.bf16.gmra.mrb[16].mxu1 %vm557_vm3, %v4323_v49  ;;  %v493_v22 = vrot.slane %v5060_v25, 1  ;;  %v5061_v6 = vunpack.c.l.bf16 %v4123_v61  ;;  %v5062_v53 = vunpack.c.h.bf16 %v4123_v61  ;;  %v5063_v60 = vunpack.c.l.bf16 %v4140_v7 }
  0x3d   : > { %3355 = vmatprep.mubr.msk.bf16.mxu1 %vm557_vm3, %v4329_v41  ;;  %v5064_v28 = vunpack.c.l.bf16 %v4151_v26  ;;  %v5065_v31 = vunpack.c.h.bf16 %v4151_v26  ;;  %v5066_v41 = vunpack.c.l.bf16 %v4161_v33 }
  0x3e   : > { %v1017_v51 = vrot.slane %v5061_v6, 2  ;;  %v1018_v25 = vrot.slane %v5062_v53, 2  ;;  %v1020_v29 = vrot.slane %v5063_v60, 2  ;;  %v494_v17 = vsel %vm426_vm2, %v492_v35, %v493_v22 }
  0x3f   : > { %3506 = vmatmul.mubr.msk.bf16.vlgmr.msra.gmra.mrb[0].mxu0 %vm557_vm3, %v4325_v40  ;;  %v1022_v45 = vrot.slane %v5064_v28, 2  ;;  %v1023_v1 = vrot.slane %v5065_v31, 2  ;;  %v1025_v6 = vrot.slane %v5066_v41, 2  ;;  %v496_v7 = vsel %vm426_vm2, %v493_v22, %v495_v23 }
  0x40   : > { %3538 = vmatpush3.bf16.msra.mxu0 %v4102_v50  ;;  %3509 = vmatprep.mubr.msk.bf16.mxu0 %vm557_vm3, %v4374_v59  ;;  %v4413_v50 = vld [vmem:[%s4025_s8 + $0xb4] sm:$0xff]   ;;  %v501_v28 = vsel %vm426_vm2, %v498_v48, %v500_v3  ;;  %v1019_v31 = vsel %vm986_vm4, %v1017_v51, %v1018_v25  ;;  %v4447_v33 = vpack.c.bf16 %v496_v7, %v494_v17  ;;  %v5068_v17 = vunpack.c.l.bf16 %v4416_v58 }
  0x41   : > { %3571 = vmatprep.subr.bf16.mxu0 %v4379_v24  ;;  %v5054_v60 = vunpack.c.l.bf16 %v4413_v50  ;;  %v5053_v53 = vunpack.c.h.bf16 %v4413_v50  ;;  %v1021_v41 = vsel %vm986_vm4, %v1018_v25, %v1020_v29  ;;  %v1024_v22 = vsel %vm986_vm4, %v1022_v45, %v1023_v1 }
  0x42   : > { %v1026_v23 = vsel %vm986_vm4, %v1023_v1, %v1025_v6  ;;  %v505_v3 = vrot.slane %v5068_v17, 1  ;;  %v4464_v45 = vpack.c.bf16 %v1021_v41, %v1019_v31  ;;  %v5069_v51 = vunpack.c.l.bf16 %v4187_v57 }
  0x43   : > { %v4466_v29 = vpack.c.bf16 %v1026_v23, %v1024_v22  ;;  %v5070_v6 = vunpack.c.h.bf16 %v4187_v57  ;;  %v5072_v31 = vunpack.c.l.bf16 %v4212_v10  ;;  %v5073_v22 = vunpack.c.h.bf16 %v4212_v10 }
  0x44   : > { %3356 = vmatmul.mubr.msk.bf16.gmra.mrb[20].mxu1 %vm557_vm3, %v4385_v46  ;;  %v499_v46 = vsel %vm426_vm2, %v497_v9, %v498_v48  ;;  %v502_v9 = vrot.slane %v5054_v60, 1  ;;  %v503_v48 = vrot.slane %v5053_v53, 1  ;;  %v5075_v60 = vunpack.c.l.bf16 %v4028_v11 }
  0x45   : > { %3359 = vmatprep.mubr.msk.bf16.mxu1 %vm557_vm3, %v4400_v30  ;;  %v4454_v35 = vpack.c.bf16 %v501_v28, %v499_v46  ;;  %v1027_v46 = vrot.slane %v5069_v51, 2  ;;  %v1028_v7 = vrot.slane %v5070_v6, 2  ;;  %v5071_v28 = vunpack.c.l.bf16 %v4194_v0 }
  0x46   : > { %v504_v25 = vsel %vm426_vm2, %v502_v9, %v503_v48  ;;  %v506_v1 = vsel %vm426_vm2, %v503_v48, %v505_v3  ;;  %v1032_v41 = vrot.slane %v5072_v31, 2  ;;  %v1033_v23 = vrot.slane %v5073_v22, 2 }
  0x47   : > { %3510 = vmatmul.mubr.msk.bf16.gmra.mrb[4].mxu0 %vm557_vm3, %v4404_v43  ;;  %5067 = vst [vmem:[#allocation4_spill] sm:$0xff] %v4454_v35  ;;  %v1030_v17 = vrot.slane %v5071_v28, 2  ;;  %v5074_v51 = vunpack.c.l.bf16 %v4219_v37  ;;  %v987_v9 = vrot.slane %v5075_v60, 2  ;;  %v5076_v48 = vunpack.c.h.bf16 %v4028_v11 }
  0x48   : > { %3513 = vmatprep.mubr.msk.bf16.mxu0 %vm557_vm3, %v4419_v5  ;;  %v5077_v6 = vunpack.c.l.bf16 %v4031_v12  ;;  %v4492_v0 = vpack.c.bf16 %v506_v1, %v504_v25  ;;  %v1029_v37 = vsel %vm986_vm4, %v1027_v46, %v1028_v7  ;;  %v1034_v60 = vsel %vm986_vm4, %v1032_v41, %v1033_v23 }
  0x49   : > { %v1035_v53 = vrot.slane %v5074_v51, 2  ;;  %v988_v3 = vrot.slane %v5076_v48, 2  ;;  %v1031_v28 = vsel %vm986_vm4, %v1028_v7, %v1030_v17  ;;  %v5078_v25 = vunpack.c.l.bf16 %v4230_v56 }
  0x4a   : > { %v4505_v12 = vpack.c.bf16 %v1031_v28, %v1029_v37  ;;  %v5080_v17 = vunpack.c.l.bf16 %v4233_v18  ;;  %v3008_v37 = vld [vmem:[%s5013_s1 + $0x6] sm:$0x3] }
  0x4b   : > { %v1036_v31 = vsel %vm986_vm4, %v1033_v23, %v1035_v53  ;;  %v4501_v22 = vsel %vm986_vm4, %v987_v9, %v988_v3  ;;  %v1037_v1 = vrot.slane %v5078_v25, 2  ;;  %v5079_v53 = vunpack.c.h.bf16 %v4230_v56 }
  0x4c   : > { %3360 = vmatmul.mubr.msk.bf16.gmra.mrb[24].mxu1 %vm557_vm3, %v4447_v33  ;;  %v4514_v46 = vpack.c.bf16 %v1036_v31, %v1034_v60  ;;  %v1040_v41 = vrot.slane %v5080_v17, 2  ;;  %v5081_v9 = vunpack.c.l.bf16 %v4268_v38  ;;  %v5085_v17 = vunpack.c.h.bf16 %v4286_v20 }
  0x4d   : > { %3363 = vmatprep.mubr.msk.bf16.mxu1 %vm557_vm3, %v4454_v35  ;;  %v990_v35 = vrot.slane %v5077_v6, 2  ;;  %v1038_v7 = vrot.slane %v5079_v53, 2  ;;  %v5083_v6 = vunpack.c.l.bf16 %v4271_v39  ;;  %v4540_v39 = vand.u32 %v3008_v37, %v4001_v4 }
  0x4e   : > { %v1042_v48 = vrot.slane %v5081_v9, 2  ;;  %v5084_v53 = vunpack.c.l.bf16 %v4286_v20  ;;  %v5086_v9 = vunpack.c.l.bf16 %v4294_v52 }
  0x4f   : > { %3514 = vmatmul.mubr.msk.bf16.gmra.mrb[8].mxu0 %vm557_vm3, %v4464_v45  ;;  %v4510_v51 = vsel %vm986_vm4, %v988_v3, %v990_v35  ;;  %v5082_v35 = vunpack.c.h.bf16 %v4268_v38  ;;  %v1039_v18 = vsel %vm986_vm4, %v1037_v1, %v1038_v7  ;;  %v1041_v28 = vsel %vm986_vm4, %v1038_v7, %v1040_v41 }
  0x50   : > { %3517 = vmatprep.mubr.msk.bf16.mxu0 %vm557_vm3, %v4466_v29  ;;  %v1099_v23 = vpack.c.bf16 %v4510_v51, %v4501_v22  ;;  %v4544_v25 = vpack.c.bf16 %v1041_v28, %v1039_v18  ;;  %v1047_v7 = vrot.slane %v5084_v53, 2  ;;  %v1048_v41 = vrot.slane %v5085_v17, 2  ;;  %v306_v22 = vld [vmem:[%s4025_s8 + $0xd4] sm:$0x1] }
  0x51   : > { %v1043_v3 = vrot.slane %v5082_v35, 2  ;;  %v5087_v35 = vunpack.c.l.bf16 %v4337_v16  ;;  %v5091_v17 = vunpack.c.h.bf16 %v4359_v44 }
  0x52   : > { %v1049_v52 = vsel %vm986_vm4, %v1047_v7, %v1048_v41 }
  0x53   : > { %v1044_v60 = vsel %vm986_vm4, %v1042_v48, %v1043_v3  ;;  %v1050_v48 = vrot.slane %v5086_v9, 2  ;;  %v1058_v9 = vrot.slane %v5091_v17, 2 }
  0x54   : > { %3364 = vmatmul.mubr.msk.bf16.gmra.mrb[28].mxu1 %vm557_vm3, %v4492_v0 }
  0x55   : > { %3369 = vmatprep.mubr.msk.bf16.mxu1 %vm557_vm3, %v4028_v11  ;;  %v1045_v11 = vrot.slane %v5083_v6, 2  ;;  %v5088_v6 = vunpack.c.h.bf16 %v4337_v16  ;;  %v1051_v18 = vsel %vm986_vm4, %v1048_v41, %v1050_v48  ;;  %v5092_v41 = vunpack.c.l.bf16 %v4362_v54 }
  0x57   : > { %3518 = vmatmul.mubr.msk.bf16.gmra.mrb[12].mxu0 %vm557_vm3, %v4505_v12  ;;  %v1046_v31 = vsel %vm986_vm4, %v1043_v3, %v1045_v11  ;;  %v1052_v3 = vrot.slane %v5087_v35, 2  ;;  %v5089_v11 = vunpack.c.l.bf16 %v4350_v36  ;;  %v4574_v36 = vpack.c.bf16 %v1051_v18, %v1049_v52  ;;  %v4593_v52 = vld [vmem:[%s4025_s8 + $0xc0] sm:$0xff]   ;;  %v303_v18 = vld [vmem:[%s4025_s8 + $0xc8] sm:$0x1] }
  0x58   : > { %3521 = vmatprep.mubr.msk.bf16.mxu0 %vm557_vm3, %v4514_v46  ;;  %v4549_v1 = vpack.c.bf16 %v1046_v31, %v1044_v60  ;;  %v5090_v31 = vunpack.c.l.bf16 %v4359_v44  ;;  %v1060_v48 = vrot.slane %v5092_v41, 2  ;;  %v5093_v35 = vunpack.c.l.bf16 %v4413_v50 }
  0x59   : > { %v1055_v37 = vrot.slane %v5089_v11, 2  ;;  %v5095_v11 = vunpack.c.l.bf16 %v4416_v58  ;;  %v357_v17 = vunpack.c.l.bf16 %v303_v18 }
  0x5a   : > { %v1057_v53 = vrot.slane %v5090_v31, 2  ;;  %v1061_v54 = vsel %vm986_vm4, %v1058_v9, %v1060_v48  ;;  %v356_v31 = vunpack.c.h.bf16 %v4593_v52 }
  0x5b   : > { %v1569_v18 = vrot.slane %v357_v17, 1 }
  0x5c   : > { %3370 = vmatmul.mubr.msk.bf16.vlgmr.msra.gmra.mrb[0].mxu1 %vm557_vm3, %v4034_v13  ;;  %v1776_v48 = vrot.slane %v356_v31, 2 }
  0x5d   : > { %3402 = vmatpush3.bf16.msra.mxu1 %v4095_v47  ;;  %3373 = vmatprep.mubr.msk.bf16.mxu1 %vm557_vm3, %v4045_v19  ;;  %v1053_v47 = vrot.slane %v5088_v6, 2  ;;  %v5094_v6 = vunpack.c.h.bf16 %v4413_v50 }
  0x5e   : > { %3435 = vmatprep.subr.bf16.mxu1 %v4540_v39 }
  0x5f   : > { %3522 = vmatmul.mubr.msk.bf16.gmra.mrb[16].mxu0 %vm557_vm3, %v4544_v25  ;;  %v1054_v28 = vsel %vm986_vm4, %v1052_v3, %v1053_v47  ;;  %v1056_v60 = vsel %vm986_vm4, %v1053_v47, %v1055_v37  ;;  %v1062_v3 = vrot.slane %v5093_v35, 2  ;;  %v1063_v47 = vrot.slane %v5094_v6, 2 }
  0x60   : > { %3525 = vmatprep.mubr.msk.bf16.mxu0 %vm557_vm3, %v4549_v1  ;;  %v4582_v7 = vpack.c.bf16 %v1056_v60, %v1054_v28  ;;  %v1065_v37 = vrot.slane %v5095_v11, 2  ;;  %v1059_v28 = vsel %vm986_vm4, %v1057_v53, %v1058_v9  ;;  %v355_v60 = vunpack.c.l.bf16 %v4593_v52 }
  0x61   : > { %v1064_v58 = vsel %vm986_vm4, %v1062_v3, %v1063_v47  ;;  %v4608_v35 = vpack.c.bf16 %v1061_v54, %v1059_v28  ;;  %v1778_v6 = vrot.slane %v357_v17, 2  ;;  %v1567_v3 = vrot.slane %v356_v31, 1 }
  0x62   : > { %v1066_v41 = vsel %vm986_vm4, %v1063_v47, %v1065_v37  ;;  %v1775_v9 = vrot.slane %v355_v60, 2  ;;  %v1566_v11 = vrot.slane %v355_v60, 1  ;;  %v3094_v60 = vld [vmem:[%s5013_s1 + $0x10] sm:$0x3] }
  0x63   : > { %v4612_v53 = vpack.c.bf16 %v1066_v41, %v1064_v58  ;;  %v1779_v37 = vsel %vm986_vm4, %v1776_v48, %v1778_v6  ;;  %v1570_v54 = vsel %vm426_vm2, %v1567_v3, %v1569_v18  ;;  %v2412_v31 = vand.u32 %v3094_v60, %v4001_v4  ;;  %v304_v4 = vld [vmem:[%s4025_s8 + $0xcc] sm:$0xff]  }
  0x64   : > { %3374 = vmatmul.mubr.msk.bf16.gmra.mrb[4].mxu1 %vm557_vm3, %v4068_v32  ;;  %v1777_v47 = vsel %vm986_vm4, %v1775_v9, %v1776_v48  ;;  %v1568_v28 = vsel %vm426_vm2, %v1566_v11, %v1567_v3 }
  0x65   : > { %3377 = vmatprep.mubr.msk.bf16.mxu1 %vm557_vm3, %v4086_v42  ;;  %v4622_v58 = vpack.c.bf16 %v1570_v54, %v1568_v28  ;;  %v4626_v41 = vpack.c.bf16 %v1779_v37, %v1777_v47 }
  0x67   : > { %3526 = vmatmul.mubr.msk.bf16.gmra.mrb[20].mxu0 %vm557_vm3, %v4574_v36 }
  0x68   : > { %3529 = vmatprep.mubr.msk.bf16.mxu0 %vm557_vm3, %v4582_v7 }
  0x6c   : > { %3378 = vmatmul.mubr.msk.bf16.gmra.mrb[8].mxu1 %vm557_vm3, %v4113_v55 }
  0x6d   : > { %3381 = vmatprep.mubr.msk.bf16.mxu1 %vm557_vm3, %v4123_v61 }
  0x6f   : > { %3530 = vmatmul.mubr.msk.bf16.gmra.mrb[24].mxu0 %vm557_vm3, %v4608_v35 }
  0x70   : > { %3533 = vmatprep.mubr.msk.bf16.mxu0 %vm557_vm3, %v4612_v53 }
  0x74   : > { %3382 = vmatmul.mubr.msk.bf16.gmra.mrb[12].mxu1 %vm557_vm3, %v4151_v26 }
  0x75   : > { %3385 = vmatprep.mubr.msk.bf16.mxu1 %vm557_vm3, %v4187_v57 }
  0x77   : > { %3534 = vmatmul.mubr.msk.bf16.gmra.mrb[28].mxu0 %vm557_vm3, %v4626_v41 }
  0x78   : > { %3539 = vmatprep.mubr.msk.bf16.mxu0 %vm557_vm3, %v4045_v19 }
  0x7c   : > { %3386 = vmatmul.mubr.msk.bf16.gmra.mrb[16].mxu1 %vm557_vm3, %v4212_v10 }
  0x7d   : > { %3389 = vmatprep.mubr.msk.bf16.mxu1 %vm557_vm3, %v4230_v56 }
  0x7f   : > { %3540 = vmatmul.mubr.msk.bf16.vlgmr.msra.gmra.mrb[0].mxu0 %vm557_vm3, %v4068_v32 }
  0x80   : > { %3572 = vmatpush3.bf16.msra.mxu0 %v4379_v24  ;;  %3543 = vmatprep.mubr.msk.bf16.mxu0 %vm557_vm3, %v4086_v42  ;;  %v358_v24 = vunpack.c.l.bf16 %v304_v4 }
  0x81   : > { %3605 = vmatprep.subr.bf16.mxu0 %v2412_v31 }
  0x82   : > { %v2398_v51 = vrot.slane %v358_v24, 2 }
  0x84   : > { %3390 = vmatmul.mubr.msk.bf16.gmra.mrb[20].mxu1 %vm557_vm3, %v4268_v38 }
  0x85   : > { %3393 = vmatprep.mubr.msk.bf16.mxu1 %vm557_vm3, %v4286_v20 }
  0x87   : > { %3544 = vmatmul.mubr.msk.bf16.gmra.mrb[4].mxu0 %vm557_vm3, %v4113_v55 }
  0x88   : > { %3547 = vmatprep.mubr.msk.bf16.mxu0 %vm557_vm3, %v4123_v61 }
  0x8c   : > { %3394 = vmatmul.mubr.msk.bf16.gmra.mrb[24].mxu1 %vm557_vm3, %v4337_v16 }
  0x8d   : > { %3397 = vmatprep.mubr.msk.bf16.mxu1 %vm557_vm3, %v4359_v44 }
  0x8f   : > { %3548 = vmatmul.mubr.msk.bf16.gmra.mrb[8].mxu0 %vm557_vm3, %v4151_v26 }
  0x90   : > { %3551 = vmatprep.mubr.msk.bf16.mxu0 %vm557_vm3, %v4187_v57 }
  0x94   : > { %3398 = vmatmul.mubr.msk.bf16.gmra.mrb[28].mxu1 %vm557_vm3, %v4413_v50 }
  0x95   : > { %3403 = vmatprep.mubr.msk.bf16.mxu1 %vm557_vm3, %v1099_v23 }
  0x97   : > { %3552 = vmatmul.mubr.msk.bf16.gmra.mrb[12].mxu0 %vm557_vm3, %v4212_v10 }
  0x98   : > { %3555 = vmatprep.mubr.msk.bf16.mxu0 %vm557_vm3, %v4230_v56 }
  0x9c   : > { %3404 = vmatmul.mubr.msk.bf16.vlgmr.msra.gmra.mrb[0].mxu1 %vm557_vm3, %v4277_v14  ;;  %v359_v14 = vunpack.c.h.bf16 %v304_v4 }
  0x9d   : > { %3436 = vmatpush3.bf16.msra.mxu1 %v4540_v39  ;;  %3407 = vmatprep.mubr.msk.bf16.mxu1 %vm557_vm3, %v4325_v40  ;;  %v360_v39 = vunpack.c.l.bf16 %v306_v22 }
  0x9e   : > { %3639 = vmatprep.subr.bf16.mxu1 %v4013_v8  ;;  %v2399_v23 = vrot.slane %v359_v14, 2 }
  0x9f   : > { %3556 = vmatmul.mubr.msk.bf16.gmra.mrb[16].mxu0 %vm557_vm3, %v4268_v38  ;;  %v2401_v17 = vrot.slane %v360_v39, 2 }
  0xa0   : > { %3559 = vmatprep.mubr.msk.bf16.mxu0 %vm557_vm3, %v4286_v20  ;;  %v4704_v9 = vsel %vm986_vm4, %v2398_v51, %v2399_v23 }
  0xa1   : > { %v4709_v48 = vsel %vm986_vm4, %v2399_v23, %v2401_v17 }
  0xa2   : > { %v2405_v6 = vpack.c.bf16 %v4709_v48, %v4704_v9 }
  0xa4   : > { %3408 = vmatmul.mubr.msk.bf16.gmra.mrb[4].mxu1 %vm557_vm3, %v4374_v59 }
  0xa5   : > { %3411 = vmatprep.mubr.msk.bf16.mxu1 %vm557_vm3, %v4404_v43 }
  0xa7   : > { %3560 = vmatmul.mubr.msk.bf16.gmra.mrb[20].mxu0 %vm557_vm3, %v4337_v16 }
  0xa8   : > { %3563 = vmatprep.mubr.msk.bf16.mxu0 %vm557_vm3, %v4359_v44 }
  0xac   : > { %3412 = vmatmul.mubr.msk.bf16.gmra.mrb[8].mxu1 %vm557_vm3, %v4419_v5 }
  0xad   : > { %3415 = vmatprep.mubr.msk.bf16.mxu1 %vm557_vm3, %v4464_v45 }
  0xaf   : > { %3564 = vmatmul.mubr.msk.bf16.gmra.mrb[24].mxu0 %vm557_vm3, %v4413_v50 }
  0xb0   : > { %3567 = vmatprep.mubr.msk.bf16.mxu0 %vm557_vm3, %v4593_v52 }
  0xb4   : > { %3416 = vmatmul.mubr.msk.bf16.gmra.mrb[12].mxu1 %vm557_vm3, %v4466_v29 }
  0xb5   : > { %3419 = vmatprep.mubr.msk.bf16.mxu1 %vm557_vm3, %v4505_v12 }
  0xb7   : > { %3568 = vmatmul.mubr.msk.bf16.gmra.mrb[28].mxu0 %vm557_vm3, %v304_v4 }
  0xb8   : > { %3573 = vmatprep.mubr.msk.bf16.mxu0 %vm557_vm3, %v4125_v62  ;;  %v5097_v62 = vld [vmem:[#allocation3_spill] sm:$0xff] }
  0xbc   : > { %3420 = vmatmul.mubr.msk.bf16.gmra.mrb[16].mxu1 %vm557_vm3, %v4514_v46 }
  0xbd   : > { %3423 = vmatprep.mubr.msk.bf16.mxu1 %vm557_vm3, %v4544_v25 }
  0xbf   : > { %3574 = vmatmul.mubr.msk.bf16.vlgmr.msra.gmra.mrb[0].mxu0 %vm557_vm3, %v4154_v27 }
  0xc0   : > { %3606 = vmatpush3.bf16.msra.mxu0 %v2412_v31  ;;  %3577 = vmatprep.mubr.msk.bf16.mxu0 %vm557_vm3, %v4163_v34 }
  0xc4   : > { %3424 = vmatmul.mubr.msk.bf16.gmra.mrb[20].mxu1 %vm557_vm3, %v4549_v1 }
  0xc5   : > { %3427 = vmatprep.mubr.msk.bf16.mxu1 %vm557_vm3, %v4574_v36 }
  0xc7   : > { %3578 = vmatmul.mubr.msk.bf16.gmra.mrb[4].mxu0 %vm557_vm3, %v4191_v63 }
  0xc8   : > { %3581 = vmatprep.mubr.msk.bf16.mxu0 %vm557_vm3, %v4225_v15  ;;  %v5096_v15 = vld [vmem:[#allocation2_spill] sm:$0xff] }
  0xcc   : > { %3428 = vmatmul.mubr.msk.bf16.gmra.mrb[24].mxu1 %vm557_vm3, %v4582_v7 }
  0xcd   : > { %3431 = vmatprep.mubr.msk.bf16.mxu1 %vm557_vm3, %v4608_v35 }
  0xcf   : > { %3582 = vmatmul.mubr.msk.bf16.gmra.mrb[8].mxu0 %vm557_vm3, %v4245_v2 }
  0xd0   : > { %3585 = vmatprep.mubr.msk.bf16.mxu0 %vm557_vm3, %v4288_v21 }
  0xd4   : > { %3432 = vmatmul.mubr.msk.bf16.gmra.mrb[28].mxu1 %vm557_vm3, %v4612_v53 }
  0xd5   : > { %3437 = vmatprep.mubr.msk.bf16.mxu1 %vm557_vm3, %v4034_v13  ;;  %v5098_v13 = vld [vmem:[#allocation4_spill] sm:$0xff] }
  0xd7   : > { %3586 = vmatmul.mubr.msk.bf16.gmra.mrb[12].mxu0 %vm557_vm3, %v4323_v49 }
  0xd8   : > { %3589 = vmatprep.mubr.msk.bf16.mxu0 %vm557_vm3, %v5096_v15 }
  0xdc   : > { %3438 = vmatmul.mubr.msk.bf16.vlgmr.msra.gmra.mrb[0].mxu1 %vm557_vm3, %v4045_v19  ;;  %v2190_v19 = vrot.slane %v359_v14, 1 }
  0xdd   : > { %3640 = vmatpush3.bf16.msra.mxu1 %v4013_v8  ;;  %3441 = vmatprep.mubr.msk.bf16.mxu1 %vm557_vm3, %v4068_v32  ;;  %v2189_v8 = vrot.slane %v358_v24, 1  ;;  %v2192_v32 = vrot.slane %v360_v39, 1 }
  0xdf   : > { %3590 = vmatmul.mubr.msk.bf16.gmra.mrb[16].mxu0 %vm557_vm3, %v5097_v62 }
  0xe0   : > { %3593 = vmatprep.mubr.msk.bf16.mxu0 %vm557_vm3, %v4400_v30 }
  0xe4   : > { %3442 = vmatmul.mubr.msk.bf16.gmra.mrb[4].mxu1 %vm557_vm3, %v4086_v42  ;;  %v2191_v42 = vsel %vm426_vm2, %v2189_v8, %v2190_v19 }
  0xe5   : > { %3445 = vmatprep.mubr.msk.bf16.mxu1 %vm557_vm3, %v4113_v55  ;;  %v2193_v55 = vsel %vm426_vm2, %v2190_v19, %v2192_v32 }
  0xe7   : > { %3594 = vmatmul.mubr.msk.bf16.gmra.mrb[20].mxu0 %vm557_vm3, %v4447_v33 }
  0xe8   : > { %3597 = vmatprep.mubr.msk.bf16.mxu0 %vm557_vm3, %v5098_v13 }
  0xec   : > { %3446 = vmatmul.mubr.msk.bf16.gmra.mrb[8].mxu1 %vm557_vm3, %v4123_v61  ;;  %v2196_v61 = vpack.c.bf16 %v2193_v55, %v2191_v42 }
  0xed   : > { %3449 = vmatprep.mubr.msk.bf16.mxu1 %vm557_vm3, %v4151_v26 }
  0xef   : > { %3598 = vmatmul.mubr.msk.bf16.gmra.mrb[24].mxu0 %vm557_vm3, %v4492_v0 }
  0xf0   : > { %3601 = vmatprep.mubr.msk.bf16.mxu0 %vm557_vm3, %v4622_v58 }
  0xf4   : > { %3450 = vmatmul.mubr.msk.bf16.gmra.mrb[12].mxu1 %vm557_vm3, %v4187_v57 }
  0xf5   : > { %3453 = vmatprep.mubr.msk.bf16.mxu1 %vm557_vm3, %v4212_v10 }
  0xf7   : > { %3602 = vmatmul.mubr.msk.bf16.gmra.mrb[28].mxu0 %vm557_vm3, %v2196_v61 }
  0xf8   : > { %3607 = vmatprep.mubr.msk.bf16.mxu0 %vm557_vm3, %v4325_v40 }
  0xfc   : > { %3454 = vmatmul.mubr.msk.bf16.gmra.mrb[16].mxu1 %vm557_vm3, %v4230_v56 }
  0xfd   : > { %3457 = vmatprep.mubr.msk.bf16.mxu1 %vm557_vm3, %v4268_v38 }
  0xff   : > { %3608 = vmatmul.mubr.msk.bf16.vlgmr.msra.gmra.mrb[0].mxu0 %vm557_vm3, %v4374_v59 }
 0x100   : > { %3611 = vmatprep.mubr.msk.bf16.mxu0 %vm557_vm3, %v4404_v43  ;;  %v4861_v43 = vld [vmem:[%s5016_s4] ss:$0 sm:$0xff] }
 0x104   : > { %3458 = vmatmul.mubr.msk.bf16.gmra.mrb[20].mxu1 %vm557_vm3, %v4286_v20 }
 0x105   : > { %3461 = vmatprep.mubr.msk.bf16.mxu1 %vm557_vm3, %v4337_v16 }
 0x107   : > { %3612 = vmatmul.mubr.msk.bf16.gmra.mrb[4].mxu0 %vm557_vm3, %v4419_v5 }
 0x108   : > { %3615 = vmatprep.mubr.msk.bf16.mxu0 %vm557_vm3, %v4464_v45 }
 0x10c   : > { %3462 = vmatmul.mubr.msk.bf16.gmra.mrb[24].mxu1 %vm557_vm3, %v4359_v44 }
 0x10d   : > { %3465 = vmatprep.mubr.msk.bf16.mxu1 %vm557_vm3, %v4413_v50 }
 0x10f   : > { %3616 = vmatmul.mubr.msk.bf16.gmra.mrb[8].mxu0 %vm557_vm3, %v4466_v29 }
 0x110   : > { %3619 = vmatprep.mubr.msk.bf16.mxu0 %vm557_vm3, %v4505_v12 }
 0x114   : > { %3466 = vmatmul.mubr.msk.bf16.gmra.mrb[28].mxu1 %vm557_vm3, %v4593_v52 }
 0x115   : > { %3487 = vmatprep.mubr.msk.bf16.mxu1 %vm557_vm3, %v4323_v49 }
 0x117   : > { %3620 = vmatmul.mubr.msk.bf16.gmra.mrb[12].mxu0 %vm557_vm3, %v4514_v46 }
 0x118   : > { %3623 = vmatprep.mubr.msk.bf16.mxu0 %vm557_vm3, %v4544_v25 }
 0x11c   : > { %3488 = vmatmul.mubr.msk.bf16.vlgmr.msra.gmra.mrb[16].mxu1 %vm557_vm3, %v5096_v15 }
 0x11d   : > { %3491 = vmatprep.mubr.msk.bf16.mxu1 %vm557_vm3, %v5097_v62 }
 0x11f   : > { %3624 = vmatmul.mubr.msk.bf16.gmra.mrb[16].mxu0 %vm557_vm3, %v4549_v1 }
 0x120   : > { %3627 = vmatprep.mubr.msk.bf16.mxu0 %vm557_vm3, %v4574_v36 }
 0x124   : > { %3492 = vmatmul.mubr.msk.bf16.gmra.mrb[20].mxu1 %vm557_vm3, %v4400_v30 }
 0x125   : > { %3495 = vmatprep.mubr.msk.bf16.mxu1 %vm557_vm3, %v4447_v33  ;;  %v4866_v33 = vld [vmem:[%s5017_s5] ss:$0 sm:$0xff] }
 0x127   : > { %3628 = vmatmul.mubr.msk.bf16.gmra.mrb[20].mxu0 %vm557_vm3, %v4582_v7 }
 0x128   : > { %3631 = vmatprep.mubr.msk.bf16.mxu0 %vm557_vm3, %v4608_v35 }
 0x12c   : > { %3496 = vmatmul.mubr.msk.bf16.gmra.mrb[24].mxu1 %vm557_vm3, %v5098_v13 }
 0x12d   : > { %3499 = vmatprep.mubr.msk.bf16.mxu1 %vm557_vm3, %v4492_v0 }
 0x12f   : > { %3632 = vmatmul.mubr.msk.bf16.gmra.mrb[24].mxu0 %vm557_vm3, %v4612_v53 }
 0x130   : > { %3635 = vmatprep.mubr.msk.bf16.mxu0 %vm557_vm3, %v4626_v41 }
 0x134   : > { %3500 = vmatmul.mubr.msk.bf16.gmra.mrb[28].mxu1 %vm557_vm3, %v4622_v58 }
 0x137   : > { %3636 = vmatmul.mubr.msk.bf16.gmra.mrb[28].mxu0 %vm557_vm3, %v2405_v6 }
 0x1af   : > { %v3439_v26 = vpop.f32.mrb[0].mxu1 }
 0x1b0   : > { %v1404_v27 = vpop.f32.mrb[1].mxu1 }
 0x1b1   : > { %v3440_v34 = vpop.f32.mrb[2].mxu1 }
 0x1b2   : > { %v1407_v56 = vpop.f32.mrb[3].mxu1 }
 0x1b7   : > { %v3443_v57 = vpop.f32.mrb[4].mxu1 }
 0x1b8   : > { %v1420_v63 = vpop.f32.mrb[5].mxu1 }
 0x1b9   : > { %v3444_v10 = vpop.f32.mrb[6].mxu1 }
 0x1ba   : > { %v1423_v21 = vpop.f32.mrb[7].mxu1 }
 0x1bf   : > { %v3447_v2 = vpop.f32.mrb[8].mxu1 }
 0x1c0   : > { %v4844_v38 = vpop.f32.mrb[9].mxu1 }
 0x1c1   : > { %v4846_v20 = vpop.f32.mrb[10].mxu1 }
 0x1c2   : > { %v4848_v16 = vpop.f32.mrb[11].mxu1 }
 0x1c7   : > { %v4850_v49 = vpop.f32.mrb[12].mxu1 }
 0x1c8   : > { %v4852_v40 = vpop.f32.mrb[13].mxu1 }
 0x1c9   : > { %v4854_v44 = vpop.f32.mrb[14].mxu1 }
 0x1ca   : > { %v4856_v59 = vpop.f32.mrb[15].mxu1 }
 0x1d2   : > { %v3609_v30 = vpop.f32.mrb[0].mxu0 }
 0x1d3   : > { %v3641_v50 = vadd.f32 %v3609_v30, %v3439_v26  ;;  %v2448_v5 = vpop.f32.mrb[1].mxu0 }
 0x1d4   : > { %v3642_v45 = vadd.f32 %v2448_v5, %v1404_v27  ;;  %v3610_v29 = vpop.f32.mrb[2].mxu0 }
 0x1d5   : > { %v2616_v0 = vmul.f32 %v3641_v50, %v4861_v43  ;;  %v3643_v12 = vadd.f32 %v3610_v29, %v3440_v34  ;;  %v2451_v46 = vpop.f32.mrb[3].mxu0 }
 0x1d6   : > { %v2614_v25 = vmul.f32 %v3642_v45, %v4861_v43  ;;  %v3644_v1 = vadd.f32 %v2451_v46, %v1407_v56 }
 0x1d7   : > { %v2655_v36 = vadd.f32 %v4866_v33, %v2616_v0  ;;  %v2617_v7 = vmul.f32 %v3643_v12, %v4861_v43 }
 0x1d8   : > { %v2653_v52 = vadd.f32 %v4866_v33, %v2614_v25  ;;  %v2615_v35 = vmul.f32 %v3644_v1, %v4861_v43 }
 0x1d9   : > { %v2687_v53 = vmax.f32 %v2655_v36, 0.0  ;;  %v2656_v11 = vadd.f32 %v4866_v33, %v2617_v7 }
 0x1da   : > { %v2685_v3 = vmax.f32 %v2653_v52, 0.0  ;;  %v2654_v18 = vadd.f32 %v4866_v33, %v2615_v35  ;;  %v3613_v47 = vpop.f32.mrb[4].mxu0 }
 0x1db   : > { %v3150_v37 = vpack.c.bf16 %v2687_v53, %v2687_v53  ;;  %v2688_v28 = vmax.f32 %v2656_v11, 0.0  ;;  %v3645_v54 = vadd.f32 %v3613_v47, %v3443_v57  ;;  %v2464_v58 = vpop.f32.mrb[5].mxu0 }
 0x1dc   : > { %v3148_v41 = vpack.c.bf16 %v2685_v3, %v2685_v3  ;;  %v2686_v60 = vmax.f32 %v2654_v18, 0.0  ;;  %v3646_v31 = vadd.f32 %v2464_v58, %v1420_v63  ;;  %v3614_v4 = vpop.f32.mrb[6].mxu0 }
 0x1dd   : > { %2848 = vst.msk [vmem:[%s4879_s26 + $0x8] sm:$0xf] %vm2845_vm5, %v3150_v37  ;;  %v3151_v24 = vpack.c.bf16 %v2688_v28, %v2688_v28  ;;  %v2620_v14 = vmul.f32 %v3645_v54, %v4861_v43  ;;  %v3647_v22 = vadd.f32 %v3614_v4, %v3444_v10  ;;  %v2467_v51 = vpop.f32.mrb[7].mxu0 }
 0x1de   : > { %2846 = vst.msk [vmem:[%s4879_s26] sm:$0xf] %vm2845_vm5, %v3148_v41  ;;  %v3149_v23 = vpack.c.bf16 %v2686_v60, %v2686_v60  ;;  %v2618_v39 = vmul.f32 %v3646_v31, %v4861_v43  ;;  %v3648_v17 = vadd.f32 %v2467_v51, %v1423_v21 }
 0x1df   : > { %2849 = vst.msk [vmem:[%s4879_s26 + $0xc] sm:$0xf] %vm2845_vm5, %v3151_v24  ;;  %v2659_v9 = vadd.f32 %v4866_v33, %v2620_v14  ;;  %v2621_v48 = vmul.f32 %v3647_v22, %v4861_v43 }
 0x1e0   : > { %2847 = vst.msk [vmem:[%s4879_s26 + $0x4] sm:$0xf] %vm2845_vm5, %v3149_v23  ;;  %v2657_v6 = vadd.f32 %v4866_v33, %v2618_v39  ;;  %v2619_v15 = vmul.f32 %v3648_v17, %v4861_v43 }
 0x1e1   : > { %v2691_v62 = vmax.f32 %v2659_v9, 0.0  ;;  %v2660_v13 = vadd.f32 %v4866_v33, %v2621_v48 }
 0x1e2   : > { %v2689_v8 = vmax.f32 %v2657_v6, 0.0  ;;  %v2658_v19 = vadd.f32 %v4866_v33, %v2619_v15  ;;  %v3617_v32 = vpop.f32.mrb[8].mxu0 }
 0x1e3   : > { %v3154_v42 = vpack.c.bf16 %v2691_v62, %v2691_v62  ;;  %v2692_v55 = vmax.f32 %v2660_v13, 0.0  ;;  %v3649_v61 = vadd.f32 %v3617_v32, %v3447_v2  ;;  %v2480_v26 = vpop.f32.mrb[9].mxu0 }
 0x1e4   : > { %v3152_v27 = vpack.c.bf16 %v2689_v8, %v2689_v8  ;;  %v2690_v34 = vmax.f32 %v2658_v19, 0.0  ;;  %v3650_v56 = vadd.f32 %v2480_v26, %v4844_v38  ;;  %v3618_v57 = vpop.f32.mrb[10].mxu0 }
 0x1e5   : > { %2852 = vst.msk [vmem:[%s4879_s26 + $0x18] sm:$0xf] %vm2845_vm5, %v3154_v42  ;;  %v3155_v63 = vpack.c.bf16 %v2692_v55, %v2692_v55  ;;  %v2624_v10 = vmul.f32 %v3649_v61, %v4861_v43  ;;  %v3651_v21 = vadd.f32 %v3618_v57, %v4846_v20  ;;  %v2483_v30 = vpop.f32.mrb[11].mxu0 }
 0x1e6   : > { %2850 = vst.msk [vmem:[%s4879_s26 + $0x10] sm:$0xf] %vm2845_vm5, %v3152_v27  ;;  %v3153_v50 = vpack.c.bf16 %v2690_v34, %v2690_v34  ;;  %v2622_v2 = vmul.f32 %v3650_v56, %v4861_v43  ;;  %v3652_v5 = vadd.f32 %v2483_v30, %v4848_v16 }
 0x1e7   : > { %2853 = vst.msk [vmem:[%s4879_s26 + $0x1c] sm:$0xf] %vm2845_vm5, %v3155_v63  ;;  %v2663_v38 = vadd.f32 %v4866_v33, %v2624_v10  ;;  %v2625_v45 = vmul.f32 %v3651_v21, %v4861_v43 }
 0x1e8   : > { %2851 = vst.msk [vmem:[%s4879_s26 + $0x14] sm:$0xf] %vm2845_vm5, %v3153_v50  ;;  %v2661_v29 = vadd.f32 %v4866_v33, %v2622_v2  ;;  %v2623_v20 = vmul.f32 %v3652_v5, %v4861_v43 }
 0x1e9   : > { %v2695_v0 = vmax.f32 %v2663_v38, 0.0  ;;  %v2664_v12 = vadd.f32 %v4866_v33, %v2625_v45 }
 0x1ea   : > { %v2693_v46 = vmax.f32 %v2661_v29, 0.0  ;;  %v2662_v16 = vadd.f32 %v4866_v33, %v2623_v20  ;;  %v3621_v25 = vpop.f32.mrb[12].mxu0 }
 0x1eb   : > { %v3158_v1 = vpack.c.bf16 %v2695_v0, %v2695_v0  ;;  %v2696_v36 = vmax.f32 %v2664_v12, 0.0  ;;  %v3653_v7 = vadd.f32 %v3621_v25, %v4850_v49  ;;  %v2496_v52 = vpop.f32.mrb[13].mxu0 }
 0x1ec   : > { %v3156_v35 = vpack.c.bf16 %v2693_v46, %v2693_v46  ;;  %v2694_v53 = vmax.f32 %v2662_v16, 0.0  ;;  %v3654_v11 = vadd.f32 %v2496_v52, %v4852_v40  ;;  %v3622_v3 = vpop.f32.mrb[14].mxu0 }
 0x1ed   : > { %2856 = vst.msk [vmem:[%s4879_s26 + $0x28] sm:$0xf] %vm2845_vm5, %v3158_v1  ;;  %v3159_v18 = vpack.c.bf16 %v2696_v36, %v2696_v36  ;;  %v2628_v47 = vmul.f32 %v3653_v7, %v4861_v43  ;;  %v3655_v37 = vadd.f32 %v3622_v3, %v4854_v44  ;;  %v2499_v28 = vpop.f32.mrb[15].mxu0 }
 0x1ee   : > { %2854 = vst.msk [vmem:[%s4879_s26 + $0x20] sm:$0xf] %vm2845_vm5, %v3156_v35  ;;  %v3157_v54 = vpack.c.bf16 %v2694_v53, %v2694_v53  ;;  %v2626_v49 = vmul.f32 %v3654_v11, %v4861_v43  ;;  %v3656_v58 = vadd.f32 %v2499_v28, %v4856_v59 }
 0x1ef   : > { %v3489_v41 = vpop.f32.mrb[16].mxu1  ;;  %2857 = vst.msk [vmem:[%s4879_s26 + $0x2c] sm:$0xf] %vm2845_vm5, %v3159_v18  ;;  %v2667_v40 = vadd.f32 %v4866_v33, %v2628_v47  ;;  %v2629_v60 = vmul.f32 %v3655_v37, %v4861_v43 }
 0x1f0   : > { %v1680_v31 = vpop.f32.mrb[17].mxu1  ;;  %2855 = vst.msk [vmem:[%s4879_s26 + $0x24] sm:$0xf] %vm2845_vm5, %v3157_v54  ;;  %v2665_v44 = vadd.f32 %v4866_v33, %v2626_v49  ;;  %v2627_v4 = vmul.f32 %v3656_v58, %v4861_v43 }
 0x1f1   : > { %v3490_v24 = vpop.f32.mrb[18].mxu1  ;;  %v2699_v14 = vmax.f32 %v2667_v40, 0.0  ;;  %v2668_v22 = vadd.f32 %v4866_v33, %v2629_v60 }
 0x1f2   : > { %v1683_v59 = vpop.f32.mrb[19].mxu1  ;;  %v2697_v51 = vmax.f32 %v2665_v44, 0.0  ;;  %v2666_v23 = vadd.f32 %v4866_v33, %v2627_v4  ;;  %v3625_v39 = vpop.f32.mrb[16].mxu0 }
 0x1f3   : > { %v3162_v17 = vpack.c.bf16 %v2699_v14, %v2699_v14  ;;  %v2700_v9 = vmax.f32 %v2668_v22, 0.0  ;;  %v3657_v48 = vadd.f32 %v3625_v39, %v3489_v41  ;;  %v2512_v6 = vpop.f32.mrb[17].mxu0 }
 0x1f4   : > { %v3160_v15 = vpack.c.bf16 %v2697_v51, %v2697_v51  ;;  %v2698_v62 = vmax.f32 %v2666_v23, 0.0  ;;  %v3658_v13 = vadd.f32 %v2512_v6, %v1680_v31  ;;  %v3626_v8 = vpop.f32.mrb[18].mxu0 }
 0x1f5   : > { %2860 = vst.msk [vmem:[%s4879_s26 + $0x38] sm:$0xf] %vm2845_vm5, %v3162_v17  ;;  %v3163_v19 = vpack.c.bf16 %v2700_v9, %v2700_v9  ;;  %v2632_v32 = vmul.f32 %v3657_v48, %v4861_v43  ;;  %v3659_v42 = vadd.f32 %v3626_v8, %v3490_v24  ;;  %v2515_v55 = vpop.f32.mrb[19].mxu0 }
 0x1f6   : > { %2858 = vst.msk [vmem:[%s4879_s26 + $0x30] sm:$0xf] %vm2845_vm5, %v3160_v15  ;;  %v3161_v61 = vpack.c.bf16 %v2698_v62, %v2698_v62  ;;  %v2630_v26 = vmul.f32 %v3658_v13, %v4861_v43  ;;  %v3660_v27 = vadd.f32 %v2515_v55, %v1683_v59 }
 0x1f7   : > { %v3493_v34 = vpop.f32.mrb[20].mxu1  ;;  %2861 = vst.msk [vmem:[%s4879_s26 + $0x3c] sm:$0xf] %vm2845_vm5, %v3163_v19  ;;  %v2671_v56 = vadd.f32 %v4866_v33, %v2632_v32  ;;  %v2633_v57 = vmul.f32 %v3659_v42, %v4861_v43 }
 0x1f8   : > { %v1696_v63 = vpop.f32.mrb[21].mxu1  ;;  %2859 = vst.msk [vmem:[%s4879_s26 + $0x34] sm:$0xf] %vm2845_vm5, %v3161_v61  ;;  %v2669_v10 = vadd.f32 %v4866_v33, %v2630_v26  ;;  %v2631_v21 = vmul.f32 %v3660_v27, %v4861_v43 }
 0x1f9   : > { %v3494_v30 = vpop.f32.mrb[22].mxu1  ;;  %v2703_v50 = vmax.f32 %v2671_v56, 0.0  ;;  %v2672_v2 = vadd.f32 %v4866_v33, %v2633_v57 }
 0x1fa   : > { %v1699_v5 = vpop.f32.mrb[23].mxu1  ;;  %v2701_v38 = vmax.f32 %v2669_v10, 0.0  ;;  %v2670_v45 = vadd.f32 %v4866_v33, %v2631_v21  ;;  %v3629_v29 = vpop.f32.mrb[20].mxu0 }
 0x1fb   : > { %v3166_v20 = vpack.c.bf16 %v2703_v50, %v2703_v50  ;;  %v2704_v0 = vmax.f32 %v2672_v2, 0.0  ;;  %v3661_v12 = vadd.f32 %v3629_v29, %v3493_v34  ;;  %v2528_v46 = vpop.f32.mrb[21].mxu0 }
 0x1fc   : > { %v3164_v16 = vpack.c.bf16 %v2701_v38, %v2701_v38  ;;  %v2702_v25 = vmax.f32 %v2670_v45, 0.0  ;;  %v3662_v1 = vadd.f32 %v2528_v46, %v1696_v63  ;;  %v3630_v36 = vpop.f32.mrb[22].mxu0 }
 0x1fd   : > { %2864 = vst.msk [vmem:[%s4879_s26 + $0x48] sm:$0xf] %vm2845_vm5, %v3166_v20  ;;  %v3167_v7 = vpack.c.bf16 %v2704_v0, %v2704_v0  ;;  %v2636_v52 = vmul.f32 %v3661_v12, %v4861_v43  ;;  %v3663_v35 = vadd.f32 %v3630_v36, %v3494_v30  ;;  %v2531_v53 = vpop.f32.mrb[23].mxu0 }
 0x1fe   : > { %2862 = vst.msk [vmem:[%s4879_s26 + $0x40] sm:$0xf] %vm2845_vm5, %v3164_v16  ;;  %v3165_v11 = vpack.c.bf16 %v2702_v25, %v2702_v25  ;;  %v2634_v3 = vmul.f32 %v3662_v1, %v4861_v43  ;;  %v3664_v18 = vadd.f32 %v2531_v53, %v1699_v5 }
 0x1ff   : > { %v3497_v47 = vpop.f32.mrb[24].mxu1  ;;  %2865 = vst.msk [vmem:[%s4879_s26 + $0x4c] sm:$0xf] %vm2845_vm5, %v3167_v7  ;;  %v2675_v37 = vadd.f32 %v4866_v33, %v2636_v52  ;;  %v2637_v28 = vmul.f32 %v3663_v35, %v4861_v43 }
 0x200   : > { %v1712_v54 = vpop.f32.mrb[25].mxu1  ;;  %2863 = vst.msk [vmem:[%s4879_s26 + $0x44] sm:$0xf] %vm2845_vm5, %v3165_v11  ;;  %v2673_v49 = vadd.f32 %v4866_v33, %v2634_v3  ;;  %v2635_v58 = vmul.f32 %v3664_v18, %v4861_v43 }
 0x201   : > { %v3498_v41 = vpop.f32.mrb[26].mxu1  ;;  %v2707_v40 = vmax.f32 %v2675_v37, 0.0  ;;  %v2676_v60 = vadd.f32 %v4866_v33, %v2637_v28 }
 0x202   : > { %v1715_v31 = vpop.f32.mrb[27].mxu1  ;;  %v2705_v44 = vmax.f32 %v2673_v49, 0.0  ;;  %v2674_v4 = vadd.f32 %v4866_v33, %v2635_v58  ;;  %v3633_v24 = vpop.f32.mrb[24].mxu0 }
 0x203   : > { %v3170_v14 = vpack.c.bf16 %v2707_v40, %v2707_v40  ;;  %v2708_v22 = vmax.f32 %v2676_v60, 0.0  ;;  %v3665_v59 = vadd.f32 %v3633_v24, %v3497_v47  ;;  %v2544_v51 = vpop.f32.mrb[25].mxu0 }
 0x204   : > { %v3168_v23 = vpack.c.bf16 %v2705_v44, %v2705_v44  ;;  %v2706_v39 = vmax.f32 %v2674_v4, 0.0  ;;  %v3666_v17 = vadd.f32 %v2544_v51, %v1712_v54  ;;  %v3634_v9 = vpop.f32.mrb[26].mxu0 }
 0x205   : > { %2868 = vst.msk [vmem:[%s4879_s26 + $0x58] sm:$0xf] %vm2845_vm5, %v3170_v14  ;;  %v3171_v48 = vpack.c.bf16 %v2708_v22, %v2708_v22  ;;  %v2640_v6 = vmul.f32 %v3665_v59, %v4861_v43  ;;  %v3667_v15 = vadd.f32 %v3634_v9, %v3498_v41  ;;  %v2547_v62 = vpop.f32.mrb[27].mxu0 }
 0x206   : > { %2866 = vst.msk [vmem:[%s4879_s26 + $0x50] sm:$0xf] %vm2845_vm5, %v3168_v23  ;;  %v3169_v13 = vpack.c.bf16 %v2706_v39, %v2706_v39  ;;  %v2638_v8 = vmul.f32 %v3666_v17, %v4861_v43  ;;  %v3668_v19 = vadd.f32 %v2547_v62, %v1715_v31 }
 0x207   : > { %v3501_v32 = vpop.f32.mrb[28].mxu1  ;;  %2869 = vst.msk [vmem:[%s4879_s26 + $0x5c] sm:$0xf] %vm2845_vm5, %v3171_v48  ;;  %v2679_v42 = vadd.f32 %v4866_v33, %v2640_v6  ;;  %v2641_v55 = vmul.f32 %v3667_v15, %v4861_v43 }
 0x208   : > { %v1728_v61 = vpop.f32.mrb[29].mxu1  ;;  %2867 = vst.msk [vmem:[%s4879_s26 + $0x54] sm:$0xf] %vm2845_vm5, %v3169_v13  ;;  %v2677_v26 = vadd.f32 %v4866_v33, %v2638_v8  ;;  %v2639_v27 = vmul.f32 %v3668_v19, %v4861_v43 }
 0x209   : > { %v3502_v34 = vpop.f32.mrb[30].mxu1  ;;  %v2711_v56 = vmax.f32 %v2679_v42, 0.0  ;;  %v2680_v57 = vadd.f32 %v4866_v33, %v2641_v55 }
 0x20a   : > { %v1731_v63 = vpop.f32.mrb[31].mxu1  ;;  %v2709_v10 = vmax.f32 %v2677_v26, 0.0  ;;  %v2678_v21 = vadd.f32 %v4866_v33, %v2639_v27  ;;  %v3637_v30 = vpop.f32.mrb[28].mxu0 }
 0x20b   : > { %v3174_v50 = vpack.c.bf16 %v2711_v56, %v2711_v56  ;;  %v2712_v2 = vmax.f32 %v2680_v57, 0.0  ;;  %v3669_v5 = vadd.f32 %v3637_v30, %v3501_v32  ;;  %v2560_v38 = vpop.f32.mrb[29].mxu0 }
 0x20c   : > { %v3172_v45 = vpack.c.bf16 %v2709_v10, %v2709_v10  ;;  %v2710_v29 = vmax.f32 %v2678_v21, 0.0  ;;  %v3670_v20 = vadd.f32 %v2560_v38, %v1728_v61  ;;  %v3638_v0 = vpop.f32.mrb[30].mxu0 }
 0x20d   : > { %2872 = vst.msk [vmem:[%s4879_s26 + $0x68] sm:$0xf] %vm2845_vm5, %v3174_v50  ;;  %v3175_v12 = vpack.c.bf16 %v2712_v2, %v2712_v2  ;;  %v2644_v46 = vmul.f32 %v3669_v5, %v4861_v43  ;;  %v3671_v16 = vadd.f32 %v3638_v0, %v3502_v34  ;;  %v2563_v25 = vpop.f32.mrb[31].mxu0 }
 0x20e   : > { %2870 = vst.msk [vmem:[%s4879_s26 + $0x60] sm:$0xf] %vm2845_vm5, %v3172_v45  ;;  %v3173_v1 = vpack.c.bf16 %v2710_v29, %v2710_v29  ;;  %v2642_v36 = vmul.f32 %v3670_v20, %v4861_v43  ;;  %v3672_v7 = vadd.f32 %v2563_v25, %v1731_v63 }
 0x20f   : > { %2873 = vst.msk [vmem:[%s4879_s26 + $0x6c] sm:$0xf] %vm2845_vm5, %v3175_v12  ;;  %v2683_v52 = vadd.f32 %v4866_v33, %v2644_v46  ;;  %v2645_v35 = vmul.f32 %v3671_v16, %v4861_v43 }
 0x210   : > { %2871 = vst.msk [vmem:[%s4879_s26 + $0x64] sm:$0xf] %vm2845_vm5, %v3173_v1  ;;  %v2681_v53 = vadd.f32 %v4866_v33, %v2642_v36  ;;  %v2643_v11 = vmul.f32 %v3672_v7, %v4861_v43 }
 0x211   : > { %v2715_v3 = vmax.f32 %v2683_v52, 0.0  ;;  %v2684_v18 = vadd.f32 %v4866_v33, %v2645_v35 }
 0x212   : > { %v2713_v47 = vmax.f32 %v2681_v53, 0.0  ;;  %v2682_v37 = vadd.f32 %v4866_v33, %v2643_v11 }
 0x213   : > { %v3178_v28 = vpack.c.bf16 %v2715_v3, %v2715_v3  ;;  %v2716_v54 = vmax.f32 %v2684_v18, 0.0 }
 0x214   : > { %v3176_v49 = vpack.c.bf16 %v2713_v47, %v2713_v47  ;;  %v2714_v58 = vmax.f32 %v2682_v37, 0.0 }
 0x215   : > { %2876 = vst.msk [vmem:[%s4879_s26 + $0x78] sm:$0xf] %vm2845_vm5, %v3178_v28  ;;  %v3179_v41 = vpack.c.bf16 %v2716_v54, %v2716_v54 }
 0x216   : > { %2874 = vst.msk [vmem:[%s4879_s26 + $0x70] sm:$0xf] %vm2845_vm5, %v3176_v49  ;;  %v3177_v40 = vpack.c.bf16 %v2714_v58, %v2714_v58 }
 0x217   : > { %2877 = vst.msk [vmem:[%s4879_s26 + $0x7c] sm:$0xf] %vm2845_vm5, %v3179_v41 }
 0x218   : > { %2875 = vst.msk [vmem:[%s4879_s26 + $0x74] sm:$0xf] %vm2845_vm5, %v3177_v40 }
 0x219 PF: > { %s16_s21 = sadd.s32 1, %s3949_s21  }
 0x21a   : > { %p13_p4 = scmp.ge.s32.totalorder %s16_s21, 4  }
 0x21c   :  { %15 = sbr.rel (!%p13_p4) target bundleno = 1 (0x1), region = 82 }

// kernel: densenet_cxr_bottom.7
= control target key start
LH: loop header
LB: loop body
LE: loop exit
PB: predicated region body
PF: predicated region fallthrough
CT: control target
= control target key end

     0   :  { %s1704_s0 = inlined_call_operand.vmem [shape: bf16[2,256,64], index: 0, kind: input, shape index: {}]   ;;  %s1705_s1 = inlined_call_operand.vmem [shape: f32[1,64], index: 1, kind: input, shape index: {}]   ;;  %s1706_s2 = inlined_call_operand.vmem [shape: f32[1,64], index: 2, kind: input, shape index: {}]   ;;  %s1707_s3 = inlined_call_operand.vmem [shape: f32[64,1], index: 3, kind: input, shape index: {}]   ;;  %s1708_s4 = inlined_call_operand.<no memory space> [shape: f32[1,1], index: 4, kind: input, shape index: {}]   ;;  %s1709_s5 = inlined_call_operand.hbm [shape: f32[2,1,64], index: 5, kind: output, shape index: {}]  }
   0x1   :  { %10 = sst [smem:[#allocation3]] %s1708_s4 }
   0x2   :  { %11 = vsyncpa [#allocation5], 0 }
   0x3   :  { %13 = vsyncpa [#allocation5 + $0x1], 0  ;;  %s1325_s20 = smov 0   ;;  %s1327_s21 = smov 0  }
   0x4   :  { %s1329_s22 = smov 0   ;;  %s1331_s23 = smov 0  }
   0x5   :  { %s1333_s24 = smov 0   ;;  %s1335_s25 = smov 0  }
   0x6   :  { %s1337_s26 = smov 0   ;;  %s1339_s27 = smov 0  }
   0x7 LB: > { %s880_s4 = sadd.s32 4294967295, %s1287_s27   ;;  %s881_s28 = sadd.s32 4294967294, %s1287_s27   ;;  %s1287_s27 = sphi %s1339_s27, %s19_s27   ;;  %s1283_s26 = sphi %s1337_s26, %s1718_s26   ;;  %s1279_s25 = sphi %s1335_s25, %s1717_s25   ;;  %s1275_s24 = sphi %s1333_s24, %s1716_s24   ;;  %s1271_s23 = sphi %s1331_s23, %s1715_s23   ;;  %s1267_s22 = sphi %s1329_s22, %s1714_s22   ;;  %s1263_s21 = sphi %s1327_s21, %s1713_s21   ;;  %s1259_s20 = sphi %s1325_s20, %s1712_s20  }
   0x8   : > { %s28_s29 = sadd.s32 1, %s1279_s25  ;;  %s31_s30 = sadd.s32 1, %s1283_s26 }
   0x9   : > { %p29_p0 = scmp.ge.s32.totalorder %s28_s29, 2  ;;  %p160_p1 = scmp.ne.s32.totalorder %s1267_s22, %s1263_s21 }
   0xa   : > { %p161_p2 = scmp.eq.s32.totalorder %s880_s4, 3  ;;  %p166_p4 = scmp.ne.s32.totalorder %s1263_s21, %s1259_s20 }
   0xb   : > { %s1720_s29 = smov (%p29_p0, %s28_s29), 0  ;;  %s1722_s30 = smov (!%p29_p0, %s31_s30), %s1283_s26 }
   0xc   : > { %p1374_p3 = por %p161_p2, %p160_p1  ;;  %p33_p5 = scmp.ge.s32.totalorder %s1722_s30, 2 }
   0xd   : > { %p167_p6 = scmp.eq.s32.totalorder %s881_s28, 3  ;;  %p884_p7 = scmp.ge.s32.totalorder %s1287_s27, 1 }
   0xe   : > { %p210_p8 = scmp.lt.s32.totalorder %s1287_s27, 5  ;;  %s1724_s30 = smov (%p33_p5, %s1722_s30), 0 }
   0xf   : > { %p1384_p9 = por %p167_p6, %p166_p4  ;;  %s147_s8 = ssub.s32 %s1283_s26, %s1724_s30 }
  0x10   : > { %p211_p10 = pnand %p884_p7, %p210_p8  ;;  %s150_s9 = sadd.s32 1, %s1267_s22 }
  0x11   : > { %p148_p11 = scmp.eq.s32.totalorder %s147_s8, 0  ;;  %s239_s11 = sand.u32 (!%p211_p10), 1, %s1263_s21  }
  0x12   : > { %214 = sbr.rel (%p211_p10) target bundleno = 507 (0x1fb), region = 40  ;;  %s885_s12 = sshll.u32 (!%p211_p10), %s1271_s23, 4 }
  0x13   : > { %s1392_s10 = scalar_select %p148_p11, %s1267_s22, %s150_s9  }
  0x14   : > { %p242_p12 = scmp.lt.s32.totalorder (!%p211_p10), %s1275_s24, 1  ;;  %p244_p13 = scmp.lt.s32.totalorder (!%p211_p10), %s885_s12, 31 }
  0x15   : > { %s1405_s4 = scalar_lea.vmem (!%p211_p10), [#allocation4], %s239_s11  ;;  %p888_p0 = scmp.ne.s32.totalorder (!%p211_p10), %s1271_s23, 0 }
  0x19   : > { %s243_s13 = scalar_select %p242_p12, %s1275_s24, 1 }
  0x1a   : > { %s1726_s12 = smov (!%p244_p13, %s885_s12), 31  ;;  %254 = sbr.rel (%p888_p0) target bundleno = 33 (0x21), region = 44 }
  0x1b   : > { %s886_s14 = sshll.u32 %s243_s13, 5  ;;  %vm255_vm0 = vcmask (!%p888_p0), 516096   ;;  %v1289_v0 = vmov (!%p888_p0), 0.0  }
  0x1c   : > { %s247_s15 = sadd.s32 %s886_s14, %s1726_s12  ;;  %256 = vst.msk [vmem:[#allocation2] sm:$0x1] (!%p888_p0), %vm255_vm0, %v1289_v0 }
  0x1d   : > { %s887_s16 = sshll.u32 %s247_s15, 2 }
  0x1e   : > { %s1401_s19 = scalar_lea.vmem %s1704_s0, %s887_s16 }
  0x21 PF: > { %v351_v1 = vld [vmem:[%s1707_s3] sm:$0xff]  ;;  %v352_v2 = vld [vmem:[%s1707_s3 + $0x8] sm:$0xff]  ;;  %v353_v3 = vld [vmem:[%s1707_s3 + $0x10] sm:$0xff]  ;;  %vm361_vm1 = vcmask 523264   ;;  %vm786_vm2 = vcmask 516096   ;;  %p923_p1 = scmp.ne.s32.totalorder %s1271_s23, 1 }
  0x22   : > { %v1030_v4 = vpack.c.bf16 %v352_v2, %v351_v1  ;;  %v354_v5 = vld [vmem:[%s1707_s3 + $0x18] sm:$0xff]  ;;  %v355_v7 = vld [vmem:[%s1707_s3 + $0x20] sm:$0xff]  ;;  %v356_v8 = vld [vmem:[%s1707_s3 + $0x28] sm:$0xff] }
  0x23   : > { %v1034_v6 = vpack.c.bf16 %v354_v5, %v353_v3  ;;  %v928_v9 = vld [vmem:[%s1401_s19] sm:$0xff]   ;;  %v959_v13 = vld [vmem:[%s1401_s19 + $0x8] sm:$0xff]   ;;  %v960_v17 = vld [vmem:[%s1401_s19 + $0x10] sm:$0xff]   ;;  %v1038_v19 = vpack.c.bf16 %v356_v8, %v355_v7 }
  0x24   : > { %1031 = vmatprep.subr.bf16.mxu0 %v1030_v4  ;;  %v929_v10 = vunpack.c.l.bf16 %v928_v9  ;;  %v930_v11 = vunpack.c.h.bf16 %v928_v9  ;;  %v1430_v12 = vld [vmem:[%s1705_s1] ss:$0 sm:$0xff]  ;;  %1046 = vmatprep.subr.bf16.mxu1 %v1030_v4  ;;  %v933_v15 = vunpack.c.l.bf16 %v959_v13  ;;  %v934_v16 = vunpack.c.h.bf16 %v959_v13  ;;  %v1440_v18 = vld [vmem:[%s1401_s19 + $0x18] sm:$0xff]   ;;  %v357_v24 = vld [vmem:[%s1707_s3 + $0x30] sm:$0xff] }
  0x25   : > { %1033 = vmatpush3.bf16.msra.mxu0 %v1030_v4  ;;  %v1436_v14 = vld [vmem:[%s1706_s2] ss:$0 sm:$0xff]  ;;  %1050 = vmatpush3.bf16.msra.mxu1 %v1030_v4  ;;  %v937_v22 = vunpack.c.l.bf16 %v960_v17  ;;  %v358_v25 = vld [vmem:[%s1707_s3 + $0x38] sm:$0xff]  ;;  %v938_v27 = vunpack.c.h.bf16 %v960_v17  ;;  %v941_v30 = vunpack.c.l.bf16 %v1440_v18  ;;  %v963_v36 = vld [vmem:[%s1401_s19 + $0x28] sm:$0xff]   ;;  %v942_v39 = vunpack.c.h.bf16 %v1440_v18 }
  0x26   : > { %1035 = vmatprep.subr.bf16.mxu0 %v1034_v6  ;;  %v296_v20 = vmul.f32 %v929_v10, %v1430_v12  ;;  %v297_v21 = vmul.f32 %v930_v11, %v1430_v12  ;;  %1047 = vmatprep.subr.bf16.mxu1 %v1034_v6  ;;  %v962_v23 = vld [vmem:[%s1401_s19 + $0x20] sm:$0xff]   ;;  %v298_v26 = vmul.f32 %v933_v15, %v1430_v12  ;;  %v964_v40 = vld [vmem:[%s1401_s19 + $0x30] sm:$0xff]   ;;  %v965_v45 = vld [vmem:[%s1401_s19 + $0x38] sm:$0xff]   ;;  %v949_v48 = vunpack.c.l.bf16 %v963_v36  ;;  %s359_s19 = sld [smem:[#allocation3]] }
  0x27   : > { %v299_v29 = vmul.f32 %v934_v16, %v1430_v12  ;;  %v300_v32 = vmul.f32 %v937_v22, %v1430_v12  ;;  %v945_v33 = vunpack.c.l.bf16 %v962_v23  ;;  %v1042_v34 = vpack.c.bf16 %v358_v25, %v357_v24 }
  0x28   : > { %v1453_v28 = vadd.f32 %v1436_v14, %v296_v20  ;;  %v1458_v31 = vadd.f32 %v1436_v14, %v297_v21  ;;  %v1464_v37 = vadd.f32 %v1436_v14, %v298_v26  ;;  %v301_v38 = vmul.f32 %v938_v27, %v1430_v12 }
  0x29   : > { %1037 = vmatpush3.bf16.msra.mxu0 %v1034_v6  ;;  %1051 = vmatpush3.bf16.msra.mxu1 %v1034_v6  ;;  %v1473_v41 = vadd.f32 %v1436_v14, %v299_v29  ;;  %v302_v42 = vmul.f32 %v941_v30, %v1430_v12  ;;  %v946_v43 = vunpack.c.h.bf16 %v962_v23  ;;  %v304_v44 = vmul.f32 %v945_v33, %v1430_v12 }
  0x2a   : > { %1039 = vmatprep.subr.bf16.mxu0 %v1038_v19  ;;  %v335_v35 = vmax.f32 %v1453_v28, 0.0  ;;  %1048 = vmatprep.subr.bf16.mxu1 %v1038_v19  ;;  %v336_v46 = vmax.f32 %v1458_v31, 0.0  ;;  %v1480_v47 = vadd.f32 %v1436_v14, %v300_v32  ;;  %v950_v49 = vunpack.c.h.bf16 %v963_v36 }
  0x2b   : > { %v1483_v50 = vadd.f32 %v1436_v14, %v304_v44  ;;  %v305_v51 = vmul.f32 %v946_v43, %v1430_v12  ;;  %v953_v52 = vunpack.c.l.bf16 %v964_v40  ;;  %v954_v53 = vunpack.c.h.bf16 %v964_v40 }
  0x2c   : > { %1006 = vmatprep.mubr.msk.f32.mxu0 %vm361_vm1, %v335_v35  ;;  %v337_v54 = vmax.f32 %v1464_v37, 0.0  ;;  %v306_v55 = vmul.f32 %v949_v48, %v1430_v12  ;;  %v307_v56 = vmul.f32 %v950_v49, %v1430_v12  ;;  %v957_v57 = vunpack.c.l.bf16 %v965_v45 }
  0x2d   : > { %1041 = vmatpush3.bf16.msra.mxu0 %v1038_v19  ;;  %1052 = vmatpush3.bf16.msra.mxu1 %v1038_v19  ;;  %v343_v58 = vmax.f32 %v1483_v50, 0.0  ;;  %v1491_v59 = vadd.f32 %v1436_v14, %v305_v51  ;;  %v308_v60 = vmul.f32 %v953_v52, %v1430_v12  ;;  %v309_v61 = vmul.f32 %v954_v53, %v1430_v12 }
  0x2e   : > { %1043 = vmatprep.subr.bf16.mxu0 %v1042_v34  ;;  %1049 = vmatprep.subr.bf16.mxu1 %v1042_v34  ;;  %v1496_v62 = vadd.f32 %v1436_v14, %v306_v55  ;;  %v1499_v63 = vadd.f32 %v1436_v14, %v307_v56  ;;  %v310_v0 = vmul.f32 %v957_v57, %v1430_v12  ;;  %v958_v1 = vunpack.c.h.bf16 %v965_v45 }
  0x2f   : > { %1018 = vmatprep.mubr.msk.f32.mxu1 %vm361_vm1, %v343_v58  ;;  %v344_v2 = vmax.f32 %v1491_v59, 0.0  ;;  %v1507_v3 = vadd.f32 %v1436_v14, %v308_v60  ;;  %v338_v4 = vmax.f32 %v1473_v41, 0.0  ;;  %v1511_v5 = vadd.f32 %v1436_v14, %v301_v38 }
  0x30   : > { %v345_v6 = vmax.f32 %v1496_v62, 0.0  ;;  %v303_v7 = vmul.f32 %v942_v39, %v1430_v12  ;;  %v346_v8 = vmax.f32 %v1499_v63, 0.0  ;;  %v1523_v9 = vadd.f32 %v1436_v14, %v309_v61 }
  0x31   : > { %1045 = vmatpush3.bf16.msra.mxu0 %v1042_v34  ;;  %1053 = vmatpush3.bf16.msra.mxu1 %v1042_v34  ;;  %v311_v10 = vmul.f32 %v958_v1, %v1430_v12  ;;  %v339_v11 = vmax.f32 %v1480_v47, 0.0  ;;  %v1531_v13 = vadd.f32 %v1436_v14, %v302_v42  ;;  %v347_v15 = vmax.f32 %v1507_v3, 0.0 }
  0x32   : > { %v1538_v16 = vadd.f32 %v1436_v14, %v310_v0  ;;  %v340_v12 = vmax.f32 %v1511_v5, 0.0  ;;  %v1545_v17 = vadd.f32 %v1436_v14, %v303_v7  ;;  %v348_v18 = vmax.f32 %v1523_v9, 0.0 }
  0x33   : > { %v1552_v19 = vadd.f32 %v1436_v14, %v311_v10  ;;  %v341_v20 = vmax.f32 %v1531_v13, 0.0  ;;  %v1290_v23 = vmov 0   ;;  %v1582_v24 = vstv %s359_s19 }
  0x34   : > { %1007 = vmatmul.mubr.msk.f32.vlgmr.msra.gmra.mrb[0].mxu0 %vm361_vm1, %v336_v46  ;;  %1019 = vmatmul.mubr.msk.f32.vlgmr.msra.gmra.mrb[0].mxu1 %vm361_vm1, %v344_v2  ;;  %v349_v21 = vmax.f32 %v1538_v16, 0.0  ;;  %v342_v22 = vmax.f32 %v1545_v17, 0.0 }
  0x35   : > { %1009 = vmatprep.mubr.msk.f32.mxu0 %vm361_vm1, %v337_v54  ;;  %1021 = vmatprep.mubr.msk.f32.mxu1 %vm361_vm1, %v345_v6  ;;  %v350_v14 = vmax.f32 %v1552_v19, 0.0 }
  0x36   : > { %1127 = vset.pattern.permute.xlu0 %v1290_v23  ;;  %1128 = vset.pattern.permute.xlu1 %v1290_v23 }
  0x38   : > { %1010 = vmatmul.mubr.msk.f32.gmra.mrb[2].mxu0 %vm361_vm1, %v338_v4  ;;  %1022 = vmatmul.mubr.msk.f32.gmra.mrb[2].mxu1 %vm361_vm1, %v346_v8 }
  0x39   : > { %1012 = vmatprep.mubr.msk.f32.mxu0 %vm361_vm1, %v339_v11  ;;  %1024 = vmatprep.mubr.msk.f32.mxu1 %vm361_vm1, %v347_v15 }
  0x3c   : > { %1013 = vmatmul.mubr.msk.f32.gmra.mrb[4].mxu0 %vm361_vm1, %v340_v12  ;;  %1025 = vmatmul.mubr.msk.f32.gmra.mrb[4].mxu1 %vm361_vm1, %v348_v18 }
  0x3d   : > { %1015 = vmatprep.mubr.msk.f32.mxu0 %vm361_vm1, %v341_v20  ;;  %1027 = vmatprep.mubr.msk.f32.mxu1 %vm361_vm1, %v349_v21 }
  0x40   : > { %1016 = vmatmul.mubr.msk.f32.gmra.mrb[6].mxu0 %vm361_vm1, %v342_v22  ;;  %1028 = vmatmul.mubr.msk.f32.gmra.mrb[6].mxu1 %vm361_vm1, %v350_v14 }
 0x107   : > { %v1008_v25 = vpop.f32.mrb[0].mxu0  ;;  %v1020_v26 = vpop.f32.mrb[0].mxu1 }
 0x108   : > { %v482_v27 = vadd.f32 %v1008_v25, %v1582_v24  ;;  %v476_v29 = vpop.f32.mrb[1].mxu0  ;;  %v516_v30 = vpop.f32.mrb[1].mxu1  ;;  %v522_v56 = vadd.f32 %v1020_v26, %v1582_v24 }
 0x109   : > { %v477_v32 = vadd.f32 %v476_v29, %v1582_v24  ;;  %v517_v38 = vadd.f32 %v516_v30, %v1582_v24 }
 0x10a   : > { %v908_v33 = vmul.f32 -1.442695, %v482_v27  ;;  %v916_v25 = vmul.f32 -1.442695, %v522_v56 }
 0x10b   : > { %v907_v34 = vmul.f32 -1.442695, %v477_v32  ;;  %v1011_v36 = vpop.f32.mrb[2].mxu0  ;;  %v1023_v39 = vpop.f32.mrb[2].mxu1  ;;  %v915_v51 = vmul.f32 -1.442695, %v517_v38 }
 0x10c   : > { %1129 = vpow2.f32 %v908_v33  ;;  %v492_v40 = vadd.f32 %v1011_v36, %v1582_v24  ;;  %v486_v42 = vpop.f32.mrb[3].mxu0  ;;  %v526_v43 = vpop.f32.mrb[3].mxu1  ;;  %v532_v36 = vadd.f32 %v1023_v39, %v1582_v24 }
 0x10d   : > { %1131 = vpow2.f32 %v907_v34  ;;  %v487_v44 = vadd.f32 %v486_v42, %v1582_v24  ;;  %v527_v27 = vadd.f32 %v526_v43, %v1582_v24 }
 0x10e   : > { %v910_v45 = vmul.f32 -1.442695, %v492_v40 }
 0x10f   : > { %v909_v48 = vmul.f32 -1.442695, %v487_v44  ;;  %v1014_v49 = vpop.f32.mrb[4].mxu0  ;;  %v1026_v52 = vpop.f32.mrb[4].mxu1  ;;  %v917_v40 = vmul.f32 -1.442695, %v527_v27 }
 0x110   : > { %1133 = vpow2.f32 %v910_v45  ;;  %v502_v53 = vadd.f32 %v1014_v49, %v1582_v24  ;;  %v496_v55 = vpop.f32.mrb[5].mxu0  ;;  %v536_v57 = vpop.f32.mrb[5].mxu1 }
 0x111   : > { %1135 = vpow2.f32 %v909_v48  ;;  %v497_v60 = vadd.f32 %v496_v55, %v1582_v24  ;;  %v537_v42 = vadd.f32 %v536_v57, %v1582_v24  ;;  %v918_v48 = vmul.f32 -1.442695, %v532_v36 }
 0x112   : > { %v912_v61 = vmul.f32 -1.442695, %v502_v53  ;;  %1137 = vpow2.f32 %v915_v51  ;;  %v542_v51 = vadd.f32 %v1026_v52, %v1582_v24 }
 0x113   : > { %v911_v0 = vmul.f32 -1.442695, %v497_v60  ;;  %v1017_v1 = vpop.f32.mrb[6].mxu0  ;;  %v1029_v7 = vpop.f32.mrb[6].mxu1  ;;  %v919_v53 = vmul.f32 -1.442695, %v537_v42 }
 0x114   : > { %1139 = vpow2.f32 %v912_v61  ;;  %v512_v10 = vadd.f32 %v1017_v1, %v1582_v24  ;;  %v506_v23 = vpop.f32.mrb[7].mxu0  ;;  %v546_v29 = vpop.f32.mrb[7].mxu1  ;;  %v552_v57 = vadd.f32 %v1029_v7, %v1582_v24 }
 0x115   : > { %1141 = vpow2.f32 %v911_v0  ;;  %v507_v26 = vadd.f32 %v506_v23, %v1582_v24  ;;  %v920_v0 = vmul.f32 -1.442695, %v542_v51 }
 0x116   : > { %v1130_v30 = vpop.eup %1129  ;;  %v914_v32 = vmul.f32 -1.442695, %v512_v10  ;;  %1143 = vpow2.f32 %v916_v25  ;;  %v547_v10 = vadd.f32 %v546_v29, %v1582_v24  ;;  %v922_v27 = vmul.f32 -1.442695, %v552_v57 }
 0x117   : > { %v1132_v33 = vpop.eup %1131  ;;  %v913_v34 = vmul.f32 -1.442695, %v507_v26  ;;  %v604_v44 = vadd.f32 1.0, %v1130_v30 }
 0x118   : > { %v603_v38 = vadd.f32 1.0, %v1132_v33  ;;  %1145 = vpow2.f32 %v914_v32  ;;  %v921_v32 = vmul.f32 -1.442695, %v547_v10 }
 0x11a   : > { %v1134_v45 = vpop.eup %1133  ;;  %1147 = vrcp.f32 %v603_v38 }
 0x11b   : > { %v1136_v43 = vpop.eup %1135  ;;  %1149 = vpow2.f32 %v913_v34  ;;  %v606_v39 = vadd.f32 1.0, %v1134_v45 }
 0x11c   : > { %v605_v49 = vadd.f32 1.0, %v1136_v43  ;;  %1151 = vpow2.f32 %v917_v40  ;;  %v1138_v55 = vpop.eup %1137 }
 0x11d   : > { %1153 = vrcp.f32 %v604_v44  ;;  %v611_v1 = vadd.f32 1.0, %v1138_v55 }
 0x11e   : > { %v1140_v56 = vpop.eup %1139  ;;  %1155 = vrcp.f32 %v605_v49 }
 0x11f   : > { %v1142_v60 = vpop.eup %1141  ;;  %1157 = vpow2.f32 %v918_v48  ;;  %v608_v25 = vadd.f32 1.0, %v1140_v56 }
 0x120   : > { %v607_v61 = vadd.f32 1.0, %v1142_v60  ;;  %1159 = vpow2.f32 %v919_v53  ;;  %v1144_v23 = vpop.eup %1143 }
 0x121   : > { %1161 = vrcp.f32 %v606_v39  ;;  %v612_v29 = vadd.f32 1.0, %v1144_v23 }
 0x122   : > { %1163 = vrcp.f32 %v607_v61  ;;  %v1146_v52 = vpop.eup %1145 }
 0x123   : > { %1165 = vpow2.f32 %v920_v0  ;;  %v610_v7 = vadd.f32 1.0, %v1146_v52 }
 0x124   : > { %v1148_v26 = vpop.eup %1147  ;;  %1167 = vrcp.f32 %v611_v1 }
 0x125   : > { %v1150_v30 = vpop.eup %1149  ;;  %654 = vperm.xlu0 %1127, %v1148_v26   ;;  %1169 = vrcp.f32 %v608_v25 }
 0x126   : > { %v1152_v33 = vpop.eup %1151  ;;  %v609_v34 = vadd.f32 1.0, %v1150_v30  ;;  %1171 = vpow2.f32 %v922_v27 }
 0x127   : > { %v1154_v36 = vpop.eup %1153  ;;  %v613_v42 = vadd.f32 1.0, %v1152_v33 }
 0x128   : > { %v1156_v38 = vpop.eup %1155  ;;  %1173 = vrcp.f32 %v609_v34 }
 0x129   : > { %v1158_v24 = vpop.eup %1157  ;;  %1175 = vpow2.f32 %v921_v32  ;;  %664 = vperm.xlu1 %1128, %v1156_v38   ;;  %659 = vperm.xlu0 %1127, %v1154_v36  }
 0x12a   : > { %v1160_v40 = vpop.eup %1159  ;;  %1177 = vrcp.f32 %v610_v7  ;;  %v614_v43 = vadd.f32 1.0, %v1158_v24 }
 0x12b   : > { %v1162_v44 = vpop.eup %1161  ;;  %1179 = vrcp.f32 %v612_v29  ;;  %v615_v49 = vadd.f32 1.0, %v1160_v40 }
 0x12c   : > { %v1164_v45 = vpop.eup %1163  ;;  %1181 = vrcp.f32 %v613_v42 }
 0x12d   : > { %669 = vperm.xlu1 %1128, %v1162_v44   ;;  %674 = vperm.xlu0 %1127, %v1164_v45   ;;  %v1166_v48 = vpop.eup %1165  ;;  %1183 = vrcp.f32 %v614_v43 }
 0x12e   : > { %v1168_v51 = vpop.eup %1167  ;;  %v616_v39 = vadd.f32 1.0, %v1166_v48  ;;  %1185 = vrcp.f32 %v615_v49 }
 0x12f   : > { %v1170_v53 = vpop.eup %1169 }
 0x130   : > { %v1172_v55 = vpop.eup %1171  ;;  %1187 = vrcp.f32 %v616_v39 }
 0x131   : > { %679 = vperm.xlu1 %1128, %v1170_v53   ;;  %v618_v0 = vadd.f32 1.0, %v1172_v55 }
 0x132   : > { %v1174_v56 = vpop.eup %1173 }
 0x133   : > { %v1176_v60 = vpop.eup %1175  ;;  %684 = vperm.xlu0 %1127, %v1174_v56  }
 0x134   : > { %v1178_v57 = vpop.eup %1177  ;;  %v617_v61 = vadd.f32 1.0, %v1176_v60 }
 0x135   : > { %689 = vperm.xlu1 %1128, %v1178_v57   ;;  %v1180_v1 = vpop.eup %1179 }
 0x136   : > { %1189 = vrcp.f32 %v617_v61  ;;  %v1182_v10 = vpop.eup %1181 }
 0x137   : > { %694 = vperm.xlu0 %1127, %v1168_v51   ;;  %1191 = vrcp.f32 %v618_v0  ;;  %v1184_v23 = vpop.eup %1183 }
 0x138   : > { %v1186_v25 = vpop.eup %1185 }
 0x139   : > { %699 = vperm.xlu1 %1128, %v1180_v1  }
 0x13a   : > { %v1188_v52 = vpop.eup %1187 }
 0x13b   : > { %704 = vperm.xlu0 %1127, %v1182_v10  }
 0x13d   : > { %709 = vperm.xlu1 %1128, %v1184_v23  }
 0x13f   : > { %714 = vperm.xlu0 %1127, %v1186_v25  }
 0x140   : > { %v1190_v27 = vpop.eup %1189 }
 0x141   : > { %719 = vperm.xlu1 %1128, %v1188_v52   ;;  %v1192_v26 = vpop.eup %1191 }
 0x143   : > { %724 = vperm.xlu0 %1127, %v1190_v27  }
 0x145   : > { %729 = vperm.xlu1 %1128, %v1192_v26  }
 0x1a4   : > { %v655_v30 = vpop.permute.xlu0 %654 }
 0x1a5   : > { %v732_v32 = vmul.f32 %v655_v30, %v335_v35 }
 0x1a7   : > { %v748_v38 = vsel %vm361_vm1, %v732_v32, 0.0 }
 0x1a8   : > { %v665_v33 = vpop.permute.xlu1 %664  ;;  %v660_v7 = vpop.permute.xlu0 %659 }
 0x1a9   : > { %v734_v34 = vmul.f32 %v665_v33, %v337_v54  ;;  %v733_v36 = vmul.f32 %v660_v7, %v336_v46 }
 0x1ab   : > { %v749_v24 = vsel %vm361_vm1, %v733_v36, 0.0  ;;  %v751_v44 = vsel %vm361_vm1, %v734_v34, 0.0 }
 0x1ac   : > { %v750_v29 = vadd.f32 %v749_v24, %v748_v38  ;;  %v670_v40 = vpop.permute.xlu1 %669  ;;  %v675_v42 = vpop.permute.xlu0 %674 }
 0x1ad   : > { %v735_v28 = vmul.f32 %v670_v40, %v338_v4  ;;  %v736_v35 = vmul.f32 %v675_v42, %v339_v11 }
 0x1ae   : > { %v752_v37 = vadd.f32 %v751_v44, %v750_v29  ;;  %v651_v29 = vld [vmem:[#allocation2] sm:$0x1] }
 0x1af   : > { %v753_v54 = vsel %vm361_vm1, %v735_v28, 0.0  ;;  %v755_v45 = vsel %vm361_vm1, %v736_v35, 0.0 }
 0x1b0   : > { %v754_v31 = vadd.f32 %v753_v54, %v752_v37  ;;  %v680_v46 = vpop.permute.xlu1 %679 }
 0x1b1   : > { %v737_v43 = vmul.f32 %v680_v46, %v340_v12 }
 0x1b2   : > { %v756_v48 = vadd.f32 %v755_v45, %v754_v31  ;;  %v685_v49 = vpop.permute.xlu0 %684 }
 0x1b3   : > { %v757_v51 = vsel %vm361_vm1, %v737_v43, 0.0  ;;  %v738_v41 = vmul.f32 %v685_v49, %v341_v20 }
 0x1b4   : > { %v758_v4 = vadd.f32 %v757_v51, %v756_v48  ;;  %v690_v47 = vpop.permute.xlu1 %689 }
 0x1b5   : > { %v759_v11 = vsel %vm361_vm1, %v738_v41, 0.0  ;;  %v739_v53 = vmul.f32 %v690_v47, %v342_v22 }
 0x1b6   : > { %v760_v55 = vadd.f32 %v759_v11, %v758_v4  ;;  %v695_v39 = vpop.permute.xlu0 %694 }
 0x1b7   : > { %v761_v56 = vsel %vm361_vm1, %v739_v53, 0.0  ;;  %v740_v5 = vmul.f32 %v695_v39, %v343_v58 }
 0x1b8   : > { %v762_v12 = vadd.f32 %v761_v56, %v760_v55  ;;  %v700_v60 = vpop.permute.xlu1 %699 }
 0x1b9   : > { %v763_v57 = vsel %vm361_vm1, %v740_v5, 0.0  ;;  %v741_v13 = vmul.f32 %v700_v60, %v344_v2 }
 0x1ba   : > { %v764_v20 = vadd.f32 %v763_v57, %v762_v12  ;;  %v705_v61 = vpop.permute.xlu0 %704 }
 0x1bb   : > { %v765_v0 = vsel %vm361_vm1, %v741_v13, 0.0  ;;  %v742_v17 = vmul.f32 %v705_v61, %v345_v6 }
 0x1bc   : > { %v766_v22 = vadd.f32 %v765_v0, %v764_v20  ;;  %v710_v1 = vpop.permute.xlu1 %709 }
 0x1bd   : > { %v767_v10 = vsel %vm361_vm1, %v742_v17, 0.0  ;;  %v743_v50 = vmul.f32 %v710_v1, %v346_v8 }
 0x1be   : > { %v768_v58 = vadd.f32 %v767_v10, %v766_v22  ;;  %v715_v23 = vpop.permute.xlu0 %714 }
 0x1bf   : > { %v769_v25 = vsel %vm361_vm1, %v743_v50, 0.0  ;;  %v744_v59 = vmul.f32 %v715_v23, %v347_v15 }
 0x1c0   : > { %v770_v2 = vadd.f32 %v769_v25, %v768_v58  ;;  %v720_v52 = vpop.permute.xlu1 %719 }
 0x1c1   : > { %v771_v27 = vsel %vm361_vm1, %v744_v59, 0.0  ;;  %v745_v62 = vmul.f32 %v720_v52, %v348_v18 }
 0x1c2   : > { %v772_v6 = vadd.f32 %v771_v27, %v770_v2  ;;  %v725_v26 = vpop.permute.xlu0 %724 }
 0x1c3   : > { %v773_v30 = vsel %vm361_vm1, %v745_v62, 0.0  ;;  %v746_v63 = vmul.f32 %v725_v26, %v349_v21 }
 0x1c4   : > { %v774_v8 = vadd.f32 %v773_v30, %v772_v6  ;;  %v730_v32 = vpop.permute.xlu1 %729 }
 0x1c5   : > { %v775_v33 = vsel %vm361_vm1, %v746_v63, 0.0  ;;  %v747_v3 = vmul.f32 %v730_v32, %v350_v14 }
 0x1c6   : > { %v776_v15 = vadd.f32 %v775_v33, %v774_v8 }
 0x1c7   : > { %v777_v7 = vsel %vm361_vm1, %v747_v3, 0.0 }
 0x1c8   : > { %v778_v34 = vadd.f32 %v777_v7, %v776_v15 }
 0x1ca   : > { %v779_v9 = vrot.slane %v778_v34, 4 }
 0x1cc   : > { %v780_v18 = vadd.f32 %v779_v9, %v778_v34 }
 0x1ce   : > { %v781_v36 = vrot.slane %v780_v18, 2 }
 0x1d0   : > { %v782_v38 = vadd.f32 %v781_v36, %v780_v18 }
 0x1d2   : > { %v783_v24 = vrot.slane %v782_v38, 1  ;;  %791 = sbr.rel (%p923_p1) target bundleno = 483 (0x1e3), region = 48 }
 0x1d4   : > { %v784_v40 = vadd.f32 %v783_v24, %v782_v38 }
 0x1d6   : > { %v785_v16 = vadd.f32 %v784_v40, %v651_v29 }
 0x1d8   : > { %787 = vst.msk [vmem:[#allocation2] sm:$0x1] %vm786_vm2, %v785_v16 }
 0x1df   : > { %v792_v21 = vld [vmem:[#allocation2] sm:$0x1] }
 0x1e0   : > { %v793_v19 = vmul.f32 0.00390625, %v792_v21 }
 0x1e2   : > { %794 = vst.msk [vmem:[%s1405_s4] sm:$0x1] %vm786_vm2, %v793_v19 }
 0x1e3 PF: > { %s924_s28 = sshll.u32 %s1275_s24, 4  ;;  %s808_s13 = sshll.u32 %s1405_s4, 4  ;;  %s809_s13 = int_to_ptr.vmem [resolvable:$true] %s808_s13 }
 0x1e4   : > { %s1654_s12 = scalar_lea.hbm %s1709_s5, %s924_s28  ;;  %s796_s23 = scalar_lea.sflag [#allocation5], %s239_s11 }
 0x1e5   : > { %s1193_s14 = scalar_lea.vmem %s809_s13, 16  ;;  %s1291_s15 = smov [#allocation4]  }
 0x1e6   : > { %p1194_p2 = scmp.ne.s32.totalorder %s809_s13, %s1193_s14  ;;  %s1197_s16 = sshll.u32 %s1291_s15, 4  ;;  %s1198_s16 = int_to_ptr.vmem [resolvable:$false] %s1197_s16 }
 0x1e7   : > { %s1199_s17 = scalar_lea.vmem %s1198_s16, 32  ;;  %p1200_p6 = scmp.lt.s32.totalorder %s809_s13, %s1198_s16 }
 0x1e8   : > { %p1195_p4 = pnand %p1194_p2, %p1374_p3  ;;  %p1201_p7 = scmp.lt.s32.totalorder %s1199_s17, %s1193_s14 }
 0x1ea   : > { %p1196_p5 = pneg %p1195_p4  ;;  %p1202_p8 = por %p1201_p7, %p1200_p6 }
 0x1ec   : > { %p1203_p10 = pnand %p1202_p8, %p1196_p5 }
 0x1ee   : > { %1206 = shalt.err (!%p1203_p10)
}
 0x1ef   : > { %s1207_s24 = scalar_lea.hbm %s1654_s12, 16  ;;  %s1211_s18 = scalar_lea.hbm %s1709_s5, 32 }
 0x1f0   : > { %p1208_p11 = scmp.ne.s32.totalorder %s1654_s12, %s1207_s24  ;;  %p1212_p0 = scmp.lt.u32.totalorder %s1654_s12, %s1709_s5 }
 0x1f1   : > { %p1213_p1 = scmp.lt.u32.totalorder %s1211_s18, %s1207_s24  ;;  %p1215_p4 = scmp.lt.u32.totalorder %s1207_s24, %s1654_s12 }
 0x1f2   : > { %p1209_p12 = pnand %p1208_p11, %p1374_p3 }
 0x1f3   : > { %p1214_p2 = por %p1213_p1, %p1212_p0 }
 0x1f4   : > { %p1210_p13 = pneg %p1209_p12 }
 0x1f5   : > { %p1216_p5 = por %p1215_p4, %p1214_p2 }
 0x1f7   : > { %p1217_p6 = pnand %p1216_p5, %p1210_p13 }
 0x1f9   : > { %1220 = shalt.err (!%p1217_p6)
}
 0x1fa   : > { %1054 = dma.vmem_to_hbm [thread:$0]  (%p1374_p3), %s809_s13, 16, %s1654_s12, %s796_s23  }
 0x1fb PF: > { %p1060_p7 = scmp.ge.s32.totalorder %s1287_s27, 2  ;;  %s820_s8 = sand.u32 1, %s1259_s20  }
 0x1fc   : > { %s821_s9 = scalar_lea.sflag [#allocation5], %s820_s8 }
 0x1fd   : > { %p1057_p8 = pnand %p1060_p7, %p1384_p9 }
 0x1ff   : > { %1254 = dma.done.wait (!%p1057_p8), %s821_s9, 16  }
 0x200   : > { %1256 = vsyncadd (!%p1057_p8), %s821_s9, 4294967280  ;;  %s19_s27 = sadd.s32 1, %s1287_s27   ;;  %s1712_s20 = smov %s1263_s21 }
 0x201   : > { %p16_p10 = scmp.ge.s32.totalorder %s19_s27, 6   ;;  %s1713_s21 = smov %s1267_s22 }
 0x202   : > { %s1714_s22 = smov %s1392_s10  ;;  %s1715_s23 = smov %s1279_s25 }
 0x203   : > { %s1716_s24 = smov %s1283_s26  ;;  %s1717_s25 = smov %s1720_s29 }
 0x204   : > { %s1718_s26 = smov %s1724_s30  ;;  %18 = sbr.rel (!%p16_p10) target bundleno = 7 (0x7), region = 83 }
 0x20b   :  { %825 = vsyncpa [#allocation5], 1 }
 0x20c   :  { %827 = vsyncpa [#allocation5 + $0x1], 1 }

// kernel: densenet_cxr_bottom.6
= control target key start
LH: loop header
LB: loop body
LE: loop exit
PB: predicated region body
PF: predicated region fallthrough
CT: control target
= control target key end

     0   :  { %s4448_s21 = smov 0   ;;  %s5536_s0 = inlined_call_operand.vmem [shape: bf16[2,18,18,48], index: 0, kind: input, shape index: {}]   ;;  %s5537_s1 = inlined_call_operand.vmem [shape: bf16[9,48,16], index: 1, kind: input, shape index: {}]   ;;  %s5538_s2 = inlined_call_operand.vmem [shape: f32[1,48], index: 2, kind: input, shape index: {}]   ;;  %s5539_s3 = inlined_call_operand.vmem [shape: f32[1,48], index: 3, kind: input, shape index: {}]   ;;  %s5540_s4 = inlined_call_operand.vmem [shape: f32[1,16], index: 4, kind: input, shape index: {}]   ;;  %s5541_s5 = inlined_call_operand.vmem [shape: f32[1,16], index: 5, kind: input, shape index: {}]   ;;  %s5542_s6 = inlined_call_operand.vmem [shape: bf16[2,256,16], index: 6, kind: output, shape index: {}]  }
   0x1 LB: > { %s3251_s22 = sadd.s32 4294967295, %s4409_s21   ;;  %p3255_p0 = scmp.ge.s32.totalorder %s4409_s21, 1  ;;  %s4409_s21 = sphi %s4448_s21, %s16_s21  }
   0x2   : > { %p212_p1 = scmp.lt.s32.totalorder %s4409_s21, 3 }
   0x4   : > { %p213_p2 = pnand %p3255_p0, %p212_p1 }
   0x6   : > { %216 = sbr.rel (%p213_p2) target bundleno = 554 (0x22a), region = 44 }
   0xd   : > { %v4371_v0 = vld [vmem:[%s5537_s1 + $0x18] sm:$0xff]   ;;  %v4372_v1 = vld [vmem:[%s5537_s1 + $0x60] sm:$0xff]   ;;  %v5543_v2 = vmov 0.0   ;;  %v537_v4 = vlaneseq  ;;  %vm837_vm0 = vcmask 392192   ;;  %v4374_v6 = vld [vmem:[%s5537_s1 + $0x68] sm:$0xff]   ;;  %p242_p3 = scmp.lt.s32.totalorder %s3251_s22, 1 }
   0xe   : > { %v684_v3 = vrot.slane %v5543_v2, 1  ;;  %3756 = vmatprep.subr.bf16.mxu1 %v4371_v0  ;;  %v4373_v5 = vld [vmem:[%s5537_s1 + $0x20] sm:$0xff]   ;;  %3908 = vmatprep.subr.bf16.mxu0 %v4372_v1  ;;  %v4375_v8 = vld [vmem:[%s5537_s1 + $0x28] sm:$0xff]   ;;  %v4376_v9 = vld [vmem:[%s5537_s1 + $0x70] sm:$0xff]   ;;  %vm683_vm3 = vcmask 1046528   ;;  %vm1274_vm4 = vcmask 1045504  }
   0xf   : > { %3757 = vmatpush3.bf16.msra.mxu1 %v4371_v0  ;;  %3909 = vmatpush3.bf16.msra.mxu0 %v4372_v1  ;;  %v4479_v10 = vshrl.u32 %v537_v4, 7  ;;  %s5596_s22 = smov (!%p242_p3, %s3251_s22), 1  ;;  %v4490_v12 = vld [vmem:[%s5537_s1] sm:$0xff]   ;;  %v4495_v13 = vld [vmem:[%s5537_s1 + $0x78] sm:$0xff]   ;;  %vm3163_vm5 = vcmask 125952  }
  0x10   : > { %v4469_v7 = vpack.c.bf16 %v684_v3, %v684_v3  ;;  %3758 = vmatprep.subr.bf16.mxu1 %v4373_v5  ;;  %3910 = vmatprep.subr.bf16.mxu0 %v4374_v6  ;;  %s4360_s9 = smul.u32 216, %s5596_s22  ;;  %v4505_v14 = vld [vmem:[%s5538_s2] ss:$0 sm:$0xff]  ;;  %s3512_s4 = sshll.u32 %s5596_s22, 7 }
  0x11   : > { %v4484_v11 = vadd.s32 16, %v4479_v10  ;;  %vm541_vm1 = vcmp.ge.s32.totalorder %v4479_v10, 1  ;;  %v4519_v25 = vld [vmem:[%s5539_s3] ss:$0 sm:$0xff]  ;;  %s5467_s24 = scalar_lea.vmem %s5542_s6, %s3512_s4 }
  0x12   : > { %5565 = vst [vmem:[#allocation2_spill] sm:$0xff] %v4469_v7  ;;  %3762 = vmatprep.mubr.msk.bf16.mxu1 %vm837_vm0, %v4469_v7  ;;  %s4500_s16 = scalar_lea.vmem %s5536_s0, %s4360_s9 }
  0x13   : > { %3759 = vmatpush3.bf16.msra.mxu1 %v4373_v5  ;;  %3911 = vmatpush3.bf16.msra.mxu0 %v4374_v6  ;;  %v256_v15 = vld [vmem:[%s4500_s16 + $0xc] sm:$0xff]   ;;  %v258_v16 = vld [vmem:[%s4500_s16 + $0x14] sm:$0x1]  ;;  %vm552_vm2 = vcmp.le.s32.totalorder %v4484_v11, 16  ;;  %v3577_v17 = vld [vmem:[%s4500_s16 + $0x18] sm:$0xff]  }
  0x14   : > { %3760 = vmatprep.subr.bf16.mxu1 %v4375_v8  ;;  %3912 = vmatprep.subr.bf16.mxu0 %v4376_v9  ;;  %v310_v18 = vunpack.c.l.bf16 %v256_v15  ;;  %v311_v19 = vunpack.c.h.bf16 %v256_v15  ;;  %v312_v20 = vunpack.c.l.bf16 %v258_v16  ;;  %v3547_v21 = vunpack.c.l.bf16 %v3577_v17  ;;  %v261_v22 = vld [vmem:[%s4500_s16 + $0x20] sm:$0x1]  ;;  %v262_v23 = vld [vmem:[%s4500_s16 + $0x24] sm:$0xff]   ;;  %v264_v24 = vld [vmem:[%s4500_s16 + $0x2c] sm:$0x1] }
  0x15   : > { %v3548_v26 = vunpack.c.h.bf16 %v3577_v17  ;;  %v315_v27 = vunpack.c.l.bf16 %v261_v22  ;;  %v316_v28 = vunpack.c.l.bf16 %v262_v23  ;;  %v317_v29 = vunpack.c.h.bf16 %v262_v23  ;;  %v3578_v3 = vld [vmem:[%s4500_s16 + $0x30] sm:$0xff]   ;;  %v268_v15 = vld [vmem:[%s4500_s16 + $0x3c] sm:$0xff]  }
  0x16   : > { %v371_v30 = vmul.f32 %v4505_v14, %v310_v18  ;;  %v372_v31 = vmul.f32 %v4505_v14, %v311_v19  ;;  %v373_v32 = vmul.f32 %v4505_v14, %v312_v20  ;;  %v374_v33 = vmul.f32 %v3547_v21, %v4505_v14  ;;  %v292_v7 = vld [vmem:[%s4500_s16 + $0x9c] sm:$0xff]  }
  0x17   : > { %3761 = vmatpush3.bf16.msra.mxu1 %v4375_v8  ;;  %3913 = vmatpush3.bf16.msra.mxu0 %v4376_v9  ;;  %v375_v34 = vmul.f32 %v3548_v26, %v4505_v14  ;;  %v376_v35 = vmul.f32 %v4505_v14, %v315_v27  ;;  %v318_v36 = vunpack.c.l.bf16 %v264_v24  ;;  %v377_v37 = vmul.f32 %v4505_v14, %v316_v28  ;;  %v267_v9 = vld [vmem:[%s4500_s16 + $0x38] sm:$0x1]  ;;  %v4379_v24 = vld [vmem:[%s5537_s1 + $0x80] sm:$0xff]   ;;  %v4380_v26 = vld [vmem:[%s5537_s1 + $0x8] sm:$0xff]  }
  0x18   : > { %3794 = vmatprep.subr.bf16.mxu1 %v4490_v12  ;;  %3946 = vmatprep.subr.bf16.mxu0 %v4495_v13  ;;  %v432_v38 = vadd.f32 %v4519_v25, %v371_v30  ;;  %v433_v39 = vadd.f32 %v4519_v25, %v372_v31  ;;  %v434_v40 = vadd.f32 %v4519_v25, %v373_v32  ;;  %v3551_v23 = vunpack.c.l.bf16 %v3578_v3  ;;  %v270_v30 = vld [vmem:[%s4500_s16 + $0x44] sm:$0x1] }
  0x19   : > { %v435_v41 = vadd.f32 %v4519_v25, %v374_v33  ;;  %v436_v42 = vadd.f32 %v4519_v25, %v375_v34  ;;  %v437_v43 = vadd.f32 %v4519_v25, %v376_v35  ;;  %v378_v44 = vmul.f32 %v4505_v14, %v317_v29 }
  0x1a   : > { %v379_v45 = vmul.f32 %v4505_v14, %v318_v36  ;;  %v486_v46 = vmax.f32 %v432_v38, 0.0  ;;  %v4537_v47 = vmax.f32 %v433_v39, 0.0  ;;  %v488_v48 = vmax.f32 %v434_v40, 0.0  ;;  %v3579_v36 = vld [vmem:[%s4500_s16 + $0x48] sm:$0xff]  }
  0x1b   : > { %v489_v49 = vmax.f32 %v435_v41, 0.0  ;;  %v4539_v50 = vmax.f32 %v436_v42, 0.0  ;;  %v491_v51 = vmax.f32 %v437_v43, 0.0  ;;  %v438_v52 = vadd.f32 %v4519_v25, %v377_v37  ;;  %v4381_v40 = vld [vmem:[%s5537_s1 + $0x88] sm:$0xff]   ;;  %v4383_v41 = vld [vmem:[%s5537_s1 + $0x10] sm:$0xff]  }
  0x1c   : > { %v439_v53 = vadd.f32 %v4519_v25, %v378_v44  ;;  %v4545_v54 = vsel %vm541_vm1, %v486_v46, 0.0  ;;  %v4549_v55 = vsel %vm552_vm2, %v488_v48, 0.0  ;;  %v690_v56 = vrot.slane %v4537_v47, 1 }
  0x1d   : > { %v4554_v57 = vsel %vm541_vm1, %v489_v49, 0.0  ;;  %v689_v58 = vrot.slane %v4545_v54, 1  ;;  %v692_v59 = vrot.slane %v4549_v55, 1  ;;  %v4560_v60 = vsel %vm552_vm2, %v491_v51, 0.0 }
  0x1e   : > { %v694_v61 = vrot.slane %v4554_v57, 1  ;;  %v695_v62 = vrot.slane %v4539_v50, 1  ;;  %v697_v63 = vrot.slane %v4560_v60, 1  ;;  %v1285_v0 = vrot.slane %v4554_v57, 2 }
  0x1f   : > { %v1286_v1 = vrot.slane %v4539_v50, 2  ;;  %v691_v4 = vsel %vm683_vm3, %v689_v58, %v690_v56  ;;  %v693_v5 = vsel %vm683_vm3, %v690_v56, %v692_v59  ;;  %v1288_v6 = vrot.slane %v4560_v60, 2  ;;  %v273_v58 = vld [vmem:[%s4500_s16 + $0x50] sm:$0x1] }
  0x20   : > { %v440_v8 = vadd.f32 %v4519_v25, %v379_v45  ;;  %v797_v16 = vpack.c.bf16 %v693_v5, %v691_v4  ;;  %v696_v17 = vsel %vm683_vm3, %v694_v61, %v695_v62  ;;  %v698_v18 = vsel %vm683_vm3, %v695_v62, %v697_v63  ;;  %v4631_v59 = vld [vmem:[%s5537_s1 + $0x30] sm:$0xff]  }
  0x21   : > { %v492_v19 = vmax.f32 %v438_v52, 0.0  ;;  %v4576_v20 = vpack.c.bf16 %v698_v18, %v696_v17  ;;  %v4578_v21 = vmax.f32 %v439_v53, 0.0  ;;  %v3552_v28 = vunpack.c.h.bf16 %v3578_v3 }
  0x22   : > { %v494_v22 = vmax.f32 %v440_v8, 0.0  ;;  %3763 = vmatmul.mubr.msk.bf16.vlgmr.msra.gmra.mrb[0].mxu1 %vm837_vm0, %v797_v16  ;;  %3914 = vmatprep.mubr.msk.bf16.mxu0 %vm837_vm0, %v797_v16  ;;  %v321_v29 = vunpack.c.l.bf16 %v267_v9  ;;  %v322_v31 = vunpack.c.l.bf16 %v268_v15  ;;  %v380_v35 = vmul.f32 %v3551_v23, %v4505_v14 }
  0x23   : > { %5566 = vst [vmem:[#allocation3_spill] sm:$0xff] %v4576_v20  ;;  %v4590_v27 = vsel %vm541_vm1, %v492_v19, 0.0  ;;  %3795 = vmatpush3.bf16.msra.mxu1 %v4490_v12  ;;  %3915 = vmatmul.mubr.msk.bf16.vlgmr.msra.gmra.mrb[0].mxu0 %vm837_vm0, %v4576_v20  ;;  %v700_v34 = vrot.slane %v4578_v21, 1  ;;  %v381_v37 = vmul.f32 %v3552_v28, %v4505_v14  ;;  %v323_v39 = vunpack.c.h.bf16 %v268_v15  ;;  %v4646_v15 = vld [vmem:[%s5537_s1 + $0x90] sm:$0xff]  }
  0x24   : > { %v4598_v32 = vsel %vm552_vm2, %v494_v22, 0.0  ;;  %v699_v33 = vrot.slane %v4590_v27, 1  ;;  %3947 = vmatpush3.bf16.msra.mxu0 %v4495_v13  ;;  %3766 = vmatprep.mubr.msk.bf16.mxu1 %vm837_vm0, %v4576_v20  ;;  %v382_v38 = vmul.f32 %v4505_v14, %v321_v29  ;;  %v441_v42 = vadd.f32 %v4519_v25, %v380_v35  ;;  %v274_v28 = vld [vmem:[%s4500_s16 + $0x54] sm:$0xff]   ;;  %v276_v29 = vld [vmem:[%s4500_s16 + $0x5c] sm:$0x1] }
  0x25   : > { %v702_v12 = vrot.slane %v4598_v32, 1  ;;  %3948 = vmatprep.subr.bf16.mxu0 %v4379_v24  ;;  %v324_v43 = vunpack.c.l.bf16 %v270_v30  ;;  %v383_v44 = vmul.f32 %v4505_v14, %v322_v31  ;;  %3796 = vmatprep.subr.bf16.mxu1 %v4380_v26  ;;  %v442_v46 = vadd.f32 %v4519_v25, %v381_v37  ;;  %v300_v20 = vld [vmem:[%s4500_s16 + $0xbc] sm:$0x1] }
  0x26   : > { %v701_v13 = vsel %vm683_vm3, %v699_v33, %v700_v34  ;;  %v443_v48 = vadd.f32 %v4519_v25, %v382_v38  ;;  %v384_v49 = vmul.f32 %v4505_v14, %v323_v39  ;;  %v495_v52 = vmax.f32 %v441_v42, 0.0  ;;  %v3580_v38 = vld [vmem:[%s4500_s16 + $0x60] sm:$0xff]  }
  0x27   : > { %v703_v45 = vsel %vm683_vm3, %v700_v34, %v702_v12  ;;  %v385_v53 = vmul.f32 %v4505_v14, %v324_v43  ;;  %v444_v56 = vadd.f32 %v4519_v25, %v383_v44  ;;  %3797 = vmatpush3.bf16.msra.mxu1 %v4380_v26  ;;  %v4633_v61 = vmax.f32 %v442_v46, 0.0  ;;  %v279_v46 = vld [vmem:[%s4500_s16 + $0x68] sm:$0x1] }
  0x28   : > { %v4623_v51 = vpack.c.bf16 %v703_v45, %v701_v13  ;;  %v497_v62 = vmax.f32 %v443_v48, 0.0  ;;  %3949 = vmatpush3.bf16.msra.mxu0 %v4379_v24  ;;  %v445_v63 = vadd.f32 %v4519_v25, %v384_v49  ;;  %v3555_v3 = vunpack.c.l.bf16 %v3579_v36  ;;  %3798 = vmatprep.subr.bf16.mxu1 %v4383_v41 }
  0x29   : > { %v4640_v4 = vsel %vm541_vm1, %v495_v52, 0.0  ;;  %v446_v5 = vadd.f32 %v4519_v25, %v385_v53  ;;  %v498_v8 = vmax.f32 %v444_v56, 0.0  ;;  %v3556_v9 = vunpack.c.h.bf16 %v3579_v36  ;;  %3950 = vmatprep.subr.bf16.mxu0 %v4381_v40 }
  0x2a   : > { %5567 = vst [vmem:[#allocation4_spill] sm:$0xff] %v4623_v51  ;;  %3918 = vmatprep.mubr.msk.bf16.mxu0 %vm837_vm0, %v4623_v51  ;;  %3767 = vmatmul.mubr.msk.bf16.gmra.mrb[4].mxu1 %vm837_vm0, %v4623_v51  ;;  %v4652_v16 = vsel %vm552_vm2, %v497_v62, 0.0  ;;  %v704_v17 = vrot.slane %v4640_v4, 1  ;;  %v705_v18 = vrot.slane %v4633_v61, 1  ;;  %v4656_v19 = vmax.f32 %v445_v63, 0.0 }
  0x2b   : > { %v707_v22 = vrot.slane %v4652_v16, 1  ;;  %v500_v23 = vmax.f32 %v446_v5, 0.0  ;;  %v4661_v24 = vsel %vm541_vm1, %v498_v8, 0.0  ;;  %v327_v26 = vunpack.c.l.bf16 %v273_v58  ;;  %3799 = vmatpush3.bf16.msra.mxu1 %v4383_v41 }
  0x2c   : > { %v706_v30 = vsel %vm683_vm3, %v704_v17, %v705_v18  ;;  %v709_v31 = vrot.slane %v4661_v24, 1  ;;  %v710_v33 = vrot.slane %v4656_v19, 1  ;;  %v386_v34 = vmul.f32 %v3555_v3, %v4505_v14  ;;  %3951 = vmatpush3.bf16.msra.mxu0 %v4381_v40  ;;  %3832 = vmatprep.subr.bf16.mxu1 %v4631_v59 }
  0x2d   : > { %v708_v35 = vsel %vm683_vm3, %v705_v18, %v707_v22  ;;  %v4673_v36 = vsel %vm552_vm2, %v500_v23, 0.0  ;;  %v387_v12 = vmul.f32 %v3556_v9, %v4505_v14  ;;  %v388_v37 = vmul.f32 %v4505_v14, %v327_v26  ;;  %3984 = vmatprep.subr.bf16.mxu0 %v4646_v15 }
  0x2e   : > { %v4679_v39 = vpack.c.bf16 %v708_v35, %v706_v30  ;;  %v711_v40 = vsel %vm683_vm3, %v709_v31, %v710_v33  ;;  %v712_v41 = vrot.slane %v4673_v36, 1  ;;  %v447_v13 = vadd.f32 %v4519_v25, %v386_v34 }
  0x2f   : > { %v448_v42 = vadd.f32 %v4519_v25, %v387_v12  ;;  %v449_v43 = vadd.f32 %v4519_v25, %v388_v37  ;;  %v328_v44 = vunpack.c.l.bf16 %v274_v28  ;;  %v329_v45 = vunpack.c.h.bf16 %v274_v28 }
  0x30   : > { %5568 = vst [vmem:[#allocation5_spill] sm:$0xff] %v4679_v39  ;;  %3919 = vmatmul.mubr.msk.bf16.gmra.mrb[4].mxu0 %vm837_vm0, %v4679_v39  ;;  %3770 = vmatprep.mubr.msk.bf16.mxu1 %vm837_vm0, %v4679_v39  ;;  %v713_v48 = vsel %vm683_vm3, %v710_v33, %v712_v41  ;;  %v501_v49 = vmax.f32 %v447_v13, 0.0  ;;  %v330_v52 = vunpack.c.l.bf16 %v276_v29  ;;  %v3559_v53 = vunpack.c.l.bf16 %v3580_v38  ;;  %v280_v41 = vld [vmem:[%s4500_s16 + $0x6c] sm:$0xff]  }
  0x31   : > { %v4692_v56 = vpack.c.bf16 %v713_v48, %v711_v40  ;;  %v4694_v58 = vmax.f32 %v448_v42, 0.0  ;;  %v503_v62 = vmax.f32 %v449_v43, 0.0  ;;  %v389_v63 = vmul.f32 %v4505_v14, %v328_v44 }
  0x32   : > { %v4699_v3 = vsel %vm541_vm1, %v501_v49, 0.0  ;;  %v390_v5 = vmul.f32 %v4505_v14, %v329_v45  ;;  %v391_v8 = vmul.f32 %v4505_v14, %v330_v52  ;;  %v3560_v9 = vunpack.c.h.bf16 %v3580_v38  ;;  %v282_v45 = vld [vmem:[%s4500_s16 + $0x74] sm:$0x1] }
  0x33   : > { %5569 = vst [vmem:[#allocation6_spill] sm:$0xff] %v4692_v56  ;;  %3771 = vmatmul.mubr.msk.bf16.gmra.mrb[8].mxu1 %vm837_vm0, %v4692_v56  ;;  %3922 = vmatprep.mubr.msk.bf16.mxu0 %vm837_vm0, %v4692_v56  ;;  %v4709_v17 = vsel %vm552_vm2, %v503_v62, 0.0  ;;  %v714_v18 = vrot.slane %v4699_v3, 1  ;;  %v715_v22 = vrot.slane %v4694_v58, 1  ;;  %v450_v23 = vadd.f32 %v4519_v25, %v389_v63 }
  0x34   : > { %v717_v26 = vrot.slane %v4709_v17, 1  ;;  %v451_v28 = vadd.f32 %v4519_v25, %v390_v5  ;;  %v452_v29 = vadd.f32 %v4519_v25, %v391_v8  ;;  %v333_v30 = vunpack.c.l.bf16 %v279_v46 }
  0x35   : > { %v716_v31 = vsel %vm683_vm3, %v714_v18, %v715_v22  ;;  %v504_v33 = vmax.f32 %v450_v23, 0.0  ;;  %v392_v34 = vmul.f32 %v3559_v53, %v4505_v14  ;;  %v393_v35 = vmul.f32 %v3560_v9, %v4505_v14 }
  0x36   : > { %v718_v12 = vsel %vm683_vm3, %v715_v22, %v717_v26  ;;  %v4721_v37 = vmax.f32 %v451_v28, 0.0  ;;  %v506_v38 = vmax.f32 %v452_v29, 0.0  ;;  %v394_v40 = vmul.f32 %v4505_v14, %v333_v30 }
  0x37   : > { %v4725_v13 = vpack.c.bf16 %v718_v12, %v716_v31  ;;  %v4729_v42 = vsel %vm541_vm1, %v504_v33, 0.0  ;;  %v453_v43 = vadd.f32 %v4519_v25, %v392_v34  ;;  %v454_v44 = vadd.f32 %v4519_v25, %v393_v35 }
  0x38   : > { %v4736_v46 = vsel %vm552_vm2, %v506_v38, 0.0  ;;  %v719_v48 = vrot.slane %v4729_v42, 1  ;;  %v720_v49 = vrot.slane %v4721_v37, 1  ;;  %v455_v52 = vadd.f32 %v4519_v25, %v394_v40 }
  0x39   : > { %5570 = vst [vmem:[#allocation7_spill] sm:$0xff] %v4725_v13  ;;  %3923 = vmatmul.mubr.msk.bf16.gmra.mrb[8].mxu0 %vm837_vm0, %v4725_v13  ;;  %3774 = vmatprep.mubr.msk.bf16.mxu1 %vm837_vm0, %v4725_v13  ;;  %v722_v53 = vrot.slane %v4736_v46, 1  ;;  %v507_v62 = vmax.f32 %v453_v43, 0.0  ;;  %v4746_v63 = vmax.f32 %v454_v44, 0.0  ;;  %v334_v5 = vunpack.c.l.bf16 %v280_v41 }
  0x3a   : > { %v721_v8 = vsel %vm683_vm3, %v719_v48, %v720_v49  ;;  %v509_v9 = vmax.f32 %v455_v52, 0.0  ;;  %v335_v18 = vunpack.c.h.bf16 %v280_v41  ;;  %v336_v22 = vunpack.c.l.bf16 %v282_v45 }
  0x3b   : > { %v723_v23 = vsel %vm683_vm3, %v720_v49, %v722_v53  ;;  %v4752_v26 = vsel %vm541_vm1, %v507_v62, 0.0  ;;  %v725_v28 = vrot.slane %v4746_v63, 1  ;;  %v395_v29 = vmul.f32 %v4505_v14, %v334_v5  ;;  %v3581_v62 = vld [vmem:[%s4500_s16 + $0x78] sm:$0xff]  }
  0x3c   : > { %v4756_v30 = vpack.c.bf16 %v723_v23, %v721_v8  ;;  %v4760_v31 = vsel %vm552_vm2, %v509_v9, 0.0  ;;  %v724_v33 = vrot.slane %v4752_v26, 1  ;;  %v396_v34 = vmul.f32 %v4505_v14, %v335_v18  ;;  %v285_v18 = vld [vmem:[%s4500_s16 + $0x80] sm:$0x1] }
  0x3d   : > { %v727_v35 = vrot.slane %v4760_v31, 1  ;;  %v397_v12 = vmul.f32 %v4505_v14, %v336_v22  ;;  %v456_v38 = vadd.f32 %v4519_v25, %v395_v29  ;;  %v1280_v40 = vrot.slane %v4545_v54, 2  ;;  %v286_v22 = vld [vmem:[%s4500_s16 + $0x84] sm:$0xff]  }
  0x3e   : > { %5571 = vst [vmem:[#allocation8_spill] sm:$0xff] %v4756_v30  ;;  %3775 = vmatmul.mubr.msk.bf16.gmra.mrb[12].mxu1 %vm837_vm0, %v4756_v30  ;;  %3926 = vmatprep.mubr.msk.bf16.mxu0 %vm837_vm0, %v4756_v30  ;;  %v726_v41 = vsel %vm683_vm3, %v724_v33, %v725_v28  ;;  %v457_v43 = vadd.f32 %v4519_v25, %v396_v34  ;;  %v1281_v44 = vrot.slane %v4537_v47, 2  ;;  %v1283_v45 = vrot.slane %v4549_v55, 2  ;;  %v294_v30 = vld [vmem:[%s4500_s16 + $0xa4] sm:$0x1] }
  0x3f   : > { %v728_v48 = vsel %vm683_vm3, %v725_v28, %v727_v35  ;;  %v458_v49 = vadd.f32 %v4519_v25, %v397_v12  ;;  %v510_v52 = vmax.f32 %v456_v38, 0.0  ;;  %v1287_v53 = vsel %vm1274_vm4, %v1285_v0, %v1286_v1  ;;  %v288_v38 = vld [vmem:[%s4500_s16 + $0x8c] sm:$0x1] }
  0x40   : > { %v4784_v5 = vpack.c.bf16 %v728_v48, %v726_v41  ;;  %v4786_v8 = vmax.f32 %v457_v43, 0.0  ;;  %v1282_v9 = vsel %vm1274_vm4, %v1280_v40, %v1281_v44  ;;  %v1284_v55 = vsel %vm1274_vm4, %v1281_v44, %v1283_v45 }
  0x41   : > { %v512_v23 = vmax.f32 %v458_v49, 0.0  ;;  %v4794_v28 = vsel %vm541_vm1, %v510_v52, 0.0  ;;  %v4796_v29 = vpack.c.bf16 %v1284_v55, %v1282_v9  ;;  %v1289_v0 = vsel %vm1274_vm4, %v1286_v1, %v1288_v6 }
  0x42   : > { %5572 = vst [vmem:[#allocation9_spill] sm:$0xff] %v4784_v5  ;;  %3927 = vmatmul.mubr.msk.bf16.gmra.mrb[12].mxu0 %vm837_vm0, %v4784_v5  ;;  %3778 = vmatprep.mubr.msk.bf16.mxu1 %vm837_vm0, %v4784_v5  ;;  %v729_v33 = vrot.slane %v4794_v28, 1  ;;  %v730_v34 = vrot.slane %v4786_v8, 1  ;;  %v4809_v35 = vpack.c.bf16 %v1289_v0, %v1287_v53  ;;  %v3563_v12 = vunpack.c.l.bf16 %v3581_v62 }
  0x43   : > { %v4814_v60 = vsel %vm552_vm2, %v512_v23, 0.0  ;;  %3952 = vmatprep.mubr.msk.bf16.mxu0 %vm837_vm0, %v4796_v29  ;;  %v3564_v1 = vunpack.c.h.bf16 %v3581_v62  ;;  %v339_v6 = vunpack.c.l.bf16 %v285_v18  ;;  %v340_v40 = vunpack.c.l.bf16 %v286_v22 }
  0x44   : > { %v731_v41 = vsel %vm683_vm3, %v729_v33, %v730_v34  ;;  %v732_v43 = vrot.slane %v4814_v60, 1  ;;  %v398_v44 = vmul.f32 %v3563_v12, %v4505_v14  ;;  %v341_v45 = vunpack.c.h.bf16 %v286_v22 }
  0x45   : > { %v399_v48 = vmul.f32 %v3564_v1, %v4505_v14  ;;  %v400_v49 = vmul.f32 %v4505_v14, %v339_v6  ;;  %v342_v52 = vunpack.c.l.bf16 %v288_v38  ;;  %v401_v53 = vmul.f32 %v4505_v14, %v340_v40  ;;  %v4384_v6 = vld [vmem:[%s5537_s1 + $0x98] sm:$0xff]  }
  0x46   : > { %v733_v9 = vsel %vm683_vm3, %v730_v34, %v732_v43  ;;  %v459_v62 = vadd.f32 %v4519_v25, %v398_v44  ;;  %v402_v55 = vmul.f32 %v4505_v14, %v341_v45  ;;  %v1290_v18 = vrot.slane %v4590_v27, 2 }
  0x47   : > { %v4828_v23 = vpack.c.bf16 %v733_v9, %v731_v41  ;;  %v460_v0 = vadd.f32 %v4519_v25, %v399_v48  ;;  %v461_v22 = vadd.f32 %v4519_v25, %v400_v49  ;;  %v403_v33 = vmul.f32 %v4505_v14, %v342_v52 }
  0x48   : > { %v513_v12 = vmax.f32 %v459_v62, 0.0  ;;  %v462_v38 = vadd.f32 %v4519_v25, %v401_v53  ;;  %v463_v1 = vadd.f32 %v4519_v25, %v402_v55  ;;  %v1291_v34 = vrot.slane %v4578_v21, 2 }
  0x49   : > { %5573 = vst [vmem:[#allocation10_spill] sm:$0xff] %v4828_v23  ;;  %3779 = vmatmul.mubr.msk.bf16.gmra.mrb[16].mxu1 %vm837_vm0, %v4828_v23  ;;  %v4841_v40 = vmax.f32 %v460_v0, 0.0  ;;  %v515_v41 = vmax.f32 %v461_v22, 0.0  ;;  %v464_v43 = vadd.f32 %v4519_v25, %v403_v33  ;;  %v1293_v44 = vrot.slane %v4598_v32, 2  ;;  %v3582_v22 = vld [vmem:[%s4500_s16 + $0x90] sm:$0xff]   ;;  %v4386_v33 = vld [vmem:[%s5537_s1 + $0xa0] sm:$0xff]  }
  0x4a   : > { %3953 = vmatmul.mubr.msk.bf16.vlgmr.msra.gmra.mrb[0].mxu0 %vm837_vm0, %v4809_v35  ;;  %v4849_v45 = vsel %vm541_vm1, %v513_v12, 0.0  ;;  %v516_v48 = vmax.f32 %v462_v38, 0.0  ;;  %v4851_v49 = vmax.f32 %v463_v1, 0.0  ;;  %v1292_v52 = vsel %vm1274_vm4, %v1290_v18, %v1291_v34 }
  0x4b   : > { %3985 = vmatpush3.bf16.msra.mxu0 %v4646_v15  ;;  %v4857_v53 = vsel %vm552_vm2, %v515_v41, 0.0  ;;  %v734_v32 = vrot.slane %v4849_v45, 1  ;;  %v735_v9 = vrot.slane %v4841_v40, 1  ;;  %v518_v62 = vmax.f32 %v464_v43, 0.0  ;;  %v291_v43 = vld [vmem:[%s4500_s16 + $0x98] sm:$0x1] }
  0x4c   : > { %v737_v55 = vrot.slane %v4857_v53, 1  ;;  %v4864_v0 = vsel %vm541_vm1, %v516_v48, 0.0  ;;  %v740_v18 = vrot.slane %v4851_v49, 1  ;;  %v1294_v15 = vsel %vm1274_vm4, %v1291_v34, %v1293_v44  ;;  %3986 = vmatprep.subr.bf16.mxu0 %v4384_v6 }
  0x4d   : > { %v736_v12 = vsel %vm683_vm3, %v734_v32, %v735_v9  ;;  %v4875_v38 = vsel %vm552_vm2, %v518_v62, 0.0  ;;  %v739_v1 = vrot.slane %v4864_v0, 1  ;;  %v4878_v41 = vpack.c.bf16 %v1294_v15, %v1292_v52 }
  0x4e   : > { %v738_v34 = vsel %vm683_vm3, %v735_v9, %v737_v55  ;;  %v742_v44 = vrot.slane %v4875_v38, 1  ;;  %v1295_v48 = vrot.slane %v4640_v4, 2  ;;  %v1296_v2 = vrot.slane %v4633_v61, 2 }
  0x4f   : > { %v4886_v32 = vpack.c.bf16 %v738_v34, %v736_v12  ;;  %v741_v62 = vsel %vm683_vm3, %v739_v1, %v740_v18  ;;  %3956 = vmatprep.mubr.msk.bf16.mxu0 %vm837_vm0, %v4878_v41  ;;  %v1298_v52 = vrot.slane %v4652_v16, 2  ;;  %v3567_v15 = vunpack.c.l.bf16 %v3582_v22  ;;  %3987 = vmatpush3.bf16.msra.mxu0 %v4384_v6  ;;  %v4898_v12 = vld [vmem:[%s5537_s1 + $0xa8] sm:$0xff]  }
  0x50   : > { %v743_v9 = vsel %vm683_vm3, %v740_v18, %v742_v44  ;;  %v1297_v55 = vsel %vm1274_vm4, %v1295_v48, %v1296_v2  ;;  %v3568_v23 = vunpack.c.h.bf16 %v3582_v22  ;;  %v345_v5 = vunpack.c.l.bf16 %v291_v43  ;;  %3988 = vmatprep.subr.bf16.mxu0 %v4386_v33 }
  0x51   : > { %5574 = vst [vmem:[#allocation11_spill] sm:$0xff] %v4886_v32  ;;  %3782 = vmatprep.mubr.msk.bf16.mxu1 %vm837_vm0, %v4886_v32  ;;  %v4902_v1 = vpack.c.bf16 %v743_v9, %v741_v62  ;;  %v1299_v16 = vsel %vm1274_vm4, %v1296_v2, %v1298_v52  ;;  %v404_v6 = vmul.f32 %v3567_v15, %v4505_v14  ;;  %v346_v18 = vunpack.c.l.bf16 %v292_v7 }
  0x52   : > { %v4906_v34 = vpack.c.bf16 %v1299_v16, %v1297_v55  ;;  %v405_v22 = vmul.f32 %v3568_v23, %v4505_v14  ;;  %v406_v43 = vmul.f32 %v4505_v14, %v345_v5  ;;  %v347_v44 = vunpack.c.h.bf16 %v292_v7 }
  0x53   : > { %5575 = vst [vmem:[#allocation12_spill] sm:$0xff] %v4902_v1  ;;  %3783 = vmatmul.mubr.msk.bf16.gmra.mrb[20].mxu1 %vm837_vm0, %v4902_v1  ;;  %v465_v48 = vadd.f32 %v4519_v25, %v404_v6  ;;  %v348_v32 = vunpack.c.l.bf16 %v294_v30  ;;  %v407_v62 = vmul.f32 %v4505_v14, %v346_v18  ;;  %v1300_v2 = vrot.slane %v4661_v24, 2  ;;  %3989 = vmatpush3.bf16.msra.mxu0 %v4386_v33 }
  0x54   : > { %5576 = vst [vmem:[#allocation13_spill] sm:$0xff] %v4906_v34  ;;  %3957 = vmatmul.mubr.msk.bf16.gmra.mrb[4].mxu0 %vm837_vm0, %v4906_v34  ;;  %v466_v52 = vadd.f32 %v4519_v25, %v405_v22  ;;  %v467_v23 = vadd.f32 %v4519_v25, %v406_v43  ;;  %v408_v7 = vmul.f32 %v4505_v14, %v347_v44  ;;  %v1301_v5 = vrot.slane %v4656_v19, 2 }
  0x55   : > { %4022 = vmatprep.subr.bf16.mxu0 %v4898_v12  ;;  %v519_v15 = vmax.f32 %v465_v48, 0.0  ;;  %v409_v30 = vmul.f32 %v4505_v14, %v348_v32  ;;  %v468_v9 = vadd.f32 %v4519_v25, %v407_v62  ;;  %v1303_v33 = vrot.slane %v4673_v36, 2 }
  0x56   : > { %v4925_v55 = vmax.f32 %v466_v52, 0.0  ;;  %v521_v16 = vmax.f32 %v467_v23, 0.0  ;;  %v469_v6 = vadd.f32 %v4519_v25, %v408_v7  ;;  %v1302_v18 = vsel %vm1274_vm4, %v1300_v2, %v1301_v5 }
  0x57   : > { %v4931_v22 = vsel %vm541_vm1, %v519_v15, 0.0  ;;  %v470_v43 = vadd.f32 %v4519_v25, %v409_v30  ;;  %v522_v32 = vmax.f32 %v468_v9, 0.0  ;;  %v1304_v44 = vsel %vm1274_vm4, %v1301_v5, %v1303_v33  ;;  %v3583_v5 = vld [vmem:[%s4500_s16 + $0xa8] sm:$0xff]  }
  0x58   : > { %v4937_v36 = vsel %vm552_vm2, %v521_v16, 0.0  ;;  %v744_v48 = vrot.slane %v4931_v22, 1  ;;  %v745_v62 = vrot.slane %v4925_v55, 1  ;;  %v4941_v52 = vmax.f32 %v469_v6, 0.0  ;;  %v297_v6 = vld [vmem:[%s4500_s16 + $0xb0] sm:$0x1] }
  0x59   : > { %v747_v2 = vrot.slane %v4937_v36, 1  ;;  %v524_v23 = vmax.f32 %v470_v43, 0.0  ;;  %v4946_v7 = vsel %vm541_vm1, %v522_v32, 0.0  ;;  %v4948_v15 = vpack.c.bf16 %v1304_v44, %v1302_v18  ;;  %v298_v44 = vld [vmem:[%s4500_s16 + $0xb4] sm:$0xff]  }
  0x5a   : > { %v746_v30 = vsel %vm683_vm3, %v744_v48, %v745_v62  ;;  %v749_v9 = vrot.slane %v4946_v7, 1  ;;  %v750_v33 = vrot.slane %v4941_v52, 1  ;;  %v1305_v16 = vrot.slane %v4699_v3, 2 }
  0x5b   : > { %5577 = vst [vmem:[#allocation14_spill] sm:$0xff] %v4948_v15  ;;  %v748_v1 = vsel %vm683_vm3, %v745_v62, %v747_v2  ;;  %v4959_v43 = vsel %vm552_vm2, %v524_v23, 0.0  ;;  %3960 = vmatprep.mubr.msk.bf16.mxu0 %vm837_vm0, %v4948_v15  ;;  %v1306_v18 = vrot.slane %v4694_v58, 2  ;;  %v1308_v32 = vrot.slane %v4709_v17, 2 }
  0x5c   : > { %v4966_v48 = vpack.c.bf16 %v748_v1, %v746_v30  ;;  %v751_v13 = vsel %vm683_vm3, %v749_v9, %v750_v33  ;;  %v752_v56 = vrot.slane %v4959_v43, 1  ;;  %v3571_v39 = vunpack.c.l.bf16 %v3583_v5 }
  0x5d   : > { %v1307_v62 = vsel %vm1274_vm4, %v1305_v16, %v1306_v18  ;;  %v1309_v2 = vsel %vm1274_vm4, %v1306_v18, %v1308_v32  ;;  %v3572_v23 = vunpack.c.h.bf16 %v3583_v5  ;;  %v351_v51 = vunpack.c.l.bf16 %v297_v6 }
  0x5e   : > { %3786 = vmatprep.mubr.msk.bf16.mxu1 %vm837_vm0, %v4966_v48  ;;  %v753_v17 = vsel %vm683_vm3, %v750_v33, %v752_v56  ;;  %v4976_v15 = vpack.c.bf16 %v1309_v2, %v1307_v62  ;;  %v410_v1 = vmul.f32 %v3571_v39, %v4505_v14  ;;  %v352_v30 = vunpack.c.l.bf16 %v298_v44 }
  0x5f   : > { %v4979_v9 = vpack.c.bf16 %v753_v17, %v751_v13  ;;  %v411_v34 = vmul.f32 %v3572_v23, %v4505_v14  ;;  %v412_v16 = vmul.f32 %v4505_v14, %v351_v51  ;;  %v353_v18 = vunpack.c.h.bf16 %v298_v44 }
  0x60   : > { %3961 = vmatmul.mubr.msk.bf16.gmra.mrb[8].mxu0 %vm837_vm0, %v4976_v15  ;;  %v471_v5 = vadd.f32 %v4519_v25, %v410_v1  ;;  %v354_v6 = vunpack.c.l.bf16 %v300_v20  ;;  %v413_v56 = vmul.f32 %v4505_v14, %v352_v30  ;;  %v1310_v33 = vrot.slane %v4729_v42, 2 }
  0x61   : > { %3787 = vmatmul.mubr.msk.bf16.gmra.mrb[24].mxu1 %vm837_vm0, %v4979_v9  ;;  %v472_v39 = vadd.f32 %v4519_v25, %v411_v34  ;;  %v473_v13 = vadd.f32 %v4519_v25, %v412_v16  ;;  %v414_v51 = vmul.f32 %v4505_v14, %v353_v18  ;;  %v1311_v32 = vrot.slane %v4721_v37, 2 }
  0x62   : > { %v525_v44 = vmax.f32 %v471_v5, 0.0  ;;  %v415_v62 = vmul.f32 %v4505_v14, %v354_v6  ;;  %v474_v20 = vadd.f32 %v4519_v25, %v413_v56  ;;  %v1313_v2 = vrot.slane %v4736_v46, 2 }
  0x63   : > { %v4997_v23 = vmax.f32 %v472_v39, 0.0  ;;  %v527_v17 = vmax.f32 %v473_v13, 0.0  ;;  %v475_v1 = vadd.f32 %v4519_v25, %v414_v51  ;;  %v1312_v34 = vsel %vm1274_vm4, %v1310_v33, %v1311_v32 }
  0x64   : > { %v5003_v30 = vsel %vm541_vm1, %v525_v44, 0.0  ;;  %v476_v16 = vadd.f32 %v4519_v25, %v415_v62  ;;  %v528_v18 = vmax.f32 %v474_v20, 0.0  ;;  %v1314_v14 = vsel %vm1274_vm4, %v1311_v32, %v1313_v2 }
  0x65   : > { %v5009_v5 = vsel %vm552_vm2, %v527_v17, 0.0  ;;  %v754_v46 = vrot.slane %v5003_v30, 1  ;;  %v755_v6 = vrot.slane %v4997_v23, 1  ;;  %v5013_v56 = vmax.f32 %v475_v1, 0.0 }
  0x66   : > { %v757_v33 = vrot.slane %v5009_v5, 1  ;;  %v530_v39 = vmax.f32 %v476_v16, 0.0  ;;  %v5018_v13 = vsel %vm541_vm1, %v528_v18, 0.0  ;;  %v5020_v25 = vpack.c.bf16 %v1314_v14, %v1312_v34 }
  0x67   : > { %v756_v51 = vsel %vm683_vm3, %v754_v46, %v755_v6  ;;  %v759_v32 = vrot.slane %v5018_v13, 1  ;;  %v760_v44 = vrot.slane %v5013_v56, 1  ;;  %v1315_v62 = vrot.slane %v4752_v26, 2 }
  0x68   : > { %v758_v20 = vsel %vm683_vm3, %v755_v6, %v757_v33  ;;  %v5029_v2 = vsel %vm552_vm2, %v530_v39, 0.0  ;;  %3964 = vmatprep.mubr.msk.bf16.mxu0 %vm837_vm0, %v5020_v25  ;;  %v1316_v17 = vrot.slane %v4746_v63, 2  ;;  %v1318_v1 = vrot.slane %v4760_v31, 2 }
  0x69   : > { %v5035_v34 = vpack.c.bf16 %v758_v20, %v756_v51  ;;  %v761_v16 = vsel %vm683_vm3, %v759_v32, %v760_v44  ;;  %v762_v18 = vrot.slane %v5029_v2, 1  ;;  %v1320_v6 = vrot.slane %v4794_v28, 2 }
  0x6a   : > { %v1317_v14 = vsel %vm1274_vm4, %v1315_v62, %v1316_v17  ;;  %v1319_v46 = vsel %vm1274_vm4, %v1316_v17, %v1318_v1  ;;  %v1321_v33 = vrot.slane %v4786_v8, 2  ;;  %v1323_v51 = vrot.slane %v4814_v60, 2 }
  0x6b   : > { %5578 = vst [vmem:[#allocation15_spill] sm:$0xff] %v5035_v34  ;;  %3790 = vmatprep.mubr.msk.bf16.mxu1 %vm837_vm0, %v5035_v34  ;;  %v763_v39 = vsel %vm683_vm3, %v760_v44, %v762_v18  ;;  %v5046_v31 = vpack.c.bf16 %v1319_v46, %v1317_v14  ;;  %v1325_v32 = vrot.slane %v4849_v45, 2  ;;  %v1326_v17 = vrot.slane %v4841_v40, 2 }
  0x6c   : > { %v5050_v20 = vpack.c.bf16 %v763_v39, %v761_v16  ;;  %v1322_v62 = vsel %vm1274_vm4, %v1320_v6, %v1321_v33  ;;  %v1328_v1 = vrot.slane %v4857_v53, 2  ;;  %v1324_v34 = vsel %vm1274_vm4, %v1321_v33, %v1323_v51 }
  0x6d   : > { %3965 = vmatmul.mubr.msk.bf16.gmra.mrb[12].mxu0 %vm837_vm0, %v5046_v31  ;;  %v1330_v44 = vrot.slane %v4864_v0, 2  ;;  %v5061_v60 = vpack.c.bf16 %v1324_v34, %v1322_v62  ;;  %v1327_v16 = vsel %vm1274_vm4, %v1325_v32, %v1326_v17  ;;  %v1331_v14 = vrot.slane %v4851_v49, 2 }
  0x6e   : > { %3791 = vmatmul.mubr.msk.bf16.gmra.mrb[28].mxu1 %vm837_vm0, %v5050_v20  ;;  %v1329_v18 = vsel %vm1274_vm4, %v1326_v17, %v1328_v1  ;;  %v5564_v46 = vmov 0.0|0.0   ;;  %v1333_v53 = vrot.slane %v4875_v38, 2  ;;  %v1335_v6 = vrot.slane %v4931_v22, 2 }
  0x6f   : > { %3800 = vmatprep.mubr.bf16.mxu1 %v5564_v46  ;;  %v1336_v33 = vrot.slane %v4925_v55, 2  ;;  %v5072_v34 = vpack.c.bf16 %v4537_v47, %v4545_v54  ;;  %3968 = vmatprep.mubr.msk.bf16.mxu0 %vm837_vm0, %v5061_v60  ;;  %v1332_v39 = vsel %vm1274_vm4, %v1330_v44, %v1331_v14  ;;  %v1338_v51 = vrot.slane %v4937_v36, 2  ;;  %v3584_v36 = vld [vmem:[%s4500_s16 + $0xc0] sm:$0xff]  }
  0x70   : > { %v5078_v32 = vpack.c.bf16 %v1329_v18, %v1327_v16  ;;  %v1334_v38 = vsel %vm1274_vm4, %v1331_v14, %v1333_v53  ;;  %v1340_v62 = vrot.slane %v4946_v7, 2  ;;  %v1341_v17 = vrot.slane %v4941_v52, 2  ;;  %v4387_v18 = vld [vmem:[%s5537_s1 + $0x38] sm:$0xff]   ;;  %v303_v53 = vld [vmem:[%s4500_s16 + $0xc8] sm:$0x1] }
  0x71   : > { %v5083_v1 = vpack.c.bf16 %v1334_v38, %v1332_v39  ;;  %v1337_v47 = vsel %vm1274_vm4, %v1335_v6, %v1336_v33  ;;  %v1339_v54 = vsel %vm1274_vm4, %v1336_v33, %v1338_v51  ;;  %v1343_v46 = vrot.slane %v4959_v43, 2 }
  0x72   : > { %v5090_v44 = vpack.c.bf16 %v4539_v50, %v4554_v57  ;;  %v5095_v16 = vpack.c.bf16 %v4578_v21, %v4590_v27  ;;  %v5102_v14 = vpack.c.bf16 %v4721_v37, %v4729_v42  ;;  %v5107_v43 = vpack.c.bf16 %v1339_v54, %v1337_v47 }
  0x73   : > { %v5111_v50 = vpack.c.bf16 %v4633_v61, %v4640_v4  ;;  %v1342_v57 = vsel %vm1274_vm4, %v1340_v62, %v1341_v17  ;;  %v1345_v21 = vrot.slane %v5003_v30, 2  ;;  %v1344_v27 = vsel %vm1274_vm4, %v1341_v17, %v1343_v46 }
  0x74   : > { %v1346_v37 = vrot.slane %v4997_v23, 2  ;;  %v3575_v42 = vunpack.c.l.bf16 %v3584_v36  ;;  %v3576_v6 = vunpack.c.h.bf16 %v3584_v36  ;;  %v1348_v61 = vrot.slane %v5009_v5, 2 }
  0x75   : > { %3969 = vmatmul.mubr.msk.bf16.gmra.mrb[16].mxu0 %vm837_vm0, %v5078_v32  ;;  %v357_v4 = vunpack.c.l.bf16 %v303_v53  ;;  %v5127_v33 = vpack.c.bf16 %v4746_v63, %v4752_v26  ;;  %v5131_v39 = vpack.c.bf16 %v4786_v8, %v4794_v28  ;;  %v1350_v46 = vrot.slane %v5018_v13, 2  ;;  %v4389_v63 = vld [vmem:[%s5537_s1 + $0x40] sm:$0xff]  }
  0x76   : > { %3801 = vmatmul.mubr.msk.bf16.vlgmr.msra.gmra.mrb[0].mxu1 %vm837_vm0, %v5072_v34  ;;  %3972 = vmatprep.mubr.msk.bf16.mxu0 %vm837_vm0, %v5083_v1  ;;  %v5139_v5 = vpack.c.bf16 %v4841_v40, %v4849_v45  ;;  %v5144_v26 = vpack.c.bf16 %v1344_v27, %v1342_v57  ;;  %v5148_v28 = vpack.c.bf16 %v4851_v49, %v4864_v0  ;;  %v4399_v40 = vld [vmem:[%s5539_s3] ss:$0 sm:$0xff]  ;;  %v1351_v49 = vrot.slane %v5013_v56, 2 }
  0x77   : > { %3833 = vmatpush3.bf16.msra.mxu1 %v4631_v59  ;;  %3804 = vmatprep.mubr.msk.bf16.mxu1 %vm837_vm0, %v5090_v44  ;;  %v4398_v59 = vld [vmem:[%s5538_s2] ss:$0 sm:$0xff]  ;;  %v5152_v62 = vpack.c.bf16 %v4925_v55, %v4931_v22  ;;  %v5159_v47 = vpack.c.bf16 %v4941_v52, %v4946_v7  ;;  %v5163_v54 = vpack.c.bf16 %v4997_v23, %v5003_v30  ;;  %v1353_v0 = vrot.slane %v5029_v2, 2  ;;  %v5174_v52 = vld [vmem:[%s5537_s1 + $0x48] sm:$0xff]  }
  0x78   : > { %3834 = vmatprep.subr.bf16.mxu1 %v4387_v18  ;;  %v416_v51 = vmul.f32 %v4398_v59, %v3575_v42  ;;  %v417_v38 = vmul.f32 %v4398_v59, %v3576_v6  ;;  %v418_v8 = vmul.f32 %v4398_v59, %v357_v4  ;;  %v5169_v22 = vpack.c.bf16 %v5013_v56, %v5018_v13 }
  0x79   : > { %v1347_v23 = vsel %vm1274_vm4, %v1345_v21, %v1346_v37  ;;  %v1349_v30 = vsel %vm1274_vm4, %v1346_v37, %v1348_v61  ;;  %v1352_v13 = vsel %vm1274_vm4, %v1350_v46, %v1351_v49  ;;  %v1354_v2 = vsel %vm1274_vm4, %v1351_v49, %v1353_v0  ;;  %v4400_v49 = vld [vmem:[%s5537_s1 + $0x60] sm:$0xff]  }
  0x7a   : > { %v477_v45 = vadd.f32 %v4399_v40, %v416_v51  ;;  %v478_v17 = vadd.f32 %v4399_v40, %v417_v38  ;;  %v479_v55 = vadd.f32 %v4399_v40, %v418_v8  ;;  %v5199_v57 = vpack.c.bf16 %v4656_v19, %v4661_v24  ;;  %v4390_v51 = vld [vmem:[%s5537_s1 + $0xb0] sm:$0xff]   ;;  %v4392_v38 = vld [vmem:[%s5537_s1 + $0xb8] sm:$0xff]  }
  0x7b   : > { %3835 = vmatpush3.bf16.msra.mxu1 %v4387_v18  ;;  %v5201_v21 = vpack.c.bf16 %v1349_v30, %v1347_v23  ;;  %v5203_v27 = vpack.c.bf16 %v1354_v2, %v1352_v13  ;;  %v5209_v11 = vpack.c.bf16 %v4694_v58, %v4699_v3  ;;  %v5584_v23 = vld [vmem:[#allocation4_spill] sm:$0xff]  ;;  %v5585_v30 = vld [vmem:[#allocation5_spill] sm:$0xff]  ;;  %v5586_v13 = vld [vmem:[#allocation6_spill] sm:$0xff] }
  0x7c   : > { %v531_v36 = vmax.f32 %v477_v45, 0.0  ;;  %3836 = vmatprep.subr.bf16.mxu1 %v4389_v63  ;;  %v533_v7 = vmax.f32 %v479_v55, 0.0  ;;  %v5184_v56 = vmax.f32 %v478_v17, 0.0  ;;  %v4393_v45 = vld [vmem:[%s5537_s1 + $0x50] sm:$0xff]   ;;  %v4395_v17 = vld [vmem:[%s5537_s1 + $0x58] sm:$0xff]   ;;  %v5581_v55 = vld [vmem:[#allocation14_spill] sm:$0xff] }
  0x7d   : > { %3973 = vmatmul.mubr.msk.bf16.gmra.mrb[20].mxu0 %vm837_vm0, %v5107_v43  ;;  %v5587_v2 = vld [vmem:[#allocation7_spill] sm:$0xff] }
  0x7e   : > { %3805 = vmatmul.mubr.msk.bf16.gmra.mrb[4].mxu1 %vm837_vm0, %v5095_v16  ;;  %3976 = vmatprep.mubr.msk.bf16.mxu0 %vm837_vm0, %v5144_v26  ;;  %v5192_v18 = vsel %vm541_vm1, %v531_v36, 0.0  ;;  %v609_v53 = vsel %vm552_vm2, %v533_v7, 0.0  ;;  %v2124_v10 = vrot.slane %v5184_v56, 2  ;;  %v1895_v3 = vrot.slane %v5184_v56, 1  ;;  %v4396_v7 = vld [vmem:[%s5537_s1 + $0xc8] sm:$0xff]  }
  0x7f   : > { %3808 = vmatprep.mubr.msk.bf16.mxu1 %vm837_vm0, %v5111_v50  ;;  %3837 = vmatpush3.bf16.msra.mxu1 %v4389_v63  ;;  %v2123_v37 = vrot.slane %v5192_v18, 2  ;;  %v2126_v42 = vrot.slane %v609_v53, 2  ;;  %v1894_v58 = vrot.slane %v5192_v18, 1  ;;  %v1897_v61 = vrot.slane %v609_v53, 1  ;;  %v4394_v63 = vld [vmem:[%s5537_s1 + $0xc0] sm:$0xff]   ;;  %v5589_v53 = vld [vmem:[#allocation9_spill] sm:$0xff] }
  0x80   : > { %3870 = vmatprep.subr.bf16.mxu1 %v5174_v52  ;;  %v5310_v0 = vpack.c.bf16 %v5184_v56, %v5192_v18  ;;  %v5582_v36 = vmov 0.0|0.0   ;;  %v4397_v56 = vld [vmem:[%s5537_s1 + $0xd0] sm:$0xff]  }
  0x81   : > { %v2125_v19 = vsel %vm1274_vm4, %v2123_v37, %v2124_v10  ;;  %v2127_v24 = vsel %vm1274_vm4, %v2124_v10, %v2126_v42  ;;  %v1896_v4 = vsel %vm683_vm3, %v1894_v58, %v1895_v3  ;;  %v1898_v46 = vsel %vm683_vm3, %v1895_v3, %v1897_v61  ;;  %v5588_v18 = vld [vmem:[#allocation8_spill] sm:$0xff]  ;;  %v5590_v37 = vld [vmem:[#allocation10_spill] sm:$0xff]  ;;  %v5591_v10 = vld [vmem:[#allocation11_spill] sm:$0xff] }
  0x82   : > { %v5221_v6 = vpack.c.bf16 %v2127_v24, %v2125_v19  ;;  %v5227_v59 = vpack.c.bf16 %v1898_v46, %v1896_v4  ;;  %v5592_v42 = vld [vmem:[#allocation12_spill] sm:$0xff]  ;;  %v4401_v19 = vld [vmem:[%s5537_s1 + $0x68] sm:$0xff]  }
  0x85   : > { %3977 = vmatmul.mubr.msk.bf16.gmra.mrb[24].mxu0 %vm837_vm0, %v5201_v21 }
  0x86   : > { %3809 = vmatmul.mubr.msk.bf16.gmra.mrb[8].mxu1 %vm837_vm0, %v5199_v57  ;;  %3980 = vmatprep.mubr.msk.bf16.mxu0 %vm837_vm0, %v5203_v27 }
  0x87   : > { %3812 = vmatprep.mubr.msk.bf16.mxu1 %vm837_vm0, %v5209_v11 }
  0x8d   : > { %3981 = vmatmul.mubr.msk.bf16.gmra.mrb[28].mxu0 %vm837_vm0, %v5221_v6 }
  0x8e   : > { %3813 = vmatmul.mubr.msk.bf16.gmra.mrb[12].mxu1 %vm837_vm0, %v5102_v14  ;;  %3990 = vmatprep.mubr.msk.bf16.mxu0 %vm837_vm0, %v5090_v44 }
  0x8f   : > { %3816 = vmatprep.mubr.msk.bf16.mxu1 %vm837_vm0, %v5127_v33 }
  0x95   : > { %3991 = vmatmul.mubr.msk.bf16.vlgmr.msra.gmra.mrb[0].mxu0 %vm837_vm0, %v5095_v16 }
  0x96   : > { %3817 = vmatmul.mubr.msk.bf16.gmra.mrb[16].mxu1 %vm837_vm0, %v5131_v39  ;;  %4023 = vmatpush3.bf16.msra.mxu0 %v4898_v12  ;;  %v5579_v12 = vmov 0.0  }
  0x97   : > { %3820 = vmatprep.mubr.msk.bf16.mxu1 %vm837_vm0, %v5139_v5  ;;  %3994 = vmatprep.mubr.msk.bf16.mxu0 %vm837_vm0, %v5111_v50  ;;  %v1275_v8 = vrot.slane %v5579_v12, 2 }
  0x98   : > { %4024 = vmatprep.subr.bf16.mxu0 %v4390_v51 }
  0x99   : > { %v5272_v40 = vpack.c.bf16 %v1275_v8, %v1275_v8 }
  0x9a   : > { %4025 = vmatpush3.bf16.msra.mxu0 %v4390_v51 }
  0x9b   : > { %4026 = vmatprep.subr.bf16.mxu0 %v4392_v38 }
  0x9d   : > { %3995 = vmatmul.mubr.msk.bf16.gmra.mrb[4].mxu0 %vm837_vm0, %v5199_v57 }
  0x9e   : > { %3821 = vmatmul.mubr.msk.bf16.gmra.mrb[20].mxu1 %vm837_vm0, %v5148_v28  ;;  %3998 = vmatprep.mubr.msk.bf16.mxu0 %vm837_vm0, %v5209_v11 }
  0x9f   : > { %3824 = vmatprep.mubr.msk.bf16.mxu1 %vm837_vm0, %v5152_v62  ;;  %4027 = vmatpush3.bf16.msra.mxu0 %v4392_v38 }
  0xa0   : > { %4060 = vmatprep.subr.bf16.mxu0 %v4394_v63 }
  0xa5   : > { %3999 = vmatmul.mubr.msk.bf16.gmra.mrb[8].mxu0 %vm837_vm0, %v5102_v14 }
  0xa6   : > { %3825 = vmatmul.mubr.msk.bf16.gmra.mrb[24].mxu1 %vm837_vm0, %v5159_v47  ;;  %4002 = vmatprep.mubr.msk.bf16.mxu0 %vm837_vm0, %v5127_v33 }
  0xa7   : > { %3828 = vmatprep.mubr.msk.bf16.mxu1 %vm837_vm0, %v5163_v54 }
  0xad   : > { %4003 = vmatmul.mubr.msk.bf16.gmra.mrb[12].mxu0 %vm837_vm0, %v5131_v39 }
  0xae   : > { %3829 = vmatmul.mubr.msk.bf16.gmra.mrb[28].mxu1 %vm837_vm0, %v5169_v22  ;;  %4006 = vmatprep.mubr.msk.bf16.mxu0 %vm837_vm0, %v5139_v5 }
  0xaf   : > { %3838 = vmatprep.mubr.msk.bf16.mxu1 %vm837_vm0, %v5272_v40 }
  0xb5   : > { %4007 = vmatmul.mubr.msk.bf16.gmra.mrb[16].mxu0 %vm837_vm0, %v5148_v28 }
  0xb6   : > { %3839 = vmatmul.mubr.msk.bf16.vlgmr.msra.gmra.mrb[0].mxu1 %vm837_vm0, %v4796_v29  ;;  %4010 = vmatprep.mubr.msk.bf16.mxu0 %vm837_vm0, %v5152_v62  ;;  %v5580_v29 = vld [vmem:[#allocation13_spill] sm:$0xff] }
  0xb7   : > { %3871 = vmatpush3.bf16.msra.mxu1 %v5174_v52  ;;  %3842 = vmatprep.mubr.msk.bf16.mxu1 %vm837_vm0, %v4809_v35  ;;  %v5583_v52 = vld [vmem:[#allocation3_spill] sm:$0xff] }
  0xb8   : > { %3872 = vmatprep.subr.bf16.mxu1 %v4393_v45 }
  0xbb   : > { %3873 = vmatpush3.bf16.msra.mxu1 %v4393_v45 }
  0xbc   : > { %3874 = vmatprep.subr.bf16.mxu1 %v4395_v17 }
  0xbd   : > { %4011 = vmatmul.mubr.msk.bf16.gmra.mrb[20].mxu0 %vm837_vm0, %v5159_v47 }
  0xbe   : > { %3843 = vmatmul.mubr.msk.bf16.gmra.mrb[4].mxu1 %vm837_vm0, %v4878_v41  ;;  %4014 = vmatprep.mubr.msk.bf16.mxu0 %vm837_vm0, %v5163_v54 }
  0xbf   : > { %3846 = vmatprep.mubr.msk.bf16.mxu1 %vm837_vm0, %v5580_v29  ;;  %3875 = vmatpush3.bf16.msra.mxu1 %v4395_v17 }
  0xc0   : > { %4098 = vmatprep.subr.bf16.mxu1 %v4400_v49 }
  0xc5   : > { %4015 = vmatmul.mubr.msk.bf16.gmra.mrb[24].mxu0 %vm837_vm0, %v5169_v22 }
  0xc6   : > { %3847 = vmatmul.mubr.msk.bf16.gmra.mrb[8].mxu1 %vm837_vm0, %v5581_v55  ;;  %4018 = vmatprep.mubr.msk.bf16.mxu0 %vm837_vm0, %v5310_v0 }
  0xc7   : > { %3850 = vmatprep.mubr.msk.bf16.mxu1 %vm837_vm0, %v4976_v15 }
  0xcd   : > { %4019 = vmatmul.mubr.bf16.gmra.mrb[28].mxu0 %v5582_v36 }
  0xce   : > { %3851 = vmatmul.mubr.msk.bf16.gmra.mrb[12].mxu1 %vm837_vm0, %v5020_v25  ;;  %4028 = vmatprep.mubr.msk.bf16.mxu0 %vm837_vm0, %v5583_v52 }
  0xcf   : > { %3854 = vmatprep.mubr.msk.bf16.mxu1 %vm837_vm0, %v5046_v31 }
  0xd5   : > { %4029 = vmatmul.mubr.msk.bf16.vlgmr.msra.gmra.mrb[0].mxu0 %vm837_vm0, %v5584_v23 }
  0xd6   : > { %3855 = vmatmul.mubr.msk.bf16.gmra.mrb[16].mxu1 %vm837_vm0, %v5061_v60  ;;  %4061 = vmatpush3.bf16.msra.mxu0 %v4394_v63 }
  0xd7   : > { %3858 = vmatprep.mubr.msk.bf16.mxu1 %vm837_vm0, %v5078_v32  ;;  %4032 = vmatprep.mubr.msk.bf16.mxu0 %vm837_vm0, %v5585_v30 }
  0xd8   : > { %4062 = vmatprep.subr.bf16.mxu0 %v4396_v7 }
  0xda   : > { %4063 = vmatpush3.bf16.msra.mxu0 %v4396_v7 }
  0xdb   : > { %4064 = vmatprep.subr.bf16.mxu0 %v4397_v56 }
  0xdd   : > { %4033 = vmatmul.mubr.msk.bf16.gmra.mrb[4].mxu0 %vm837_vm0, %v5586_v13 }
  0xde   : > { %3859 = vmatmul.mubr.msk.bf16.gmra.mrb[20].mxu1 %vm837_vm0, %v5083_v1  ;;  %4036 = vmatprep.mubr.msk.bf16.mxu0 %vm837_vm0, %v5587_v2 }
  0xdf   : > { %3862 = vmatprep.mubr.msk.bf16.mxu1 %vm837_vm0, %v5107_v43  ;;  %4065 = vmatpush3.bf16.msra.mxu0 %v4397_v56 }
  0xe5   : > { %4037 = vmatmul.mubr.msk.bf16.gmra.mrb[8].mxu0 %vm837_vm0, %v5588_v18 }
  0xe6   : > { %3863 = vmatmul.mubr.msk.bf16.gmra.mrb[24].mxu1 %vm837_vm0, %v5144_v26  ;;  %4040 = vmatprep.mubr.msk.bf16.mxu0 %vm837_vm0, %v5589_v53 }
  0xe7   : > { %3866 = vmatprep.mubr.msk.bf16.mxu1 %vm837_vm0, %v5201_v21 }
  0xed   : > { %4041 = vmatmul.mubr.msk.bf16.gmra.mrb[12].mxu0 %vm837_vm0, %v5590_v37 }
  0xee   : > { %3867 = vmatmul.mubr.msk.bf16.gmra.mrb[28].mxu1 %vm837_vm0, %v5203_v27  ;;  %4044 = vmatprep.mubr.msk.bf16.mxu0 %vm837_vm0, %v5591_v10 }
  0xef   : > { %3876 = vmatprep.mubr.msk.bf16.mxu1 %vm837_vm0, %v5072_v34  ;;  %v4402_v34 = vld [vmem:[%s5537_s1 + $0x70] sm:$0xff]  }
  0xf5   : > { %4045 = vmatmul.mubr.msk.bf16.gmra.mrb[16].mxu0 %vm837_vm0, %v5592_v42 }
  0xf6   : > { %3877 = vmatmul.mubr.msk.bf16.vlgmr.msra.gmra.mrb[0].mxu1 %vm837_vm0, %v5090_v44  ;;  %4048 = vmatprep.mubr.msk.bf16.mxu0 %vm837_vm0, %v4966_v48  ;;  %v5593_v44 = vld [vmem:[#allocation15_spill] sm:$0xff] }
  0xf7   : > { %4101 = vmatpush3.bf16.msra.mxu1 %v4400_v49  ;;  %3880 = vmatprep.mubr.msk.bf16.mxu1 %vm837_vm0, %v5095_v16  ;;  %v5594_v16 = vld [vmem:[#allocation2_spill] sm:$0xff] }
  0xf8   : > { %4099 = vmatprep.subr.bf16.mxu1 %v4401_v19 }
  0xfb   : > { %4102 = vmatpush3.bf16.msra.mxu1 %v4401_v19 }
  0xfc   : > { %4100 = vmatprep.subr.bf16.mxu1 %v4402_v34 }
  0xfd   : > { %4049 = vmatmul.mubr.msk.bf16.gmra.mrb[20].mxu0 %vm837_vm0, %v4979_v9 }
  0xfe   : > { %3881 = vmatmul.mubr.msk.bf16.gmra.mrb[4].mxu1 %vm837_vm0, %v5111_v50  ;;  %4052 = vmatprep.mubr.msk.bf16.mxu0 %vm837_vm0, %v5593_v44 }
  0xff   : > { %3884 = vmatprep.mubr.msk.bf16.mxu1 %vm837_vm0, %v5199_v57  ;;  %4103 = vmatpush3.bf16.msra.mxu1 %v4402_v34 }
 0x105   : > { %4053 = vmatmul.mubr.msk.bf16.gmra.mrb[24].mxu0 %vm837_vm0, %v5050_v20 }
 0x106   : > { %3885 = vmatmul.mubr.msk.bf16.gmra.mrb[8].mxu1 %vm837_vm0, %v5209_v11  ;;  %4056 = vmatprep.mubr.msk.bf16.mxu0 %vm837_vm0, %v5227_v59 }
 0x107   : > { %3888 = vmatprep.mubr.msk.bf16.mxu1 %vm837_vm0, %v5102_v14 }
 0x10d   : > { %4057 = vmatmul.mubr.msk.bf16.gmra.mrb[28].mxu0 %vm837_vm0, %v5594_v16 }
 0x10e   : > { %3889 = vmatmul.mubr.msk.bf16.gmra.mrb[12].mxu1 %vm837_vm0, %v5127_v33  ;;  %4066 = vmatprep.mubr.msk.bf16.mxu0 %vm837_vm0, %v4809_v35 }
 0x10f   : > { %3892 = vmatprep.mubr.msk.bf16.mxu1 %vm837_vm0, %v5131_v39 }
 0x115   : > { %4067 = vmatmul.mubr.msk.bf16.vlgmr.msra.gmra.mrb[0].mxu0 %vm837_vm0, %v4878_v41 }
 0x116   : > { %3893 = vmatmul.mubr.msk.bf16.gmra.mrb[16].mxu1 %vm837_vm0, %v5139_v5  ;;  %4070 = vmatprep.mubr.msk.bf16.mxu0 %vm837_vm0, %v5580_v29 }
 0x117   : > { %3896 = vmatprep.mubr.msk.bf16.mxu1 %vm837_vm0, %v5148_v28 }
 0x11d   : > { %4071 = vmatmul.mubr.msk.bf16.gmra.mrb[4].mxu0 %vm837_vm0, %v5581_v55 }
 0x11e   : > { %3897 = vmatmul.mubr.msk.bf16.gmra.mrb[20].mxu1 %vm837_vm0, %v5152_v62  ;;  %4074 = vmatprep.mubr.msk.bf16.mxu0 %vm837_vm0, %v4976_v15 }
 0x11f   : > { %3900 = vmatprep.mubr.msk.bf16.mxu1 %vm837_vm0, %v5159_v47 }
 0x125   : > { %4075 = vmatmul.mubr.msk.bf16.gmra.mrb[8].mxu0 %vm837_vm0, %v5020_v25 }
 0x126   : > { %3901 = vmatmul.mubr.msk.bf16.gmra.mrb[24].mxu1 %vm837_vm0, %v5163_v54  ;;  %4078 = vmatprep.mubr.msk.bf16.mxu0 %vm837_vm0, %v5046_v31 }
 0x127   : > { %3904 = vmatprep.mubr.msk.bf16.mxu1 %vm837_vm0, %v5169_v22 }
 0x12d   : > { %4079 = vmatmul.mubr.msk.bf16.gmra.mrb[12].mxu0 %vm837_vm0, %v5061_v60 }
 0x12e   : > { %3905 = vmatmul.mubr.msk.bf16.gmra.mrb[28].mxu1 %vm837_vm0, %v5310_v0  ;;  %4082 = vmatprep.mubr.msk.bf16.mxu0 %vm837_vm0, %v5078_v32 }
 0x12f   : > { %3930 = vmatprep.mubr.msk.bf16.mxu1 %vm837_vm0, %v5590_v37 }
 0x135   : > { %4083 = vmatmul.mubr.msk.bf16.gmra.mrb[16].mxu0 %vm837_vm0, %v5083_v1 }
 0x136   : > { %3931 = vmatmul.mubr.msk.bf16.vlgmr.msra.gmra.mrb[16].mxu1 %vm837_vm0, %v5591_v10  ;;  %4086 = vmatprep.mubr.msk.bf16.mxu0 %vm837_vm0, %v5107_v43 }
 0x137   : > { %3934 = vmatprep.mubr.msk.bf16.mxu1 %vm837_vm0, %v5592_v42 }
 0x13d   : > { %4087 = vmatmul.mubr.msk.bf16.gmra.mrb[20].mxu0 %vm837_vm0, %v5144_v26 }
 0x13e   : > { %3935 = vmatmul.mubr.msk.bf16.gmra.mrb[20].mxu1 %vm837_vm0, %v4966_v48  ;;  %4090 = vmatprep.mubr.msk.bf16.mxu0 %vm837_vm0, %v5201_v21 }
 0x13f   : > { %3938 = vmatprep.mubr.msk.bf16.mxu1 %vm837_vm0, %v4979_v9 }
 0x145   : > { %4091 = vmatmul.mubr.msk.bf16.gmra.mrb[24].mxu0 %vm837_vm0, %v5203_v27 }
 0x146   : > { %3939 = vmatmul.mubr.msk.bf16.gmra.mrb[24].mxu1 %vm837_vm0, %v5593_v44  ;;  %4094 = vmatprep.mubr.msk.bf16.mxu0 %vm837_vm0, %v5221_v6 }
 0x147   : > { %3942 = vmatprep.mubr.msk.bf16.mxu1 %vm837_vm0, %v5050_v20 }
 0x14d   : > { %4095 = vmatmul.mubr.msk.bf16.gmra.mrb[28].mxu0 %vm837_vm0, %v5272_v40 }
 0x14e   : > { %3943 = vmatmul.mubr.msk.bf16.gmra.mrb[28].mxu1 %vm837_vm0, %v5227_v59 }
 0x1c9   : > { %v3878_v35 = vpop.f32.mrb[0].mxu1 }
 0x1ca   : > { %v1732_v41 = vpop.f32.mrb[1].mxu1 }
 0x1cb   : > { %v3879_v15 = vpop.f32.mrb[2].mxu1 }
 0x1cc   : > { %v1735_v48 = vpop.f32.mrb[3].mxu1 }
 0x1d1   : > { %v3882_v9 = vpop.f32.mrb[4].mxu1 }
 0x1d2   : > { %v1748_v25 = vpop.f32.mrb[5].mxu1 }
 0x1d3   : > { %v3883_v31 = vpop.f32.mrb[6].mxu1 }
 0x1d4   : > { %v1751_v60 = vpop.f32.mrb[7].mxu1 }
 0x1d9   : > { %v3886_v32 = vpop.f32.mrb[8].mxu1 }
 0x1da   : > { %v1764_v1 = vpop.f32.mrb[9].mxu1 }
 0x1db   : > { %v3887_v14 = vpop.f32.mrb[10].mxu1 }
 0x1dc   : > { %v1767_v43 = vpop.f32.mrb[11].mxu1 }
 0x1e1   : > { %v3890_v20 = vpop.f32.mrb[12].mxu1 }
 0x1e2   : > { %v1780_v50 = vpop.f32.mrb[13].mxu1 }
 0x1e3   : > { %v3891_v33 = vpop.f32.mrb[14].mxu1 }
 0x1e4   : > { %v1783_v39 = vpop.f32.mrb[15].mxu1 }
 0x1e8   : > { %v4068_v5 = vpop.f32.mrb[0].mxu0 }
 0x1e9   : > { %v4104_v26 = vadd.f32 %v4068_v5, %v3878_v35  ;;  %v2876_v28 = vpop.f32.mrb[1].mxu0 }
 0x1ea   : > { %v4105_v62 = vadd.f32 %v2876_v28, %v1732_v41  ;;  %v4069_v47 = vpop.f32.mrb[2].mxu0 }
 0x1eb   : > { %v3515_v54 = vpack.c.bf16 %v4104_v26, %v4104_v26  ;;  %v4106_v22 = vadd.f32 %v4069_v47, %v3879_v15  ;;  %v2879_v57 = vpop.f32.mrb[3].mxu0 }
 0x1ec   : > { %v3513_v21 = vpack.c.bf16 %v4105_v62, %v4105_v62  ;;  %v4107_v27 = vadd.f32 %v2879_v57, %v1735_v48 }
 0x1ed   : > { %3166 = vst.msk [vmem:[%s5467_s24 + $0x8] sm:$0xf] %vm3163_vm5, %v3515_v54  ;;  %v3516_v11 = vpack.c.bf16 %v4106_v22, %v4106_v22 }
 0x1ee   : > { %3164 = vst.msk [vmem:[%s5467_s24] sm:$0xf] %vm3163_vm5, %v3513_v21  ;;  %v3514_v24 = vpack.c.bf16 %v4107_v27, %v4107_v27 }
 0x1ef   : > { %3167 = vst.msk [vmem:[%s5467_s24 + $0xc] sm:$0xf] %vm3163_vm5, %v3516_v11 }
 0x1f0   : > { %3165 = vst.msk [vmem:[%s5467_s24 + $0x4] sm:$0xf] %vm3163_vm5, %v3514_v24  ;;  %v4072_v6 = vpop.f32.mrb[4].mxu0 }
 0x1f1   : > { %v4108_v58 = vadd.f32 %v4072_v6, %v3882_v9  ;;  %v2892_v3 = vpop.f32.mrb[5].mxu0 }
 0x1f2   : > { %v4109_v61 = vadd.f32 %v2892_v3, %v1748_v25  ;;  %v4073_v4 = vpop.f32.mrb[6].mxu0 }
 0x1f3   : > { %v3519_v46 = vpack.c.bf16 %v4108_v58, %v4108_v58  ;;  %v4110_v59 = vadd.f32 %v4073_v4, %v3883_v31  ;;  %v2895_v51 = vpop.f32.mrb[7].mxu0 }
 0x1f4   : > { %v3517_v38 = vpack.c.bf16 %v4109_v61, %v4109_v61  ;;  %v4111_v63 = vadd.f32 %v2895_v51, %v1751_v60 }
 0x1f5   : > { %3170 = vst.msk [vmem:[%s5467_s24 + $0x18] sm:$0xf] %vm3163_vm5, %v3519_v46  ;;  %v3520_v12 = vpack.c.bf16 %v4110_v59, %v4110_v59 }
 0x1f6   : > { %3168 = vst.msk [vmem:[%s5467_s24 + $0x10] sm:$0xf] %vm3163_vm5, %v3517_v38  ;;  %v3518_v8 = vpack.c.bf16 %v4111_v63, %v4111_v63 }
 0x1f7   : > { %3171 = vst.msk [vmem:[%s5467_s24 + $0x1c] sm:$0xf] %vm3163_vm5, %v3520_v12 }
 0x1f8   : > { %3169 = vst.msk [vmem:[%s5467_s24 + $0x14] sm:$0xf] %vm3163_vm5, %v3518_v8  ;;  %v4076_v40 = vpop.f32.mrb[8].mxu0 }
 0x1f9   : > { %v4112_v45 = vadd.f32 %v4076_v40, %v3886_v32  ;;  %v2908_v17 = vpop.f32.mrb[9].mxu0 }
 0x1fa   : > { %v4113_v29 = vadd.f32 %v2908_v17, %v1764_v1  ;;  %v4077_v49 = vpop.f32.mrb[10].mxu0 }
 0x1fb   : > { %v3523_v0 = vpack.c.bf16 %v4112_v45, %v4112_v45  ;;  %v4114_v55 = vadd.f32 %v4077_v49, %v3887_v14  ;;  %v2911_v36 = vpop.f32.mrb[11].mxu0 }
 0x1fc   : > { %v3521_v52 = vpack.c.bf16 %v4113_v29, %v4113_v29  ;;  %v4115_v7 = vadd.f32 %v2911_v36, %v1767_v43 }
 0x1fd   : > { %3174 = vst.msk [vmem:[%s5467_s24 + $0x28] sm:$0xf] %vm3163_vm5, %v3523_v0  ;;  %v3524_v23 = vpack.c.bf16 %v4114_v55, %v4114_v55 }
 0x1fe   : > { %3172 = vst.msk [vmem:[%s5467_s24 + $0x20] sm:$0xf] %vm3163_vm5, %v3521_v52  ;;  %v3522_v30 = vpack.c.bf16 %v4115_v7, %v4115_v7 }
 0x1ff   : > { %3175 = vst.msk [vmem:[%s5467_s24 + $0x2c] sm:$0xf] %vm3163_vm5, %v3524_v23 }
 0x200   : > { %3173 = vst.msk [vmem:[%s5467_s24 + $0x24] sm:$0xf] %vm3163_vm5, %v3522_v30  ;;  %v4080_v56 = vpop.f32.mrb[12].mxu0 }
 0x201   : > { %v4116_v13 = vadd.f32 %v4080_v56, %v3890_v20  ;;  %v2924_v2 = vpop.f32.mrb[13].mxu0 }
 0x202   : > { %v4117_v18 = vadd.f32 %v2924_v2, %v1780_v50  ;;  %v4081_v53 = vpop.f32.mrb[14].mxu0 }
 0x203   : > { %v3527_v37 = vpack.c.bf16 %v4116_v13, %v4116_v13  ;;  %v4118_v10 = vadd.f32 %v4081_v53, %v3891_v33  ;;  %v2927_v42 = vpop.f32.mrb[15].mxu0 }
 0x204   : > { %v3525_v19 = vpack.c.bf16 %v4117_v18, %v4117_v18  ;;  %v4119_v34 = vadd.f32 %v2927_v42, %v1783_v39 }
 0x205   : > { %3178 = vst.msk [vmem:[%s5467_s24 + $0x38] sm:$0xf] %vm3163_vm5, %v3527_v37  ;;  %v3528_v44 = vpack.c.bf16 %v4118_v10, %v4118_v10 }
 0x206   : > { %3176 = vst.msk [vmem:[%s5467_s24 + $0x30] sm:$0xf] %vm3163_vm5, %v3525_v19  ;;  %v3526_v16 = vpack.c.bf16 %v4119_v34, %v4119_v34 }
 0x207   : > { %3179 = vst.msk [vmem:[%s5467_s24 + $0x3c] sm:$0xf] %vm3163_vm5, %v3528_v44 }
 0x208   : > { %3177 = vst.msk [vmem:[%s5467_s24 + $0x34] sm:$0xf] %vm3163_vm5, %v3526_v16  ;;  %v4084_v35 = vpop.f32.mrb[16].mxu0 }
 0x209   : > { %v3932_v41 = vpop.f32.mrb[16].mxu1  ;;  %v2940_v15 = vpop.f32.mrb[17].mxu0 }
 0x20a   : > { %v2028_v48 = vpop.f32.mrb[17].mxu1  ;;  %v4120_v9 = vadd.f32 %v4084_v35, %v3932_v41  ;;  %v4085_v25 = vpop.f32.mrb[18].mxu0 }
 0x20b   : > { %v3933_v31 = vpop.f32.mrb[18].mxu1  ;;  %v4121_v60 = vadd.f32 %v2940_v15, %v2028_v48  ;;  %v2943_v32 = vpop.f32.mrb[19].mxu0 }
 0x20c   : > { %v3531_v1 = vpack.c.bf16 %v4120_v9, %v4120_v9  ;;  %v2031_v14 = vpop.f32.mrb[19].mxu1  ;;  %v4122_v43 = vadd.f32 %v4085_v25, %v3933_v31 }
 0x20d   : > { %v3529_v20 = vpack.c.bf16 %v4121_v60, %v4121_v60  ;;  %v4123_v50 = vadd.f32 %v2943_v32, %v2031_v14 }
 0x20e   : > { %3182 = vst.msk [vmem:[%s5467_s24 + $0x48] sm:$0xf] %vm3163_vm5, %v3531_v1  ;;  %v3532_v33 = vpack.c.bf16 %v4122_v43, %v4122_v43 }
 0x20f   : > { %3180 = vst.msk [vmem:[%s5467_s24 + $0x40] sm:$0xf] %vm3163_vm5, %v3529_v20  ;;  %v3530_v39 = vpack.c.bf16 %v4123_v50, %v4123_v50 }
 0x210   : > { %3183 = vst.msk [vmem:[%s5467_s24 + $0x4c] sm:$0xf] %vm3163_vm5, %v3532_v33  ;;  %v4088_v5 = vpop.f32.mrb[20].mxu0 }
 0x211   : > { %3181 = vst.msk [vmem:[%s5467_s24 + $0x44] sm:$0xf] %vm3163_vm5, %v3530_v39  ;;  %v3936_v26 = vpop.f32.mrb[20].mxu1  ;;  %v2956_v28 = vpop.f32.mrb[21].mxu0 }
 0x212   : > { %v2044_v62 = vpop.f32.mrb[21].mxu1  ;;  %v4124_v47 = vadd.f32 %v4088_v5, %v3936_v26  ;;  %v4089_v54 = vpop.f32.mrb[22].mxu0 }
 0x213   : > { %v3937_v22 = vpop.f32.mrb[22].mxu1  ;;  %v4125_v57 = vadd.f32 %v2956_v28, %v2044_v62  ;;  %v2959_v21 = vpop.f32.mrb[23].mxu0 }
 0x214   : > { %v3535_v27 = vpack.c.bf16 %v4124_v47, %v4124_v47  ;;  %v2047_v11 = vpop.f32.mrb[23].mxu1  ;;  %v4126_v24 = vadd.f32 %v4089_v54, %v3937_v22 }
 0x215   : > { %v3533_v6 = vpack.c.bf16 %v4125_v57, %v4125_v57  ;;  %v4127_v58 = vadd.f32 %v2959_v21, %v2047_v11 }
 0x216   : > { %3186 = vst.msk [vmem:[%s5467_s24 + $0x58] sm:$0xf] %vm3163_vm5, %v3535_v27  ;;  %v3536_v3 = vpack.c.bf16 %v4126_v24, %v4126_v24 }
 0x217   : > { %3184 = vst.msk [vmem:[%s5467_s24 + $0x50] sm:$0xf] %vm3163_vm5, %v3533_v6  ;;  %v3534_v61 = vpack.c.bf16 %v4127_v58, %v4127_v58 }
 0x218   : > { %3187 = vst.msk [vmem:[%s5467_s24 + $0x5c] sm:$0xf] %vm3163_vm5, %v3536_v3  ;;  %v4092_v4 = vpop.f32.mrb[24].mxu0 }
 0x219   : > { %3185 = vst.msk [vmem:[%s5467_s24 + $0x54] sm:$0xf] %vm3163_vm5, %v3534_v61  ;;  %v3940_v46 = vpop.f32.mrb[24].mxu1  ;;  %v2972_v59 = vpop.f32.mrb[25].mxu0 }
 0x21a   : > { %v2060_v51 = vpop.f32.mrb[25].mxu1  ;;  %v4128_v38 = vadd.f32 %v4092_v4, %v3940_v46  ;;  %v4093_v63 = vpop.f32.mrb[26].mxu0 }
 0x21b   : > { %v3941_v12 = vpop.f32.mrb[26].mxu1  ;;  %v4129_v8 = vadd.f32 %v2972_v59, %v2060_v51  ;;  %v2975_v40 = vpop.f32.mrb[27].mxu0 }
 0x21c   : > { %v3539_v45 = vpack.c.bf16 %v4128_v38, %v4128_v38  ;;  %v2063_v17 = vpop.f32.mrb[27].mxu1  ;;  %v4130_v29 = vadd.f32 %v4093_v63, %v3941_v12 }
 0x21d   : > { %v3537_v49 = vpack.c.bf16 %v4129_v8, %v4129_v8  ;;  %v4131_v0 = vadd.f32 %v2975_v40, %v2063_v17 }
 0x21e   : > { %3190 = vst.msk [vmem:[%s5467_s24 + $0x68] sm:$0xf] %vm3163_vm5, %v3539_v45  ;;  %v3540_v55 = vpack.c.bf16 %v4130_v29, %v4130_v29 }
 0x21f   : > { %3188 = vst.msk [vmem:[%s5467_s24 + $0x60] sm:$0xf] %vm3163_vm5, %v3537_v49  ;;  %v3538_v36 = vpack.c.bf16 %v4131_v0, %v4131_v0 }
 0x220   : > { %3191 = vst.msk [vmem:[%s5467_s24 + $0x6c] sm:$0xf] %vm3163_vm5, %v3540_v55  ;;  %v4096_v52 = vpop.f32.mrb[28].mxu0 }
 0x221   : > { %3189 = vst.msk [vmem:[%s5467_s24 + $0x64] sm:$0xf] %vm3163_vm5, %v3538_v36  ;;  %v3944_v7 = vpop.f32.mrb[28].mxu1  ;;  %v2988_v23 = vpop.f32.mrb[29].mxu0 }
 0x222   : > { %v2076_v30 = vpop.f32.mrb[29].mxu1  ;;  %v4132_v56 = vadd.f32 %v4096_v52, %v3944_v7  ;;  %v4097_v13 = vpop.f32.mrb[30].mxu0 }
 0x223   : > { %v3945_v2 = vpop.f32.mrb[30].mxu1  ;;  %v4133_v18 = vadd.f32 %v2988_v23, %v2076_v30  ;;  %v2991_v53 = vpop.f32.mrb[31].mxu0 }
 0x224   : > { %v3543_v37 = vpack.c.bf16 %v4132_v56, %v4132_v56  ;;  %v2079_v10 = vpop.f32.mrb[31].mxu1  ;;  %v4134_v42 = vadd.f32 %v4097_v13, %v3945_v2 }
 0x225   : > { %v3541_v19 = vpack.c.bf16 %v4133_v18, %v4133_v18  ;;  %v4135_v34 = vadd.f32 %v2991_v53, %v2079_v10 }
 0x226   : > { %3194 = vst.msk [vmem:[%s5467_s24 + $0x78] sm:$0xf] %vm3163_vm5, %v3543_v37  ;;  %v3544_v44 = vpack.c.bf16 %v4134_v42, %v4134_v42 }
 0x227   : > { %3192 = vst.msk [vmem:[%s5467_s24 + $0x70] sm:$0xf] %vm3163_vm5, %v3541_v19  ;;  %v3542_v16 = vpack.c.bf16 %v4135_v34, %v4135_v34 }
 0x228   : > { %3195 = vst.msk [vmem:[%s5467_s24 + $0x7c] sm:$0xf] %vm3163_vm5, %v3544_v44 }
 0x229   : > { %3193 = vst.msk [vmem:[%s5467_s24 + $0x74] sm:$0xf] %vm3163_vm5, %v3542_v16 }
 0x22a PF: > { %s16_s21 = sadd.s32 1, %s4409_s21  }
 0x22b   : > { %p13_p4 = scmp.ge.s32.totalorder %s16_s21, 4  }
 0x22d   :  { %15 = sbr.rel (!%p13_p4) target bundleno = 1 (0x1), region = 82 }

</bundles_post_ra>
